<compile_context>
chip_gen: v7x
topology: tpu7x:2x2x1
jax: 0.10.0
libtpu: 0.0.40
codegen_flags: <defaults>
</compile_context>

<pallas_src>
import functools
import numpy as np
import jax
import jax.numpy as jnp
from jax import lax
from jax.experimental import pallas as pl
from jax.experimental.pallas import tpu as pltpu

PATCH = 7
PAD = PATCH // 2            # conv2d(padding=3) with a 7x7 identity kernel
NCHAN = PATCH * PATCH       # 49
NOFF = NCHAN - 1            # 48 non-center offsets (center term is 0)


def _round_up(x, m):
    return ((x + m - 1) // m) * m


def _ternary_kernel(g0_ref, g1_ref, out_ref):
    """g0/g1/out refs: (THP, WP) zero-padded gray tiles, f32, lane-dense.

    Writes acc = sum over the 48 non-center offsets of 1/(0.1 + d_o);
    the wrapper finalizes  (48 - 0.1*acc)/49 * valid_mask.
    """
    g0 = g0_ref[...]
    g1 = g1_ref[...]
    nrow, ncol = g0.shape

    def recip_term(p0, p1):
        # one offset's 1/(0.1 + (f(t0)-f(t1))^2), f(x) = x * rsqrt(0.81 + x^2)
        t0 = p0 - g0
        t1 = p1 - g1
        t0n = t0 * lax.rsqrt(0.81 + t0 * t0)       # EUP rsqrt
        t1n = t1 * lax.rsqrt(0.81 + t1 * t1)
        diff = t0n - t1n
        d = diff * diff
        return pl.reciprocal(0.1 + d, approx=True)  # EUP reciprocal

    # Direct offsets: dy in {0,1,2} (all dx) and dy == 3 with dx in {0,1,2}.
    # Every mirrored offset (-o) is derived from the direct tile via rolls.
    acc = None
    for dy in range(PAD + 1):                       # dy = 0..3, oy = dy-3 <= 0
        oy = dy - PAD
        if dy == PAD:
            r0, r1 = g0, g1
            dx_range = range(PAD)                   # 0,1,2 (mirrors cover 4,5,6)
        else:
            sr = (PAD - dy) % nrow                  # shared sublane roll (XLU)
            r0 = pltpu.roll(g0, shift=sr, axis=0)
            r1 = pltpu.roll(g1, shift=sr, axis=0)
            dx_range = range(PATCH)                 # all dx
        acc_m = None                                # mirrored contribs, this dy
        for dx in dx_range:
            ox = dx - PAD
            if ox == 0:
                p0, p1 = r0, r1
            else:
                sc = (PAD - dx) % ncol
                p0 = pltpu.roll(r0, shift=sc, axis=1)   # lane roll (XLU)
                p1 = pltpu.roll(r1, shift=sc, axis=1)
            r = recip_term(p0, p1)
            acc = r if acc is None else acc + r
            # mirrored offset -o: lane-roll now; sublane-roll once per dy
            # (rolls are linear, so the sublane roll is batched over dx).
            m = r if ox == 0 else pltpu.roll(r, shift=ox % ncol, axis=1)
            acc_m = m if acc_m is None else acc_m + m
        if oy != 0:
            acc_m = pltpu.roll(acc_m, shift=oy % nrow, axis=0)
        acc = acc + acc_m

    out_ref[...] = acc


@functools.partial(jax.jit, static_argnames=("tile_h",))
def ternary_pallas(img0, img1, tile_h=256):
    """img0, img1: (N, 3, H, W) float32 NCHW. Returns (N, 1, H, W) float32."""
    N, C, H, W = img0.shape
    assert C == 3
    img0 = img0.astype(jnp.float32)
    img1 = img1.astype(jnp.float32)

    # rgb2gray is linear -> hoisted into this jit (fuses with the pad below);
    # the kernel then streams one gray channel per image.
    def rgb2gray(img):
        return 0.2989 * img[:, 0] + 0.587 * img[:, 1] + 0.114 * img[:, 2]

    g0 = rgb2gray(img0)   # (N, H, W)
    g1 = rgb2gray(img1)

    # ---- tiling --------------------------------------------------------------
    WP = _round_up(W + 2 * PAD, 128)              # lane-dense padded width
    # Keep ~18 live full-tile f32 buffers (3 pipelined arrays x 2 bufs + roll /
    # chain intermediates) under ~24 MiB so v7x (64 MiB physical) never spills.
    budget = 24 * 1024 * 1024
    max_thp = max(16, (budget // (18 * 4 * WP)) // 8 * 8)
    TH = max(8, min(tile_h, max_thp - 2 * PAD, _round_up(H, 8)))
    nH = pl.cdiv(H, TH)
    # v7x megacore: ensure >= 2 grid programs when there is enough H to split.
    if N * nH < 2 and H >= 32:
        TH = _round_up(pl.cdiv(H, 2), 8)
        nH = pl.cdiv(H, TH)
    THP = _round_up(TH + 2 * PAD, 8)              # padded tile rows (sublane-aligned)
    HP = (nH - 1) * TH + THP                      # rows covering every tile window

    def pad_and_tile(g):
        gp = jnp.zeros((N, HP, WP), jnp.float32)
        gp = gp.at[:, PAD:PAD + H, PAD:PAD + W].set(g)
        if nH == 1:
            return gp[:, None, :, :]              # no duplicated-halo copy needed
        # Overlapping H tiles with a 2*PAD halo, duplicated here so the kernel
        # keeps plain non-overlapping BlockSpecs with unmasked, aligned DMA.
        return jnp.stack([gp[:, j * TH:j * TH + THP, :] for j in range(nH)], axis=1)

    tiles0 = pad_and_tile(g0)                     # (N, nH, THP, WP)
    tiles1 = pad_and_tile(g1)

    acc_tiles = pl.pallas_call(
        _ternary_kernel,
        out_shape=jax.ShapeDtypeStruct((N, nH, THP, WP), jnp.float32),
        grid_spec=pltpu.PrefetchScalarGridSpec(
            num_scalar_prefetch=0,
            grid=(N, nH),
            in_specs=[
                pl.BlockSpec((None, None, THP, WP), lambda n, j: (n, j, 0, 0)),
                pl.BlockSpec((None, None, THP, WP), lambda n, j: (n, j, 0, 0)),
            ],
            out_specs=pl.BlockSpec((None, None, THP, WP), lambda n, j: (n, j, 0, 0)),
        ),
        compiler_params=pltpu.CompilerParams(
            dimension_semantics=("parallel", "parallel"),
            vmem_limit_bytes=48 * 1024 * 1024),
    )(tiles0, tiles1)

    # ---- fused epilogue: crop + algebraic fold + 1-px valid mask -------------
    acc = acc_tiles[:, :, PAD:PAD + TH, :].reshape(N, nH * TH, WP)
    acc = acc[:, :H, PAD:PAD + W]
    mask = jnp.zeros((H, W), jnp.float32).at[1:H - 1, 1:W - 1].set(1.0)
    out = ((float(NOFF) - 0.1 * acc) * (1.0 / NCHAN)) * mask
    return out[:, None, :, :]


# ------------------------------------------------------------------------------
# Pure-JAX reference (mirrors the PyTorch forward with the actual eye conv).
# ------------------------------------------------------------------------------
def _make_identity_patch_weights():
    w = np.eye(NCHAN).reshape((PATCH, PATCH, 1, NCHAN))
    w = np.transpose(w, (3, 2, 0, 1))  # (49, 1, 7, 7), OIHW
    return jnp.asarray(w, dtype=jnp.float32)


def ternary_reference(img0, img1, w):
    def rgb2gray(rgb):
        return 0.2989 * rgb[:, 0:1] + 0.587 * rgb[:, 1:2] + 0.114 * rgb[:, 2:3]

    def transform(img):
        patches = jax.lax.conv_general_dilated(
            img, w, window_strides=(1, 1), padding=[(PAD, PAD), (PAD, PAD)],
            dimension_numbers=("NCHW", "OIHW", "NCHW"))
        transf = patches - img
        return transf / jnp.sqrt(0.81 + transf ** 2)

    t0 = transform(rgb2gray(img0))
    t1 = transform(rgb2gray(img1))
    dist = (t0 - t1) ** 2
    dist_norm = jnp.mean(dist / (0.1 + dist), axis=1, keepdims=True)
    N, _, H, W = img0.shape
    mask = jnp.zeros((N, 1, H, W), jnp.float32).at[:, :, 1:-1, 1:-1].set(1.0)
    return dist_norm * mask


if __name__ == "__main__":
    key = jax.random.PRNGKey(0)
    k0, k1 = jax.random.split(key)
    N, C, H, W = 2, 3, 16, 16
    img0 = jax.random.uniform(k0, (N, C, H, W), dtype=jnp.float32)
    img1 = jax.random.uniform(k1, (N, C, H, W), dtype=jnp.float32)

    out = ternary_pallas(img0, img1)
    jax.block_until_ready(out)

    w = _make_identity_patch_weights()
    ref = ternary_reference(img0, img1, w)
    # approx=True reciprocal (EUP) leaves ~1e-4-level error per term; the
    # folded accumulation keeps it well inside this tolerance.
    np.testing.assert_allclose(np.asarray(out), np.asarray(ref),
                               atol=3e-3, rtol=3e-3)

    print("KERNEL_OK")
</pallas_src>

<mosaic_0001>
module attributes {stable_mosaic.version = 11 : i64} {
  func.func @_ternary_kernel(%arg0: i32, %arg1: i32, %arg2: memref<1x1x24x128xf32, #tpu.memory_space<vmem>>, %arg3: memref<1x1x24x128xf32, #tpu.memory_space<vmem>>, %arg4: memref<1x1x24x128xf32, #tpu.memory_space<vmem>>) attributes {dimension_semantics = [#tpu.dimension_semantics<parallel>, #tpu.dimension_semantics<parallel>], iteration_bounds = array<i64: 2, 1>, scalar_prefetch = 0 : i64, scratch_operands = 0 : i64, tpu.core_type = #tpu.core_type<tc>, window_params = [{transform_indices = @transform_0, window_bounds = array<i64: 1, 1, 24, 128>}, {transform_indices = @transform_1, window_bounds = array<i64: 1, 1, 24, 128>}, {transform_indices = @transform_2, window_bounds = array<i64: 1, 1, 24, 128>}]} {
    %c0 = arith.constant 0 : index
    %c0_0 = arith.constant 0 : index
    %c0_1 = arith.constant 0 : index
    %c0_2 = arith.constant 0 : index
    %0 = vector.load %arg2[%c0, %c0_0, %c0_1, %c0_2] : memref<1x1x24x128xf32, #tpu.memory_space<vmem>>, vector<1x1x24x128xf32>
    %1 = vector.shape_cast %0 : vector<1x1x24x128xf32> to vector<24x128xf32>
    %c0_3 = arith.constant 0 : index
    %c0_4 = arith.constant 0 : index
    %c0_5 = arith.constant 0 : index
    %c0_6 = arith.constant 0 : index
    %2 = vector.load %arg3[%c0_3, %c0_4, %c0_5, %c0_6] : memref<1x1x24x128xf32, #tpu.memory_space<vmem>>, vector<1x1x24x128xf32>
    %3 = vector.shape_cast %2 : vector<1x1x24x128xf32> to vector<24x128xf32>
    %c3_i32 = arith.constant 3 : i32
    %4 = tpu.dynamic_rotate %1 by %c3_i32 dim 0 : vector<24x128xf32>, i32 -> vector<24x128xf32>
    %c3_i32_7 = arith.constant 3 : i32
    %5 = tpu.dynamic_rotate %3 by %c3_i32_7 dim 0 : vector<24x128xf32>, i32 -> vector<24x128xf32>
    %c3_i32_8 = arith.constant 3 : i32
    %6 = tpu.dynamic_rotate %4 by %c3_i32_8 dim 1 : vector<24x128xf32>, i32 -> vector<24x128xf32>
    %c3_i32_9 = arith.constant 3 : i32
    %7 = tpu.dynamic_rotate %5 by %c3_i32_9 dim 1 : vector<24x128xf32>, i32 -> vector<24x128xf32>
    %8 = arith.subf %6, %1 : vector<24x128xf32>
    %9 = arith.subf %7, %3 : vector<24x128xf32>
    %10 = arith.mulf %8, %8 : vector<24x128xf32>
    %cst = arith.constant 8.100000e-01 : f32
    %11 = vector.broadcast %cst : f32 to vector<24x128xf32>
    %12 = arith.addf %11, %10 : vector<24x128xf32>
    %13 = math.rsqrt %12 : vector<24x128xf32>
    %14 = arith.mulf %8, %13 : vector<24x128xf32>
    %15 = arith.mulf %9, %9 : vector<24x128xf32>
    %cst_10 = arith.constant 8.100000e-01 : f32
    %16 = vector.broadcast %cst_10 : f32 to vector<24x128xf32>
    %17 = arith.addf %16, %15 : vector<24x128xf32>
    %18 = math.rsqrt %17 : vector<24x128xf32>
    %19 = arith.mulf %9, %18 : vector<24x128xf32>
    %20 = arith.subf %14, %19 : vector<24x128xf32>
    %21 = arith.mulf %20, %20 : vector<24x128xf32>
    %cst_11 = arith.constant 1.000000e-01 : f32
    %22 = vector.broadcast %cst_11 : f32 to vector<24x128xf32>
    %23 = arith.addf %22, %21 : vector<24x128xf32>
    %24 = tpu.reciprocal %23 {approx = true} : vector<24x128xf32> -> vector<24x128xf32>
    %c125_i32 = arith.constant 125 : i32
    %25 = tpu.dynamic_rotate %24 by %c125_i32 dim 1 : vector<24x128xf32>, i32 -> vector<24x128xf32>
    %c2_i32 = arith.constant 2 : i32
    %26 = tpu.dynamic_rotate %4 by %c2_i32 dim 1 : vector<24x128xf32>, i32 -> vector<24x128xf32>
    %c2_i32_12 = arith.constant 2 : i32
    %27 = tpu.dynamic_rotate %5 by %c2_i32_12 dim 1 : vector<24x128xf32>, i32 -> vector<24x128xf32>
    %28 = arith.subf %26, %1 : vector<24x128xf32>
    %29 = arith.subf %27, %3 : vector<24x128xf32>
    %30 = arith.mulf %28, %28 : vector<24x128xf32>
    %cst_13 = arith.constant 8.100000e-01 : f32
    %31 = vector.broadcast %cst_13 : f32 to vector<24x128xf32>
    %32 = arith.addf %31, %30 : vector<24x128xf32>
    %33 = math.rsqrt %32 : vector<24x128xf32>
    %34 = arith.mulf %28, %33 : vector<24x128xf32>
    %35 = arith.mulf %29, %29 : vector<24x128xf32>
    %cst_14 = arith.constant 8.100000e-01 : f32
    %36 = vector.broadcast %cst_14 : f32 to vector<24x128xf32>
    %37 = arith.addf %36, %35 : vector<24x128xf32>
    %38 = math.rsqrt %37 : vector<24x128xf32>
    %39 = arith.mulf %29, %38 : vector<24x128xf32>
    %40 = arith.subf %34, %39 : vector<24x128xf32>
    %41 = arith.mulf %40, %40 : vector<24x128xf32>
    %cst_15 = arith.constant 1.000000e-01 : f32
    %42 = vector.broadcast %cst_15 : f32 to vector<24x128xf32>
    %43 = arith.addf %42, %41 : vector<24x128xf32>
    %44 = tpu.reciprocal %43 {approx = true} : vector<24x128xf32> -> vector<24x128xf32>
    %45 = arith.addf %24, %44 : vector<24x128xf32>
    %c126_i32 = arith.constant 126 : i32
    %46 = tpu.dynamic_rotate %44 by %c126_i32 dim 1 : vector<24x128xf32>, i32 -> vector<24x128xf32>
    %47 = arith.addf %25, %46 : vector<24x128xf32>
    %c1_i32 = arith.constant 1 : i32
    %48 = tpu.dynamic_rotate %4 by %c1_i32 dim 1 : vector<24x128xf32>, i32 -> vector<24x128xf32>
    %c1_i32_16 = arith.constant 1 : i32
    %49 = tpu.dynamic_rotate %5 by %c1_i32_16 dim 1 : vector<24x128xf32>, i32 -> vector<24x128xf32>
    %50 = arith.subf %48, %1 : vector<24x128xf32>
    %51 = arith.subf %49, %3 : vector<24x128xf32>
    %52 = arith.mulf %50, %50 : vector<24x128xf32>
    %cst_17 = arith.constant 8.100000e-01 : f32
    %53 = vector.broadcast %cst_17 : f32 to vector<24x128xf32>
    %54 = arith.addf %53, %52 : vector<24x128xf32>
    %55 = math.rsqrt %54 : vector<24x128xf32>
    %56 = arith.mulf %50, %55 : vector<24x128xf32>
    %57 = arith.mulf %51, %51 : vector<24x128xf32>
    %cst_18 = arith.constant 8.100000e-01 : f32
    %58 = vector.broadcast %cst_18 : f32 to vector<24x128xf32>
    %59 = arith.addf %58, %57 : vector<24x128xf32>
    %60 = math.rsqrt %59 : vector<24x128xf32>
    %61 = arith.mulf %51, %60 : vector<24x128xf32>
    %62 = arith.subf %56, %61 : vector<24x128xf32>
    %63 = arith.mulf %62, %62 : vector<24x128xf32>
    %cst_19 = arith.constant 1.000000e-01 : f32
    %64 = vector.broadcast %cst_19 : f32 to vector<24x128xf32>
    %65 = arith.addf %64, %63 : vector<24x128xf32>
    %66 = tpu.reciprocal %65 {approx = true} : vector<24x128xf32> -> vector<24x128xf32>
    %67 = arith.addf %45, %66 : vector<24x128xf32>
    %c127_i32 = arith.constant 127 : i32
    %68 = tpu.dynamic_rotate %66 by %c127_i32 dim 1 : vector<24x128xf32>, i32 -> vector<24x128xf32>
    %69 = arith.addf %47, %68 : vector<24x128xf32>
    %70 = arith.subf %4, %1 : vector<24x128xf32>
    %71 = arith.subf %5, %3 : vector<24x128xf32>
    %72 = arith.mulf %70, %70 : vector<24x128xf32>
    %cst_20 = arith.constant 8.100000e-01 : f32
    %73 = vector.broadcast %cst_20 : f32 to vector<24x128xf32>
    %74 = arith.addf %73, %72 : vector<24x128xf32>
    %75 = math.rsqrt %74 : vector<24x128xf32>
    %76 = arith.mulf %70, %75 : vector<24x128xf32>
    %77 = arith.mulf %71, %71 : vector<24x128xf32>
    %cst_21 = arith.constant 8.100000e-01 : f32
    %78 = vector.broadcast %cst_21 : f32 to vector<24x128xf32>
    %79 = arith.addf %78, %77 : vector<24x128xf32>
    %80 = math.rsqrt %79 : vector<24x128xf32>
    %81 = arith.mulf %71, %80 : vector<24x128xf32>
    %82 = arith.subf %76, %81 : vector<24x128xf32>
    %83 = arith.mulf %82, %82 : vector<24x128xf32>
    %cst_22 = arith.constant 1.000000e-01 : f32
    %84 = vector.broadcast %cst_22 : f32 to vector<24x128xf32>
    %85 = arith.addf %84, %83 : vector<24x128xf32>
    %86 = tpu.reciprocal %85 {approx = true} : vector<24x128xf32> -> vector<24x128xf32>
    %87 = arith.addf %67, %86 : vector<24x128xf32>
    %88 = arith.addf %69, %86 : vector<24x128xf32>
    %c127_i32_23 = arith.constant 127 : i32
    %89 = tpu.dynamic_rotate %4 by %c127_i32_23 dim 1 : vector<24x128xf32>, i32 -> vector<24x128xf32>
    %c127_i32_24 = arith.constant 127 : i32
    %90 = tpu.dynamic_rotate %5 by %c127_i32_24 dim 1 : vector<24x128xf32>, i32 -> vector<24x128xf32>
    %91 = arith.subf %89, %1 : vector<24x128xf32>
    %92 = arith.subf %90, %3 : vector<24x128xf32>
    %93 = arith.mulf %91, %91 : vector<24x128xf32>
    %cst_25 = arith.constant 8.100000e-01 : f32
    %94 = vector.broadcast %cst_25 : f32 to vector<24x128xf32>
    %95 = arith.addf %94, %93 : vector<24x128xf32>
    %96 = math.rsqrt %95 : vector<24x128xf32>
    %97 = arith.mulf %91, %96 : vector<24x128xf32>
    %98 = arith.mulf %92, %92 : vector<24x128xf32>
    %cst_26 = arith.constant 8.100000e-01 : f32
    %99 = vector.broadcast %cst_26 : f32 to vector<24x128xf32>
    %100 = arith.addf %99, %98 : vector<24x128xf32>
    %101 = math.rsqrt %100 : vector<24x128xf32>
    %102 = arith.mulf %92, %101 : vector<24x128xf32>
    %103 = arith.subf %97, %102 : vector<24x128xf32>
    %104 = arith.mulf %103, %103 : vector<24x128xf32>
    %cst_27 = arith.constant 1.000000e-01 : f32
    %105 = vector.broadcast %cst_27 : f32 to vector<24x128xf32>
    %106 = arith.addf %105, %104 : vector<24x128xf32>
    %107 = tpu.reciprocal %106 {approx = true} : vector<24x128xf32> -> vector<24x128xf32>
    %108 = arith.addf %87, %107 : vector<24x128xf32>
    %c1_i32_28 = arith.constant 1 : i32
    %109 = tpu.dynamic_rotate %107 by %c1_i32_28 dim 1 : vector<24x128xf32>, i32 -> vector<24x128xf32>
    %110 = arith.addf %88, %109 : vector<24x128xf32>
    %c126_i32_29 = arith.constant 126 : i32
    %111 = tpu.dynamic_rotate %4 by %c126_i32_29 dim 1 : vector<24x128xf32>, i32 -> vector<24x128xf32>
    %c126_i32_30 = arith.constant 126 : i32
    %112 = tpu.dynamic_rotate %5 by %c126_i32_30 dim 1 : vector<24x128xf32>, i32 -> vector<24x128xf32>
    %113 = arith.subf %111, %1 : vector<24x128xf32>
    %114 = arith.subf %112, %3 : vector<24x128xf32>
    %115 = arith.mulf %113, %113 : vector<24x128xf32>
    %cst_31 = arith.constant 8.100000e-01 : f32
    %116 = vector.broadcast %cst_31 : f32 to vector<24x128xf32>
    %117 = arith.addf %116, %115 : vector<24x128xf32>
    %118 = math.rsqrt %117 : vector<24x128xf32>
    %119 = arith.mulf %113, %118 : vector<24x128xf32>
    %120 = arith.mulf %114, %114 : vector<24x128xf32>
    %cst_32 = arith.constant 8.100000e-01 : f32
    %121 = vector.broadcast %cst_32 : f32 to vector<24x128xf32>
    %122 = arith.addf %121, %120 : vector<24x128xf32>
    %123 = math.rsqrt %122 : vector<24x128xf32>
    %124 = arith.mulf %114, %123 : vector<24x128xf32>
    %125 = arith.subf %119, %124 : vector<24x128xf32>
    %126 = arith.mulf %125, %125 : vector<24x128xf32>
    %cst_33 = arith.constant 1.000000e-01 : f32
    %127 = vector.broadcast %cst_33 : f32 to vector<24x128xf32>
    %128 = arith.addf %127, %126 : vector<24x128xf32>
    %129 = tpu.reciprocal %128 {approx = true} : vector<24x128xf32> -> vector<24x128xf32>
    %130 = arith.addf %108, %129 : vector<24x128xf32>
    %c2_i32_34 = arith.constant 2 : i32
    %131 = tpu.dynamic_rotate %129 by %c2_i32_34 dim 1 : vector<24x128xf32>, i32 -> vector<24x128xf32>
    %132 = arith.addf %110, %131 : vector<24x128xf32>
    %c125_i32_35 = arith.constant 125 : i32
    %133 = tpu.dynamic_rotate %4 by %c125_i32_35 dim 1 : vector<24x128xf32>, i32 -> vector<24x128xf32>
    %c125_i32_36 = arith.constant 125 : i32
    %134 = tpu.dynamic_rotate %5 by %c125_i32_36 dim 1 : vector<24x128xf32>, i32 -> vector<24x128xf32>
    %135 = arith.subf %133, %1 : vector<24x128xf32>
    %136 = arith.subf %134, %3 : vector<24x128xf32>
    %137 = arith.mulf %135, %135 : vector<24x128xf32>
    %cst_37 = arith.constant 8.100000e-01 : f32
    %138 = vector.broadcast %cst_37 : f32 to vector<24x128xf32>
    %139 = arith.addf %138, %137 : vector<24x128xf32>
    %140 = math.rsqrt %139 : vector<24x128xf32>
    %141 = arith.mulf %135, %140 : vector<24x128xf32>
    %142 = arith.mulf %136, %136 : vector<24x128xf32>
    %cst_38 = arith.constant 8.100000e-01 : f32
    %143 = vector.broadcast %cst_38 : f32 to vector<24x128xf32>
    %144 = arith.addf %143, %142 : vector<24x128xf32>
    %145 = math.rsqrt %144 : vector<24x128xf32>
    %146 = arith.mulf %136, %145 : vector<24x128xf32>
    %147 = arith.subf %141, %146 : vector<24x128xf32>
    %148 = arith.mulf %147, %147 : vector<24x128xf32>
    %cst_39 = arith.constant 1.000000e-01 : f32
    %149 = vector.broadcast %cst_39 : f32 to vector<24x128xf32>
    %150 = arith.addf %149, %148 : vector<24x128xf32>
    %151 = tpu.reciprocal %150 {approx = true} : vector<24x128xf32> -> vector<24x128xf32>
    %152 = arith.addf %130, %151 : vector<24x128xf32>
    %c3_i32_40 = arith.constant 3 : i32
    %153 = tpu.dynamic_rotate %151 by %c3_i32_40 dim 1 : vector<24x128xf32>, i32 -> vector<24x128xf32>
    %154 = arith.addf %132, %153 : vector<24x128xf32>
    %c21_i32 = arith.constant 21 : i32
    %155 = tpu.dynamic_rotate %154 by %c21_i32 dim 0 : vector<24x128xf32>, i32 -> vector<24x128xf32>
    %156 = arith.addf %152, %155 : vector<24x128xf32>
    %c2_i32_41 = arith.constant 2 : i32
    %157 = tpu.dynamic_rotate %1 by %c2_i32_41 dim 0 : vector<24x128xf32>, i32 -> vector<24x128xf32>
    %c2_i32_42 = arith.constant 2 : i32
    %158 = tpu.dynamic_rotate %3 by %c2_i32_42 dim 0 : vector<24x128xf32>, i32 -> vector<24x128xf32>
    %c3_i32_43 = arith.constant 3 : i32
    %159 = tpu.dynamic_rotate %157 by %c3_i32_43 dim 1 : vector<24x128xf32>, i32 -> vector<24x128xf32>
    %c3_i32_44 = arith.constant 3 : i32
    %160 = tpu.dynamic_rotate %158 by %c3_i32_44 dim 1 : vector<24x128xf32>, i32 -> vector<24x128xf32>
    %161 = arith.subf %159, %1 : vector<24x128xf32>
    %162 = arith.subf %160, %3 : vector<24x128xf32>
    %163 = arith.mulf %161, %161 : vector<24x128xf32>
    %cst_45 = arith.constant 8.100000e-01 : f32
    %164 = vector.broadcast %cst_45 : f32 to vector<24x128xf32>
    %165 = arith.addf %164, %163 : vector<24x128xf32>
    %166 = math.rsqrt %165 : vector<24x128xf32>
    %167 = arith.mulf %161, %166 : vector<24x128xf32>
    %168 = arith.mulf %162, %162 : vector<24x128xf32>
    %cst_46 = arith.constant 8.100000e-01 : f32
    %169 = vector.broadcast %cst_46 : f32 to vector<24x128xf32>
    %170 = arith.addf %169, %168 : vector<24x128xf32>
    %171 = math.rsqrt %170 : vector<24x128xf32>
    %172 = arith.mulf %162, %171 : vector<24x128xf32>
    %173 = arith.subf %167, %172 : vector<24x128xf32>
    %174 = arith.mulf %173, %173 : vector<24x128xf32>
    %cst_47 = arith.constant 1.000000e-01 : f32
    %175 = vector.broadcast %cst_47 : f32 to vector<24x128xf32>
    %176 = arith.addf %175, %174 : vector<24x128xf32>
    %177 = tpu.reciprocal %176 {approx = true} : vector<24x128xf32> -> vector<24x128xf32>
    %178 = arith.addf %156, %177 : vector<24x128xf32>
    %c125_i32_48 = arith.constant 125 : i32
    %179 = tpu.dynamic_rotate %177 by %c125_i32_48 dim 1 : vector<24x128xf32>, i32 -> vector<24x128xf32>
    %c2_i32_49 = arith.constant 2 : i32
    %180 = tpu.dynamic_rotate %157 by %c2_i32_49 dim 1 : vector<24x128xf32>, i32 -> vector<24x128xf32>
    %c2_i32_50 = arith.constant 2 : i32
    %181 = tpu.dynamic_rotate %158 by %c2_i32_50 dim 1 : vector<24x128xf32>, i32 -> vector<24x128xf32>
    %182 = arith.subf %180, %1 : vector<24x128xf32>
    %183 = arith.subf %181, %3 : vector<24x128xf32>
    %184 = arith.mulf %182, %182 : vector<24x128xf32>
    %cst_51 = arith.constant 8.100000e-01 : f32
    %185 = vector.broadcast %cst_51 : f32 to vector<24x128xf32>
    %186 = arith.addf %185, %184 : vector<24x128xf32>
    %187 = math.rsqrt %186 : vector<24x128xf32>
    %188 = arith.mulf %182, %187 : vector<24x128xf32>
    %189 = arith.mulf %183, %183 : vector<24x128xf32>
    %cst_52 = arith.constant 8.100000e-01 : f32
    %190 = vector.broadcast %cst_52 : f32 to vector<24x128xf32>
    %191 = arith.addf %190, %189 : vector<24x128xf32>
    %192 = math.rsqrt %191 : vector<24x128xf32>
    %193 = arith.mulf %183, %192 : vector<24x128xf32>
    %194 = arith.subf %188, %193 : vector<24x128xf32>
    %195 = arith.mulf %194, %194 : vector<24x128xf32>
    %cst_53 = arith.constant 1.000000e-01 : f32
    %196 = vector.broadcast %cst_53 : f32 to vector<24x128xf32>
    %197 = arith.addf %196, %195 : vector<24x128xf32>
    %198 = tpu.reciprocal %197 {approx = true} : vector<24x128xf32> -> vector<24x128xf32>
    %199 = arith.addf %178, %198 : vector<24x128xf32>
    %c126_i32_54 = arith.constant 126 : i32
    %200 = tpu.dynamic_rotate %198 by %c126_i32_54 dim 1 : vector<24x128xf32>, i32 -> vector<24x128xf32>
    %201 = arith.addf %179, %200 : vector<24x128xf32>
    %c1_i32_55 = arith.constant 1 : i32
    %202 = tpu.dynamic_rotate %157 by %c1_i32_55 dim 1 : vector<24x128xf32>, i32 -> vector<24x128xf32>
    %c1_i32_56 = arith.constant 1 : i32
    %203 = tpu.dynamic_rotate %158 by %c1_i32_56 dim 1 : vector<24x128xf32>, i32 -> vector<24x128xf32>
    %204 = arith.subf %202, %1 : vector<24x128xf32>
    %205 = arith.subf %203, %3 : vector<24x128xf32>
    %206 = arith.mulf %204, %204 : vector<24x128xf32>
    %cst_57 = arith.constant 8.100000e-01 : f32
    %207 = vector.broadcast %cst_57 : f32 to vector<24x128xf32>
    %208 = arith.addf %207, %206 : vector<24x128xf32>
    %209 = math.rsqrt %208 : vector<24x128xf32>
    %210 = arith.mulf %204, %209 : vector<24x128xf32>
    %211 = arith.mulf %205, %205 : vector<24x128xf32>
    %cst_58 = arith.constant 8.100000e-01 : f32
    %212 = vector.broadcast %cst_58 : f32 to vector<24x128xf32>
    %213 = arith.addf %212, %211 : vector<24x128xf32>
    %214 = math.rsqrt %213 : vector<24x128xf32>
    %215 = arith.mulf %205, %214 : vector<24x128xf32>
    %216 = arith.subf %210, %215 : vector<24x128xf32>
    %217 = arith.mulf %216, %216 : vector<24x128xf32>
    %cst_59 = arith.constant 1.000000e-01 : f32
    %218 = vector.broadcast %cst_59 : f32 to vector<24x128xf32>
    %219 = arith.addf %218, %217 : vector<24x128xf32>
    %220 = tpu.reciprocal %219 {approx = true} : vector<24x128xf32> -> vector<24x128xf32>
    %221 = arith.addf %199, %220 : vector<24x128xf32>
    %c127_i32_60 = arith.constant 127 : i32
    %222 = tpu.dynamic_rotate %220 by %c127_i32_60 dim 1 : vector<24x128xf32>, i32 -> vector<24x128xf32>
    %223 = arith.addf %201, %222 : vector<24x128xf32>
    %224 = arith.subf %157, %1 : vector<24x128xf32>
    %225 = arith.subf %158, %3 : vector<24x128xf32>
    %226 = arith.mulf %224, %224 : vector<24x128xf32>
    %cst_61 = arith.constant 8.100000e-01 : f32
    %227 = vector.broadcast %cst_61 : f32 to vector<24x128xf32>
    %228 = arith.addf %227, %226 : vector<24x128xf32>
    %229 = math.rsqrt %228 : vector<24x128xf32>
    %230 = arith.mulf %224, %229 : vector<24x128xf32>
    %231 = arith.mulf %225, %225 : vector<24x128xf32>
    %cst_62 = arith.constant 8.100000e-01 : f32
    %232 = vector.broadcast %cst_62 : f32 to vector<24x128xf32>
    %233 = arith.addf %232, %231 : vector<24x128xf32>
    %234 = math.rsqrt %233 : vector<24x128xf32>
    %235 = arith.mulf %225, %234 : vector<24x128xf32>
    %236 = arith.subf %230, %235 : vector<24x128xf32>
    %237 = arith.mulf %236, %236 : vector<24x128xf32>
    %cst_63 = arith.constant 1.000000e-01 : f32
    %238 = vector.broadcast %cst_63 : f32 to vector<24x128xf32>
    %239 = arith.addf %238, %237 : vector<24x128xf32>
    %240 = tpu.reciprocal %239 {approx = true} : vector<24x128xf32> -> vector<24x128xf32>
    %241 = arith.addf %221, %240 : vector<24x128xf32>
    %242 = arith.addf %223, %240 : vector<24x128xf32>
    %c127_i32_64 = arith.constant 127 : i32
    %243 = tpu.dynamic_rotate %157 by %c127_i32_64 dim 1 : vector<24x128xf32>, i32 -> vector<24x128xf32>
    %c127_i32_65 = arith.constant 127 : i32
    %244 = tpu.dynamic_rotate %158 by %c127_i32_65 dim 1 : vector<24x128xf32>, i32 -> vector<24x128xf32>
    %245 = arith.subf %243, %1 : vector<24x128xf32>
    %246 = arith.subf %244, %3 : vector<24x128xf32>
    %247 = arith.mulf %245, %245 : vector<24x128xf32>
    %cst_66 = arith.constant 8.100000e-01 : f32
    %248 = vector.broadcast %cst_66 : f32 to vector<24x128xf32>
    %249 = arith.addf %248, %247 : vector<24x128xf32>
    %250 = math.rsqrt %249 : vector<24x128xf32>
    %251 = arith.mulf %245, %250 : vector<24x128xf32>
    %252 = arith.mulf %246, %246 : vector<24x128xf32>
    %cst_67 = arith.constant 8.100000e-01 : f32
    %253 = vector.broadcast %cst_67 : f32 to vector<24x128xf32>
    %254 = arith.addf %253, %252 : vector<24x128xf32>
    %255 = math.rsqrt %254 : vector<24x128xf32>
    %256 = arith.mulf %246, %255 : vector<24x128xf32>
    %257 = arith.subf %251, %256 : vector<24x128xf32>
    %258 = arith.mulf %257, %257 : vector<24x128xf32>
    %cst_68 = arith.constant 1.000000e-01 : f32
    %259 = vector.broadcast %cst_68 : f32 to vector<24x128xf32>
    %260 = arith.addf %259, %258 : vector<24x128xf32>
    %261 = tpu.reciprocal %260 {approx = true} : vector<24x128xf32> -> vector<24x128xf32>
    %262 = arith.addf %241, %261 : vector<24x128xf32>
    %c1_i32_69 = arith.constant 1 : i32
    %263 = tpu.dynamic_rotate %261 by %c1_i32_69 dim 1 : vector<24x128xf32>, i32 -> vector<24x128xf32>
    %264 = arith.addf %242, %263 : vector<24x128xf32>
    %c126_i32_70 = arith.constant 126 : i32
    %265 = tpu.dynamic_rotate %157 by %c126_i32_70 dim 1 : vector<24x128xf32>, i32 -> vector<24x128xf32>
    %c126_i32_71 = arith.constant 126 : i32
    %266 = tpu.dynamic_rotate %158 by %c126_i32_71 dim 1 : vector<24x128xf32>, i32 -> vector<24x128xf32>
    %267 = arith.subf %265, %1 : vector<24x128xf32>
    %268 = arith.subf %266, %3 : vector<24x128xf32>
    %269 = arith.mulf %267, %267 : vector<24x128xf32>
    %cst_72 = arith.constant 8.100000e-01 : f32
    %270 = vector.broadcast %cst_72 : f32 to vector<24x128xf32>
    %271 = arith.addf %270, %269 : vector<24x128xf32>
    %272 = math.rsqrt %271 : vector<24x128xf32>
    %273 = arith.mulf %267, %272 : vector<24x128xf32>
    %274 = arith.mulf %268, %268 : vector<24x128xf32>
    %cst_73 = arith.constant 8.100000e-01 : f32
    %275 = vector.broadcast %cst_73 : f32 to vector<24x128xf32>
    %276 = arith.addf %275, %274 : vector<24x128xf32>
    %277 = math.rsqrt %276 : vector<24x128xf32>
    %278 = arith.mulf %268, %277 : vector<24x128xf32>
    %279 = arith.subf %273, %278 : vector<24x128xf32>
    %280 = arith.mulf %279, %279 : vector<24x128xf32>
    %cst_74 = arith.constant 1.000000e-01 : f32
    %281 = vector.broadcast %cst_74 : f32 to vector<24x128xf32>
    %282 = arith.addf %281, %280 : vector<24x128xf32>
    %283 = tpu.reciprocal %282 {approx = true} : vector<24x128xf32> -> vector<24x128xf32>
    %284 = arith.addf %262, %283 : vector<24x128xf32>
    %c2_i32_75 = arith.constant 2 : i32
    %285 = tpu.dynamic_rotate %283 by %c2_i32_75 dim 1 : vector<24x128xf32>, i32 -> vector<24x128xf32>
    %286 = arith.addf %264, %285 : vector<24x128xf32>
    %c125_i32_76 = arith.constant 125 : i32
    %287 = tpu.dynamic_rotate %157 by %c125_i32_76 dim 1 : vector<24x128xf32>, i32 -> vector<24x128xf32>
    %c125_i32_77 = arith.constant 125 : i32
    %288 = tpu.dynamic_rotate %158 by %c125_i32_77 dim 1 : vector<24x128xf32>, i32 -> vector<24x128xf32>
    %289 = arith.subf %287, %1 : vector<24x128xf32>
    %290 = arith.subf %288, %3 : vector<24x128xf32>
    %291 = arith.mulf %289, %289 : vector<24x128xf32>
    %cst_78 = arith.constant 8.100000e-01 : f32
    %292 = vector.broadcast %cst_78 : f32 to vector<24x128xf32>
    %293 = arith.addf %292, %291 : vector<24x128xf32>
    %294 = math.rsqrt %293 : vector<24x128xf32>
    %295 = arith.mulf %289, %294 : vector<24x128xf32>
    %296 = arith.mulf %290, %290 : vector<24x128xf32>
    %cst_79 = arith.constant 8.100000e-01 : f32
    %297 = vector.broadcast %cst_79 : f32 to vector<24x128xf32>
    %298 = arith.addf %297, %296 : vector<24x128xf32>
    %299 = math.rsqrt %298 : vector<24x128xf32>
    %300 = arith.mulf %290, %299 : vector<24x128xf32>
    %301 = arith.subf %295, %300 : vector<24x128xf32>
    %302 = arith.mulf %301, %301 : vector<24x128xf32>
    %cst_80 = arith.constant 1.000000e-01 : f32
    %303 = vector.broadcast %cst_80 : f32 to vector<24x128xf32>
    %304 = arith.addf %303, %302 : vector<24x128xf32>
    %305 = tpu.reciprocal %304 {approx = true} : vector<24x128xf32> -> vector<24x128xf32>
    %306 = arith.addf %284, %305 : vector<24x128xf32>
    %c3_i32_81 = arith.constant 3 : i32
    %307 = tpu.dynamic_rotate %305 by %c3_i32_81 dim 1 : vector<24x128xf32>, i32 -> vector<24x128xf32>
    %308 = arith.addf %286, %307 : vector<24x128xf32>
    %c22_i32 = arith.constant 22 : i32
    %309 = tpu.dynamic_rotate %308 by %c22_i32 dim 0 : vector<24x128xf32>, i32 -> vector<24x128xf32>
    %310 = arith.addf %306, %309 : vector<24x128xf32>
    %c1_i32_82 = arith.constant 1 : i32
    %311 = tpu.dynamic_rotate %1 by %c1_i32_82 dim 0 : vector<24x128xf32>, i32 -> vector<24x128xf32>
    %c1_i32_83 = arith.constant 1 : i32
    %312 = tpu.dynamic_rotate %3 by %c1_i32_83 dim 0 : vector<24x128xf32>, i32 -> vector<24x128xf32>
    %c3_i32_84 = arith.constant 3 : i32
    %313 = tpu.dynamic_rotate %311 by %c3_i32_84 dim 1 : vector<24x128xf32>, i32 -> vector<24x128xf32>
    %c3_i32_85 = arith.constant 3 : i32
    %314 = tpu.dynamic_rotate %312 by %c3_i32_85 dim 1 : vector<24x128xf32>, i32 -> vector<24x128xf32>
    %315 = arith.subf %313, %1 : vector<24x128xf32>
    %316 = arith.subf %314, %3 : vector<24x128xf32>
    %317 = arith.mulf %315, %315 : vector<24x128xf32>
    %cst_86 = arith.constant 8.100000e-01 : f32
    %318 = vector.broadcast %cst_86 : f32 to vector<24x128xf32>
    %319 = arith.addf %318, %317 : vector<24x128xf32>
    %320 = math.rsqrt %319 : vector<24x128xf32>
    %321 = arith.mulf %315, %320 : vector<24x128xf32>
    %322 = arith.mulf %316, %316 : vector<24x128xf32>
    %cst_87 = arith.constant 8.100000e-01 : f32
    %323 = vector.broadcast %cst_87 : f32 to vector<24x128xf32>
    %324 = arith.addf %323, %322 : vector<24x128xf32>
    %325 = math.rsqrt %324 : vector<24x128xf32>
    %326 = arith.mulf %316, %325 : vector<24x128xf32>
    %327 = arith.subf %321, %326 : vector<24x128xf32>
    %328 = arith.mulf %327, %327 : vector<24x128xf32>
    %cst_88 = arith.constant 1.000000e-01 : f32
    %329 = vector.broadcast %cst_88 : f32 to vector<24x128xf32>
    %330 = arith.addf %329, %328 : vector<24x128xf32>
    %331 = tpu.reciprocal %330 {approx = true} : vector<24x128xf32> -> vector<24x128xf32>
    %332 = arith.addf %310, %331 : vector<24x128xf32>
    %c125_i32_89 = arith.constant 125 : i32
    %333 = tpu.dynamic_rotate %331 by %c125_i32_89 dim 1 : vector<24x128xf32>, i32 -> vector<24x128xf32>
    %c2_i32_90 = arith.constant 2 : i32
    %334 = tpu.dynamic_rotate %311 by %c2_i32_90 dim 1 : vector<24x128xf32>, i32 -> vector<24x128xf32>
    %c2_i32_91 = arith.constant 2 : i32
    %335 = tpu.dynamic_rotate %312 by %c2_i32_91 dim 1 : vector<24x128xf32>, i32 -> vector<24x128xf32>
    %336 = arith.subf %334, %1 : vector<24x128xf32>
    %337 = arith.subf %335, %3 : vector<24x128xf32>
    %338 = arith.mulf %336, %336 : vector<24x128xf32>
    %cst_92 = arith.constant 8.100000e-01 : f32
    %339 = vector.broadcast %cst_92 : f32 to vector<24x128xf32>
    %340 = arith.addf %339, %338 : vector<24x128xf32>
    %341 = math.rsqrt %340 : vector<24x128xf32>
    %342 = arith.mulf %336, %341 : vector<24x128xf32>
    %343 = arith.mulf %337, %337 : vector<24x128xf32>
    %cst_93 = arith.constant 8.100000e-01 : f32
    %344 = vector.broadcast %cst_93 : f32 to vector<24x128xf32>
    %345 = arith.addf %344, %343 : vector<24x128xf32>
    %346 = math.rsqrt %345 : vector<24x128xf32>
    %347 = arith.mulf %337, %346 : vector<24x128xf32>
    %348 = arith.subf %342, %347 : vector<24x128xf32>
    %349 = arith.mulf %348, %348 : vector<24x128xf32>
    %cst_94 = arith.constant 1.000000e-01 : f32
    %350 = vector.broadcast %cst_94 : f32 to vector<24x128xf32>
    %351 = arith.addf %350, %349 : vector<24x128xf32>
    %352 = tpu.reciprocal %351 {approx = true} : vector<24x128xf32> -> vector<24x128xf32>
    %353 = arith.addf %332, %352 : vector<24x128xf32>
    %c126_i32_95 = arith.constant 126 : i32
    %354 = tpu.dynamic_rotate %352 by %c126_i32_95 dim 1 : vector<24x128xf32>, i32 -> vector<24x128xf32>
    %355 = arith.addf %333, %354 : vector<24x128xf32>
    %c1_i32_96 = arith.constant 1 : i32
    %356 = tpu.dynamic_rotate %311 by %c1_i32_96 dim 1 : vector<24x128xf32>, i32 -> vector<24x128xf32>
    %c1_i32_97 = arith.constant 1 : i32
    %357 = tpu.dynamic_rotate %312 by %c1_i32_97 dim 1 : vector<24x128xf32>, i32 -> vector<24x128xf32>
    %358 = arith.subf %356, %1 : vector<24x128xf32>
    %359 = arith.subf %357, %3 : vector<24x128xf32>
    %360 = arith.mulf %358, %358 : vector<24x128xf32>
    %cst_98 = arith.constant 8.100000e-01 : f32
    %361 = vector.broadcast %cst_98 : f32 to vector<24x128xf32>
    %362 = arith.addf %361, %360 : vector<24x128xf32>
    %363 = math.rsqrt %362 : vector<24x128xf32>
    %364 = arith.mulf %358, %363 : vector<24x128xf32>
    %365 = arith.mulf %359, %359 : vector<24x128xf32>
    %cst_99 = arith.constant 8.100000e-01 : f32
    %366 = vector.broadcast %cst_99 : f32 to vector<24x128xf32>
    %367 = arith.addf %366, %365 : vector<24x128xf32>
    %368 = math.rsqrt %367 : vector<24x128xf32>
    %369 = arith.mulf %359, %368 : vector<24x128xf32>
    %370 = arith.subf %364, %369 : vector<24x128xf32>
    %371 = arith.mulf %370, %370 : vector<24x128xf32>
    %cst_100 = arith.constant 1.000000e-01 : f32
    %372 = vector.broadcast %cst_100 : f32 to vector<24x128xf32>
    %373 = arith.addf %372, %371 : vector<24x128xf32>
    %374 = tpu.reciprocal %373 {approx = true} : vector<24x128xf32> -> vector<24x128xf32>
    %375 = arith.addf %353, %374 : vector<24x128xf32>
    %c127_i32_101 = arith.constant 127 : i32
    %376 = tpu.dynamic_rotate %374 by %c127_i32_101 dim 1 : vector<24x128xf32>, i32 -> vector<24x128xf32>
    %377 = arith.addf %355, %376 : vector<24x128xf32>
    %378 = arith.subf %311, %1 : vector<24x128xf32>
    %379 = arith.subf %312, %3 : vector<24x128xf32>
    %380 = arith.mulf %378, %378 : vector<24x128xf32>
    %cst_102 = arith.constant 8.100000e-01 : f32
    %381 = vector.broadcast %cst_102 : f32 to vector<24x128xf32>
    %382 = arith.addf %381, %380 : vector<24x128xf32>
    %383 = math.rsqrt %382 : vector<24x128xf32>
    %384 = arith.mulf %378, %383 : vector<24x128xf32>
    %385 = arith.mulf %379, %379 : vector<24x128xf32>
    %cst_103 = arith.constant 8.100000e-01 : f32
    %386 = vector.broadcast %cst_103 : f32 to vector<24x128xf32>
    %387 = arith.addf %386, %385 : vector<24x128xf32>
    %388 = math.rsqrt %387 : vector<24x128xf32>
    %389 = arith.mulf %379, %388 : vector<24x128xf32>
    %390 = arith.subf %384, %389 : vector<24x128xf32>
    %391 = arith.mulf %390, %390 : vector<24x128xf32>
    %cst_104 = arith.constant 1.000000e-01 : f32
    %392 = vector.broadcast %cst_104 : f32 to vector<24x128xf32>
    %393 = arith.addf %392, %391 : vector<24x128xf32>
    %394 = tpu.reciprocal %393 {approx = true} : vector<24x128xf32> -> vector<24x128xf32>
    %395 = arith.addf %375, %394 : vector<24x128xf32>
    %396 = arith.addf %377, %394 : vector<24x128xf32>
    %c127_i32_105 = arith.constant 127 : i32
    %397 = tpu.dynamic_rotate %311 by %c127_i32_105 dim 1 : vector<24x128xf32>, i32 -> vector<24x128xf32>
    %c127_i32_106 = arith.constant 127 : i32
    %398 = tpu.dynamic_rotate %312 by %c127_i32_106 dim 1 : vector<24x128xf32>, i32 -> vector<24x128xf32>
    %399 = arith.subf %397, %1 : vector<24x128xf32>
    %400 = arith.subf %398, %3 : vector<24x128xf32>
    %401 = arith.mulf %399, %399 : vector<24x128xf32>
    %cst_107 = arith.constant 8.100000e-01 : f32
    %402 = vector.broadcast %cst_107 : f32 to vector<24x128xf32>
    %403 = arith.addf %402, %401 : vector<24x128xf32>
    %404 = math.rsqrt %403 : vector<24x128xf32>
    %405 = arith.mulf %399, %404 : vector<24x128xf32>
    %406 = arith.mulf %400, %400 : vector<24x128xf32>
    %cst_108 = arith.constant 8.100000e-01 : f32
    %407 = vector.broadcast %cst_108 : f32 to vector<24x128xf32>
    %408 = arith.addf %407, %406 : vector<24x128xf32>
    %409 = math.rsqrt %408 : vector<24x128xf32>
    %410 = arith.mulf %400, %409 : vector<24x128xf32>
    %411 = arith.subf %405, %410 : vector<24x128xf32>
    %412 = arith.mulf %411, %411 : vector<24x128xf32>
    %cst_109 = arith.constant 1.000000e-01 : f32
    %413 = vector.broadcast %cst_109 : f32 to vector<24x128xf32>
    %414 = arith.addf %413, %412 : vector<24x128xf32>
    %415 = tpu.reciprocal %414 {approx = true} : vector<24x128xf32> -> vector<24x128xf32>
    %416 = arith.addf %395, %415 : vector<24x128xf32>
    %c1_i32_110 = arith.constant 1 : i32
    %417 = tpu.dynamic_rotate %415 by %c1_i32_110 dim 1 : vector<24x128xf32>, i32 -> vector<24x128xf32>
    %418 = arith.addf %396, %417 : vector<24x128xf32>
    %c126_i32_111 = arith.constant 126 : i32
    %419 = tpu.dynamic_rotate %311 by %c126_i32_111 dim 1 : vector<24x128xf32>, i32 -> vector<24x128xf32>
    %c126_i32_112 = arith.constant 126 : i32
    %420 = tpu.dynamic_rotate %312 by %c126_i32_112 dim 1 : vector<24x128xf32>, i32 -> vector<24x128xf32>
    %421 = arith.subf %419, %1 : vector<24x128xf32>
    %422 = arith.subf %420, %3 : vector<24x128xf32>
    %423 = arith.mulf %421, %421 : vector<24x128xf32>
    %cst_113 = arith.constant 8.100000e-01 : f32
    %424 = vector.broadcast %cst_113 : f32 to vector<24x128xf32>
    %425 = arith.addf %424, %423 : vector<24x128xf32>
    %426 = math.rsqrt %425 : vector<24x128xf32>
    %427 = arith.mulf %421, %426 : vector<24x128xf32>
    %428 = arith.mulf %422, %422 : vector<24x128xf32>
    %cst_114 = arith.constant 8.100000e-01 : f32
    %429 = vector.broadcast %cst_114 : f32 to vector<24x128xf32>
    %430 = arith.addf %429, %428 : vector<24x128xf32>
    %431 = math.rsqrt %430 : vector<24x128xf32>
    %432 = arith.mulf %422, %431 : vector<24x128xf32>
    %433 = arith.subf %427, %432 : vector<24x128xf32>
    %434 = arith.mulf %433, %433 : vector<24x128xf32>
    %cst_115 = arith.constant 1.000000e-01 : f32
    %435 = vector.broadcast %cst_115 : f32 to vector<24x128xf32>
    %436 = arith.addf %435, %434 : vector<24x128xf32>
    %437 = tpu.reciprocal %436 {approx = true} : vector<24x128xf32> -> vector<24x128xf32>
    %438 = arith.addf %416, %437 : vector<24x128xf32>
    %c2_i32_116 = arith.constant 2 : i32
    %439 = tpu.dynamic_rotate %437 by %c2_i32_116 dim 1 : vector<24x128xf32>, i32 -> vector<24x128xf32>
    %440 = arith.addf %418, %439 : vector<24x128xf32>
    %c125_i32_117 = arith.constant 125 : i32
    %441 = tpu.dynamic_rotate %311 by %c125_i32_117 dim 1 : vector<24x128xf32>, i32 -> vector<24x128xf32>
    %c125_i32_118 = arith.constant 125 : i32
    %442 = tpu.dynamic_rotate %312 by %c125_i32_118 dim 1 : vector<24x128xf32>, i32 -> vector<24x128xf32>
    %443 = arith.subf %441, %1 : vector<24x128xf32>
    %444 = arith.subf %442, %3 : vector<24x128xf32>
    %445 = arith.mulf %443, %443 : vector<24x128xf32>
    %cst_119 = arith.constant 8.100000e-01 : f32
    %446 = vector.broadcast %cst_119 : f32 to vector<24x128xf32>
    %447 = arith.addf %446, %445 : vector<24x128xf32>
    %448 = math.rsqrt %447 : vector<24x128xf32>
    %449 = arith.mulf %443, %448 : vector<24x128xf32>
    %450 = arith.mulf %444, %444 : vector<24x128xf32>
    %cst_120 = arith.constant 8.100000e-01 : f32
    %451 = vector.broadcast %cst_120 : f32 to vector<24x128xf32>
    %452 = arith.addf %451, %450 : vector<24x128xf32>
    %453 = math.rsqrt %452 : vector<24x128xf32>
    %454 = arith.mulf %444, %453 : vector<24x128xf32>
    %455 = arith.subf %449, %454 : vector<24x128xf32>
    %456 = arith.mulf %455, %455 : vector<24x128xf32>
    %cst_121 = arith.constant 1.000000e-01 : f32
    %457 = vector.broadcast %cst_121 : f32 to vector<24x128xf32>
    %458 = arith.addf %457, %456 : vector<24x128xf32>
    %459 = tpu.reciprocal %458 {approx = true} : vector<24x128xf32> -> vector<24x128xf32>
    %460 = arith.addf %438, %459 : vector<24x128xf32>
    %c3_i32_122 = arith.constant 3 : i32
    %461 = tpu.dynamic_rotate %459 by %c3_i32_122 dim 1 : vector<24x128xf32>, i32 -> vector<24x128xf32>
    %462 = arith.addf %440, %461 : vector<24x128xf32>
    %c23_i32 = arith.constant 23 : i32
    %463 = tpu.dynamic_rotate %462 by %c23_i32 dim 0 : vector<24x128xf32>, i32 -> vector<24x128xf32>
    %464 = arith.addf %460, %463 : vector<24x128xf32>
    %c3_i32_123 = arith.constant 3 : i32
    %465 = tpu.dynamic_rotate %1 by %c3_i32_123 dim 1 : vector<24x128xf32>, i32 -> vector<24x128xf32>
    %c3_i32_124 = arith.constant 3 : i32
    %466 = tpu.dynamic_rotate %3 by %c3_i32_124 dim 1 : vector<24x128xf32>, i32 -> vector<24x128xf32>
    %467 = arith.subf %465, %1 : vector<24x128xf32>
    %468 = arith.subf %466, %3 : vector<24x128xf32>
    %469 = arith.mulf %467, %467 : vector<24x128xf32>
    %cst_125 = arith.constant 8.100000e-01 : f32
    %470 = vector.broadcast %cst_125 : f32 to vector<24x128xf32>
    %471 = arith.addf %470, %469 : vector<24x128xf32>
    %472 = math.rsqrt %471 : vector<24x128xf32>
    %473 = arith.mulf %467, %472 : vector<24x128xf32>
    %474 = arith.mulf %468, %468 : vector<24x128xf32>
    %cst_126 = arith.constant 8.100000e-01 : f32
    %475 = vector.broadcast %cst_126 : f32 to vector<24x128xf32>
    %476 = arith.addf %475, %474 : vector<24x128xf32>
    %477 = math.rsqrt %476 : vector<24x128xf32>
    %478 = arith.mulf %468, %477 : vector<24x128xf32>
    %479 = arith.subf %473, %478 : vector<24x128xf32>
    %480 = arith.mulf %479, %479 : vector<24x128xf32>
    %cst_127 = arith.constant 1.000000e-01 : f32
    %481 = vector.broadcast %cst_127 : f32 to vector<24x128xf32>
    %482 = arith.addf %481, %480 : vector<24x128xf32>
    %483 = tpu.reciprocal %482 {approx = true} : vector<24x128xf32> -> vector<24x128xf32>
    %484 = arith.addf %464, %483 : vector<24x128xf32>
    %c125_i32_128 = arith.constant 125 : i32
    %485 = tpu.dynamic_rotate %483 by %c125_i32_128 dim 1 : vector<24x128xf32>, i32 -> vector<24x128xf32>
    %c2_i32_129 = arith.constant 2 : i32
    %486 = tpu.dynamic_rotate %1 by %c2_i32_129 dim 1 : vector<24x128xf32>, i32 -> vector<24x128xf32>
    %c2_i32_130 = arith.constant 2 : i32
    %487 = tpu.dynamic_rotate %3 by %c2_i32_130 dim 1 : vector<24x128xf32>, i32 -> vector<24x128xf32>
    %488 = arith.subf %486, %1 : vector<24x128xf32>
    %489 = arith.subf %487, %3 : vector<24x128xf32>
    %490 = arith.mulf %488, %488 : vector<24x128xf32>
    %cst_131 = arith.constant 8.100000e-01 : f32
    %491 = vector.broadcast %cst_131 : f32 to vector<24x128xf32>
    %492 = arith.addf %491, %490 : vector<24x128xf32>
    %493 = math.rsqrt %492 : vector<24x128xf32>
    %494 = arith.mulf %488, %493 : vector<24x128xf32>
    %495 = arith.mulf %489, %489 : vector<24x128xf32>
    %cst_132 = arith.constant 8.100000e-01 : f32
    %496 = vector.broadcast %cst_132 : f32 to vector<24x128xf32>
    %497 = arith.addf %496, %495 : vector<24x128xf32>
    %498 = math.rsqrt %497 : vector<24x128xf32>
    %499 = arith.mulf %489, %498 : vector<24x128xf32>
    %500 = arith.subf %494, %499 : vector<24x128xf32>
    %501 = arith.mulf %500, %500 : vector<24x128xf32>
    %cst_133 = arith.constant 1.000000e-01 : f32
    %502 = vector.broadcast %cst_133 : f32 to vector<24x128xf32>
    %503 = arith.addf %502, %501 : vector<24x128xf32>
    %504 = tpu.reciprocal %503 {approx = true} : vector<24x128xf32> -> vector<24x128xf32>
    %505 = arith.addf %484, %504 : vector<24x128xf32>
    %c126_i32_134 = arith.constant 126 : i32
    %506 = tpu.dynamic_rotate %504 by %c126_i32_134 dim 1 : vector<24x128xf32>, i32 -> vector<24x128xf32>
    %507 = arith.addf %485, %506 : vector<24x128xf32>
    %c1_i32_135 = arith.constant 1 : i32
    %508 = tpu.dynamic_rotate %1 by %c1_i32_135 dim 1 : vector<24x128xf32>, i32 -> vector<24x128xf32>
    %c1_i32_136 = arith.constant 1 : i32
    %509 = tpu.dynamic_rotate %3 by %c1_i32_136 dim 1 : vector<24x128xf32>, i32 -> vector<24x128xf32>
    %510 = arith.subf %508, %1 : vector<24x128xf32>
    %511 = arith.subf %509, %3 : vector<24x128xf32>
    %512 = arith.mulf %510, %510 : vector<24x128xf32>
    %cst_137 = arith.constant 8.100000e-01 : f32
    %513 = vector.broadcast %cst_137 : f32 to vector<24x128xf32>
    %514 = arith.addf %513, %512 : vector<24x128xf32>
    %515 = math.rsqrt %514 : vector<24x128xf32>
    %516 = arith.mulf %510, %515 : vector<24x128xf32>
    %517 = arith.mulf %511, %511 : vector<24x128xf32>
    %cst_138 = arith.constant 8.100000e-01 : f32
    %518 = vector.broadcast %cst_138 : f32 to vector<24x128xf32>
    %519 = arith.addf %518, %517 : vector<24x128xf32>
    %520 = math.rsqrt %519 : vector<24x128xf32>
    %521 = arith.mulf %511, %520 : vector<24x128xf32>
    %522 = arith.subf %516, %521 : vector<24x128xf32>
    %523 = arith.mulf %522, %522 : vector<24x128xf32>
    %cst_139 = arith.constant 1.000000e-01 : f32
    %524 = vector.broadcast %cst_139 : f32 to vector<24x128xf32>
    %525 = arith.addf %524, %523 : vector<24x128xf32>
    %526 = tpu.reciprocal %525 {approx = true} : vector<24x128xf32> -> vector<24x128xf32>
    %527 = arith.addf %505, %526 : vector<24x128xf32>
    %c127_i32_140 = arith.constant 127 : i32
    %528 = tpu.dynamic_rotate %526 by %c127_i32_140 dim 1 : vector<24x128xf32>, i32 -> vector<24x128xf32>
    %529 = arith.addf %507, %528 : vector<24x128xf32>
    %530 = arith.addf %527, %529 : vector<24x128xf32>
    %c0_141 = arith.constant 0 : index
    %c0_142 = arith.constant 0 : index
    %c0_143 = arith.constant 0 : index
    %c0_144 = arith.constant 0 : index
    %531 = vector.load %arg4[%c0_141, %c0_142, %c0_143, %c0_144] : memref<1x1x24x128xf32, #tpu.memory_space<vmem>>, vector<1x1x24x128xf32>
    %532 = vector.shape_cast %531 : vector<1x1x24x128xf32> to vector<24x128xf32>
    %533 = vector.shape_cast %530 : vector<24x128xf32> to vector<1x1x24x128xf32>
    tpu.vector_store %arg4[%c0_141, %c0_142, %c0_143, %c0_144], %533 {strides = array<i32>} : memref<1x1x24x128xf32, #tpu.memory_space<vmem>>, vector<1x1x24x128xf32>,
    return
  }
  func.func @transform_0(%arg0: i32, %arg1: i32) -> (i32, i32, i32, i32) {
    %c0_i32 = arith.constant 0 : i32
    %c0_i32_0 = arith.constant 0 : i32
    %c0_i32_1 = arith.constant 0 : i32
    return %arg0, %arg1, %c0_i32, %c0_i32_0 : i32, i32, i32, i32
  }
  func.func @transform_1(%arg0: i32, %arg1: i32) -> (i32, i32, i32, i32) {
    %c0_i32 = arith.constant 0 : i32
    %c0_i32_0 = arith.constant 0 : i32
    %c0_i32_1 = arith.constant 0 : i32
    return %arg0, %arg1, %c0_i32, %c0_i32_0 : i32, i32, i32, i32
  }
  func.func @transform_2(%arg0: i32, %arg1: i32) -> (i32, i32, i32, i32) {
    %c0_i32 = arith.constant 0 : i32
    %c0_i32_0 = arith.constant 0 : i32
    %c0_i32_1 = arith.constant 0 : i32
    return %arg0, %arg1, %c0_i32, %c0_i32_0 : i32, i32, i32, i32
  }
}

</mosaic_0001>

<bundles_post_ra>
// kernel: ternary_pallas.1
= control target key start
LH: loop header
LB: loop body
LE: loop exit
PB: predicated region body
PF: predicated region fallthrough
CT: control target
= control target key end

     0   :  { %s2458_s9 = smov 0   ;;  %s2460_s10 = smov 0   ;;  %s3970_s0 = inlined_call_operand.vmem [shape: f32[2,1,24,128], index: 0, kind: input, shape index: {}]   ;;  %s3971_s1 = inlined_call_operand.vmem [shape: f32[2,1,24,128], index: 1, kind: input, shape index: {}]   ;;  %s3972_s2 = inlined_call_operand.vmem [shape: f32[2,1,24,128], index: 2, kind: output, shape index: {}]  }
   0x1   :  { %s2462_s11 = smov 0  }
   0x2 LB: > { %s24_s12 = sadd.s32 1, %s2431_s10  ;;  %p1929_p0 = scmp.ge.s32.totalorder %s2435_s11, 1  ;;  %s2435_s11 = sphi %s2462_s11, %s12_s11   ;;  %s2431_s10 = sphi %s2460_s10, %s4006_s10   ;;  %s2427_s9 = sphi %s2458_s9, %s4005_s9  }
   0x3   : > { %p26_p1 = scmp.ge.s32.totalorder %s24_s12, 2  ;;  %p148_p2 = scmp.lt.s32.totalorder %s2435_s11, 3 }
   0x5   : > { %s4008_s12 = smov (%p26_p1, %s24_s12), 0  ;;  %p149_p3 = pnand %p1929_p0, %p148_p2 }
   0x7   : > { %152 = sbr.rel (%p149_p3) target bundleno = 995 (0x3e3), region = 28 }
   0xe   : > { %p187_p4 = scmp.lt.s32.totalorder %s2427_s9, 1  ;;  %v223_v0 = vlaneseq  ;;  %s2437_s20 = smov 3  }
   0xf   : > { %s2438_s21 = smov 2   ;;  %s2439_s22 = smov 1  }
  0x10   : > { %s4010_s9 = smov (!%p187_p4, %s2427_s9), 1  ;;  %v2476_v1 = vshrl.u32 %v223_v0, 7  ;;  %s2440_s23 = smov 127  }
  0x11   : > { %s2478_s13 = smul.u32 24, %s4010_s9  ;;  %s2441_s24 = smov 126  }
  0x12   : > { %vm225_vm0 = vcmp.lt.s32.totalorder %v2476_v1, 3  ;;  %s2442_s25 = smov 125   ;;  %vm686_vm1 = vcmp.lt.s32.totalorder %v2476_v1, 2  ;;  %vm676_vm2 = vcmp.lt.s32.totalorder %v2476_v1, 5  ;;  %vm1150_vm3 = vcmp.lt.s32.totalorder %v2476_v1, 1 }
  0x13   : > { %s2484_s16 = scalar_lea.vmem %s3970_s0, %s2478_s13  ;;  %s2490_s19 = scalar_lea.vmem %s3971_s1, %s2478_s13  ;;  %vm1140_vm4 = vcmp.lt.s32.totalorder %v2476_v1, 6  ;;  %vm1604_vm5 = vcmp.lt.s32.totalorder %v2476_v1, 7 }
  0x14   : > { %v2493_v2 = vld [vmem:[%s2484_s16 + $0x8] sm:$0xff]  ;;  %v2496_v3 = vld [vmem:[%s2484_s16 + $0x10] sm:$0xff]  ;;  %v2500_v4 = vld [vmem:[%s2484_s16] sm:$0xff]  ;;  %s213_s28 = scalar_lea.vmem %s3972_s2, %s2478_s13 }
  0x15   : > { %v221_v5 = vrot.slane %v2493_v2, 5  ;;  %v222_v6 = vrot.slane %v2496_v3, 5  ;;  %v220_v7 = vrot.slane %v2500_v4, 5  ;;  %v2506_v8 = vld [vmem:[%s2490_s19] sm:$0xff]  ;;  %v2509_v9 = vld [vmem:[%s2490_s19 + $0x10] sm:$0xff]  ;;  %v2514_v12 = vld [vmem:[%s2490_s19 + $0x8] sm:$0xff] }
  0x16   : > { %v229_v10 = vrot.slane %v2506_v8, 5  ;;  %v231_v11 = vrot.slane %v2509_v9, 5  ;;  %v230_v17 = vrot.slane %v2514_v12, 5  ;;  %v683_v53 = vrot.slane %v2500_v4, 6 }
  0x17   : > { %v2518_v13 = vsel %vm225_vm0, %v221_v5, %v222_v6  ;;  %v2522_v14 = vsel %vm225_vm0, %v222_v6, %v220_v7  ;;  %v2534_v16 = vsel %vm225_vm0, %v220_v7, %v221_v5  ;;  %v684_v54 = vrot.slane %v2493_v2, 6 }
  0x18   : > { %239 = vrot.lane.b32.xlu1 %v2518_v13, %s2437_s20  ;;  %235 = vrot.lane.b32.xlu0 %v2522_v14, %s2437_s20  ;;  %v2530_v15 = vsel %vm225_vm0, %v231_v11, %v229_v10  ;;  %v2543_v18 = vsel %vm225_vm0, %v230_v17, %v231_v11  ;;  %v2547_v19 = vsel %vm225_vm0, %v229_v10, %v230_v17  ;;  %v685_v55 = vrot.slane %v2496_v3, 6 }
  0x19   : > { %v427_v20 = vsub.f32 %v2522_v14, %v2500_v4  ;;  %v430_v21 = vsub.f32 %v2530_v15, %v2506_v8  ;;  %v429_v26 = vsub.f32 %v2518_v13, %v2496_v3  ;;  %v432_v27 = vsub.f32 %v2543_v18, %v2509_v9 }
  0x1a   : > { %v431_v28 = vsub.f32 %v2547_v19, %v2514_v12  ;;  %v428_v29 = vsub.f32 %v2534_v16, %v2493_v2  ;;  %v2635_v56 = vsel %vm686_vm1, %v683_v53, %v684_v54  ;;  %v2637_v57 = vsel %vm686_vm1, %v685_v55, %v683_v53 }
  0x1b   : > { %v433_v22 = vmul.f32 %v427_v20, %v427_v20  ;;  %v445_v23 = vmul.f32 %v430_v21, %v430_v21  ;;  %v435_v30 = vmul.f32 %v429_v26, %v429_v26  ;;  %v447_v31 = vmul.f32 %v432_v27, %v432_v27 }
  0x1c   : > { %241 = vrot.lane.b32.xlu1 %v2530_v15, %s2437_s20  ;;  %237 = vrot.lane.b32.xlu0 %v2534_v16, %s2437_s20  ;;  %v446_v32 = vmul.f32 %v431_v28, %v431_v28  ;;  %v434_v33 = vmul.f32 %v428_v29, %v428_v29  ;;  %v690_v58 = vrot.slane %v2506_v8, 6  ;;  %v692_v59 = vrot.slane %v2509_v9, 6 }
  0x1d   : > { %v436_v24 = vadd.f32 0.81, %v433_v22  ;;  %v448_v25 = vadd.f32 0.81, %v445_v23  ;;  %v438_v34 = vadd.f32 0.81, %v435_v30  ;;  %v2647_v61 = vsel %vm686_vm1, %v684_v54, %v685_v55 }
  0x1e   : > { %v450_v35 = vadd.f32 0.81, %v447_v31  ;;  %v449_v36 = vadd.f32 0.81, %v446_v32  ;;  %v437_v37 = vadd.f32 0.81, %v434_v33  ;;  %v2645_v60 = vsel %vm686_vm1, %v692_v59, %v690_v58 }
  0x1f   : > { %1966 = vrsqrt.f32 %v436_v24  ;;  %v691_v62 = vrot.slane %v2514_v12, 6 }
  0x20   : > { %245 = vrot.lane.b32.xlu1 %v2543_v18, %s2437_s20  ;;  %243 = vrot.lane.b32.xlu0 %v2547_v19, %s2437_s20  ;;  %1968 = vrsqrt.f32 %v448_v25 }
  0x21   : > { %1970 = vrsqrt.f32 %v438_v34  ;;  %v2654_v63 = vsel %vm686_vm1, %v691_v62, %v692_v59  ;;  %v2656_v0 = vsel %vm686_vm1, %v690_v58, %v691_v62 }
  0x22   : > { %1972 = vrsqrt.f32 %v450_v35 }
  0x23   : > { %1974 = vrsqrt.f32 %v449_v36 }
  0x24   : > { %295 = vrot.lane.b32.xlu1 %v2522_v14, %s2438_s21  ;;  %297 = vrot.lane.b32.xlu0 %v2534_v16, %s2438_s21  ;;  %1976 = vrsqrt.f32 %v437_v37 }
  0x28   : > { %299 = vrot.lane.b32.xlu1 %v2518_v13, %s2438_s21  ;;  %301 = vrot.lane.b32.xlu0 %v2530_v15, %s2438_s21 }
  0x29   : > { %v1967_v38 = vpop.eup %1966 }
  0x2a   : > { %v1969_v39 = vpop.eup %1968  ;;  %v442_v40 = vmul.f32 %v1967_v38, %v427_v20 }
  0x2b   : > { %v454_v41 = vmul.f32 %v1969_v39, %v430_v21  ;;  %v1971_v42 = vpop.eup %1970 }
  0x2c   : > { %303 = vrot.lane.b32.xlu1 %v2547_v19, %s2438_s21  ;;  %305 = vrot.lane.b32.xlu0 %v2543_v18, %s2438_s21  ;;  %v1973_v44 = vpop.eup %1972  ;;  %v444_v45 = vmul.f32 %v1971_v42, %v429_v26 }
  0x2d   : > { %v2597_v43 = vsub.f32 %v442_v40, %v454_v41  ;;  %v1975_v46 = vpop.eup %1974  ;;  %v456_v47 = vmul.f32 %v1973_v44, %v432_v27 }
  0x2e   : > { %v1977_v48 = vpop.eup %1976  ;;  %v455_v49 = vmul.f32 %v1975_v46, %v431_v28 }
  0x2f   : > { %v2603_v50 = vsub.f32 %v444_v45, %v456_v47  ;;  %v443_v51 = vmul.f32 %v1977_v48, %v428_v29  ;;  %v460_v32 = vmul.f32 %v2597_v43, %v2597_v43 }
  0x30   : > { %363 = vrot.lane.b32.xlu1 %v2534_v16, %s2439_s22  ;;  %361 = vrot.lane.b32.xlu0 %v2522_v14, %s2439_s22 }
  0x31   : > { %v2605_v52 = vsub.f32 %v443_v51, %v455_v49  ;;  %v462_v37 = vmul.f32 %v2603_v50, %v2603_v50  ;;  %v463_v42 = vadd.f32 0.1, %v460_v32 }
  0x33   : > { %v465_v47 = vadd.f32 0.1, %v462_v37 }
  0x34   : > { %367 = vrot.lane.b32.xlu1 %v2530_v15, %s2439_s22  ;;  %365 = vrot.lane.b32.xlu0 %v2518_v13, %s2439_s22 }
  0x38   : > { %371 = vrot.lane.b32.xlu1 %v2543_v18, %s2439_s22  ;;  %369 = vrot.lane.b32.xlu0 %v2547_v19, %s2439_s22 }
  0x3c   : > { %475 = vrot.lane.b32.xlu1 %v2522_v14, %s2440_s23  ;;  %477 = vrot.lane.b32.xlu0 %v2534_v16, %s2440_s23 }
  0x40   : > { %479 = vrot.lane.b32.xlu1 %v2518_v13, %s2440_s23  ;;  %481 = vrot.lane.b32.xlu0 %v2530_v15, %s2440_s23 }
  0x44   : > { %483 = vrot.lane.b32.xlu1 %v2547_v19, %s2440_s23  ;;  %485 = vrot.lane.b32.xlu0 %v2543_v18, %s2440_s23 }
  0x48   : > { %543 = vrot.lane.b32.xlu1 %v2534_v16, %s2441_s24  ;;  %541 = vrot.lane.b32.xlu0 %v2522_v14, %s2441_s24 }
  0x4c   : > { %547 = vrot.lane.b32.xlu1 %v2530_v15, %s2441_s24  ;;  %545 = vrot.lane.b32.xlu0 %v2518_v13, %s2441_s24 }
  0x50   : > { %551 = vrot.lane.b32.xlu1 %v2543_v18, %s2441_s24  ;;  %549 = vrot.lane.b32.xlu0 %v2547_v19, %s2441_s24 }
  0x54   : > { %607 = vrot.lane.b32.xlu1 %v2522_v14, %s2442_s25  ;;  %609 = vrot.lane.b32.xlu0 %v2534_v16, %s2442_s25 }
  0x58   : > { %611 = vrot.lane.b32.xlu1 %v2518_v13, %s2442_s25  ;;  %613 = vrot.lane.b32.xlu0 %v2530_v15, %s2442_s25 }
  0x5c   : > { %615 = vrot.lane.b32.xlu1 %v2547_v19, %s2442_s25  ;;  %617 = vrot.lane.b32.xlu0 %v2543_v18, %s2442_s25 }
  0x60   : > { %698 = vrot.lane.b32.xlu1 %v2635_v56, %s2437_s20  ;;  %696 = vrot.lane.b32.xlu0 %v2637_v57, %s2437_s20 }
  0x64   : > { %702 = vrot.lane.b32.xlu1 %v2645_v60, %s2437_s20  ;;  %700 = vrot.lane.b32.xlu0 %v2647_v61, %s2437_s20 }
  0x68   : > { %706 = vrot.lane.b32.xlu1 %v2654_v63, %s2437_s20  ;;  %704 = vrot.lane.b32.xlu0 %v2656_v0, %s2437_s20 }
  0x6c   : > { %759 = vrot.lane.b32.xlu1 %v2637_v57, %s2438_s21  ;;  %761 = vrot.lane.b32.xlu0 %v2635_v56, %s2438_s21 }
  0x70   : > { %763 = vrot.lane.b32.xlu1 %v2647_v61, %s2438_s21  ;;  %765 = vrot.lane.b32.xlu0 %v2645_v60, %s2438_s21 }
  0x74   : > { %767 = vrot.lane.b32.xlu1 %v2656_v0, %s2438_s21  ;;  %769 = vrot.lane.b32.xlu0 %v2654_v63, %s2438_s21 }
  0x78   : > { %827 = vrot.lane.b32.xlu1 %v2635_v56, %s2439_s22  ;;  %825 = vrot.lane.b32.xlu0 %v2637_v57, %s2439_s22 }
  0x7c   : > { %831 = vrot.lane.b32.xlu1 %v2645_v60, %s2439_s22  ;;  %829 = vrot.lane.b32.xlu0 %v2647_v61, %s2439_s22 }
  0x80   : > { %835 = vrot.lane.b32.xlu1 %v2654_v63, %s2439_s22  ;;  %833 = vrot.lane.b32.xlu0 %v2656_v0, %s2439_s22 }
  0x84   : > { %939 = vrot.lane.b32.xlu1 %v2637_v57, %s2440_s23 }
  0x8a   : > { %v240_v5 = vpop.permute.xlu1 %239  ;;  %v236_v6 = vpop.permute.xlu0 %235 }
  0x8b   : > { %v2689_v7 = vsub.f32 %v240_v5, %v2496_v3  ;;  %v247_v10 = vsub.f32 %v236_v6, %v2500_v4 }
  0x8d   : > { %v255_v11 = vmul.f32 %v2689_v7, %v2689_v7  ;;  %v253_v13 = vmul.f32 %v247_v10, %v247_v10 }
  0x8e   : > { %v242_v14 = vpop.permute.xlu1 %241  ;;  %v238_v15 = vpop.permute.xlu0 %237 }
  0x8f   : > { %v256_v16 = vadd.f32 0.81, %v253_v13  ;;  %v250_v17 = vsub.f32 %v242_v14, %v2506_v8  ;;  %v2696_v18 = vsub.f32 %v238_v15, %v2493_v2  ;;  %v258_v19 = vadd.f32 0.81, %v255_v11 }
  0x91   : > { %v265_v20 = vmul.f32 %v250_v17, %v250_v17  ;;  %v254_v21 = vmul.f32 %v2696_v18, %v2696_v18  ;;  %1978 = vrsqrt.f32 %v256_v16 }
  0x92   : > { %v246_v22 = vpop.permute.xlu1 %245  ;;  %v244_v23 = vpop.permute.xlu0 %243  ;;  %1980 = vrsqrt.f32 %v258_v19 }
  0x93   : > { %v268_v24 = vadd.f32 0.81, %v265_v20  ;;  %v257_v25 = vadd.f32 0.81, %v254_v21  ;;  %v252_v26 = vsub.f32 %v246_v22, %v2509_v9  ;;  %v251_v27 = vsub.f32 %v244_v23, %v2514_v12 }
  0x95   : > { %1982 = vrsqrt.f32 %v268_v24  ;;  %v267_v28 = vmul.f32 %v252_v26, %v252_v26  ;;  %v266_v29 = vmul.f32 %v251_v27, %v251_v27 }
  0x96   : > { %1984 = vrsqrt.f32 %v257_v25  ;;  %v296_v30 = vpop.permute.xlu1 %295  ;;  %v298_v31 = vpop.permute.xlu0 %297 }
  0x97   : > { %v270_v33 = vadd.f32 0.81, %v267_v28  ;;  %v269_v34 = vadd.f32 0.81, %v266_v29  ;;  %v2705_v35 = vsub.f32 %v296_v30, %v2500_v4  ;;  %v2708_v36 = vsub.f32 %v298_v31, %v2493_v2 }
  0x99   : > { %1986 = vrsqrt.f32 %v270_v33  ;;  %v313_v38 = vmul.f32 %v2705_v35, %v2705_v35  ;;  %v314_v39 = vmul.f32 %v2708_v36, %v2708_v36 }
  0x9a   : > { %1988 = vrsqrt.f32 %v269_v34  ;;  %v300_v40 = vpop.permute.xlu1 %299  ;;  %v302_v41 = vpop.permute.xlu0 %301 }
  0x9b   : > { %v316_v43 = vadd.f32 0.81, %v313_v38  ;;  %v2717_v44 = vsub.f32 %v300_v40, %v2496_v3  ;;  %v2720_v45 = vsub.f32 %v302_v41, %v2506_v8  ;;  %v1979_v46 = vpop.eup %1978  ;;  %v317_v48 = vadd.f32 0.81, %v314_v39 }
  0x9c   : > { %v1981_v51 = vpop.eup %1980  ;;  %1990 = vrcp.f32 %v463_v42  ;;  %v262_v6 = vmul.f32 %v1979_v46, %v247_v10 }
  0x9d   : > { %v315_v49 = vmul.f32 %v2717_v44, %v2717_v44  ;;  %v325_v50 = vmul.f32 %v2720_v45, %v2720_v45  ;;  %1992 = vrsqrt.f32 %v316_v43  ;;  %v264_v16 = vmul.f32 %v1981_v51, %v2689_v7 }
  0x9e   : > { %v304_v53 = vpop.permute.xlu1 %303  ;;  %v306_v54 = vpop.permute.xlu0 %305  ;;  %1994 = vrcp.f32 %v465_v47 }
  0x9f   : > { %v1983_v55 = vpop.eup %1982  ;;  %v328_v58 = vadd.f32 0.81, %v325_v50  ;;  %v2727_v59 = vsub.f32 %v304_v53, %v2514_v12  ;;  %v2730_v62 = vsub.f32 %v306_v54, %v2509_v9  ;;  %v318_v13 = vadd.f32 0.81, %v315_v49 }
  0xa0   : > { %v1985_v5 = vpop.eup %1984  ;;  %v274_v11 = vmul.f32 %v1983_v55, %v250_v17  ;;  %1996 = vrsqrt.f32 %v317_v48  ;;  %v461_v54 = vmul.f32 %v2605_v52, %v2605_v52 }
  0xa1   : > { %v326_v14 = vmul.f32 %v2727_v59, %v2727_v59  ;;  %v327_v15 = vmul.f32 %v2730_v62, %v2730_v62  ;;  %1998 = vrsqrt.f32 %v328_v58  ;;  %v263_v29 = vmul.f32 %v1985_v5, %v2696_v18 }
  0xa2   : > { %v277_v19 = vsub.f32 %v262_v6, %v274_v11  ;;  %v364_v20 = vpop.permute.xlu1 %363  ;;  %v362_v21 = vpop.permute.xlu0 %361  ;;  %2000 = vrsqrt.f32 %v318_v13 }
  0xa3   : > { %v1987_v22 = vpop.eup %1986  ;;  %v329_v23 = vadd.f32 0.81, %v326_v14  ;;  %v330_v24 = vadd.f32 0.81, %v327_v15  ;;  %v2738_v10 = vsub.f32 %v364_v20, %v2493_v2  ;;  %v2741_v17 = vsub.f32 %v362_v21, %v2500_v4 }
  0xa4   : > { %v1989_v25 = vpop.eup %1988  ;;  %v280_v28 = vmul.f32 %v277_v19, %v277_v19  ;;  %v276_v30 = vmul.f32 %v1987_v22, %v252_v26 }
  0xa5   : > { %v275_v7 = vmul.f32 %v1989_v25, %v251_v27  ;;  %2002 = vrsqrt.f32 %v329_v23  ;;  %v380_v31 = vmul.f32 %v2738_v10, %v2738_v10  ;;  %v379_v32 = vmul.f32 %v2741_v17, %v2741_v17 }
  0xa6   : > { %v283_v33 = vadd.f32 0.1, %v280_v28  ;;  %v279_v34 = vsub.f32 %v264_v16, %v276_v30  ;;  %2004 = vrsqrt.f32 %v330_v24  ;;  %v368_v37 = vpop.permute.xlu1 %367  ;;  %v366_v38 = vpop.permute.xlu0 %365  ;;  %v464_v23 = vadd.f32 0.1, %v461_v54 }
  0xa7   : > { %v278_v39 = vsub.f32 %v263_v29, %v275_v7  ;;  %v383_v40 = vadd.f32 0.81, %v380_v31  ;;  %v382_v41 = vadd.f32 0.81, %v379_v32  ;;  %v2749_v18 = vsub.f32 %v368_v37, %v2506_v8  ;;  %v2751_v26 = vpop.eup %1990 }
  0xa8   : > { %2006 = vrcp.f32 %v283_v33  ;;  %v282_v27 = vmul.f32 %v279_v34, %v279_v34  ;;  %v2754_v42 = vsub.f32 %v366_v38, %v2496_v3  ;;  %v1993_v43 = vpop.eup %1992 }
  0xa9   : > { %v281_v46 = vmul.f32 %v278_v39, %v278_v39  ;;  %2008 = vrsqrt.f32 %v383_v40  ;;  %v391_v47 = vmul.f32 %v2749_v18, %v2749_v18  ;;  %v2758_v48 = vpop.eup %1994  ;;  %v322_v14 = vmul.f32 %v1993_v43, %v2705_v35 }
  0xaa   : > { %v285_v49 = vadd.f32 0.1, %v282_v27  ;;  %2010 = vrsqrt.f32 %v382_v41  ;;  %v381_v50 = vmul.f32 %v2754_v42, %v2754_v42  ;;  %v372_v51 = vpop.permute.xlu1 %371  ;;  %v370_v53 = vpop.permute.xlu0 %369 }
  0xab   : > { %v1997_v55 = vpop.eup %1996  ;;  %v284_v58 = vadd.f32 0.1, %v281_v46  ;;  %v394_v5 = vadd.f32 0.81, %v391_v47  ;;  %v2765_v6 = vsub.f32 %v372_v51, %v2509_v9  ;;  %v2768_v11 = vsub.f32 %v370_v53, %v2514_v12 }
  0xac   : > { %v1999_v13 = vpop.eup %1998  ;;  %2012 = vrcp.f32 %v285_v49  ;;  %v384_v15 = vadd.f32 0.81, %v381_v50  ;;  %v323_v30 = vmul.f32 %v1997_v55, %v2708_v36 }
  0xad   : > { %2014 = vrcp.f32 %v284_v58  ;;  %v334_v16 = vmul.f32 %v1999_v13, %v2720_v45  ;;  %v393_v52 = vmul.f32 %v2765_v6, %v2765_v6  ;;  %v392_v19 = vmul.f32 %v2768_v11, %v2768_v11  ;;  %v2001_v20 = vpop.eup %2000 }
  0xae   : > { %2016 = vrsqrt.f32 %v394_v5  ;;  %v476_v21 = vpop.permute.xlu1 %475  ;;  %v478_v22 = vpop.permute.xlu0 %477  ;;  %v324_v32 = vmul.f32 %v2001_v20, %v2717_v44 }
  0xaf   : > { %v2003_v24 = vpop.eup %2002  ;;  %v337_v25 = vsub.f32 %v322_v14, %v334_v16  ;;  %2018 = vrsqrt.f32 %v384_v15  ;;  %v396_v28 = vadd.f32 0.81, %v393_v52  ;;  %v395_v35 = vadd.f32 0.81, %v392_v19 }
  0xb0   : > { %v2005_v29 = vpop.eup %2004  ;;  %v335_v45 = vmul.f32 %v2003_v24, %v2727_v59  ;;  %v2779_v7 = vsub.f32 %v476_v21, %v2500_v4  ;;  %v2782_v31 = vsub.f32 %v478_v22, %v2493_v2 }
  0xb1   : > { %v340_v33 = vmul.f32 %v337_v25, %v337_v25  ;;  %v336_v34 = vmul.f32 %v2005_v29, %v2730_v62  ;;  %2020 = vrsqrt.f32 %v396_v28 }
  0xb2   : > { %v2786_v37 = vpop.eup %2006  ;;  %v338_v38 = vsub.f32 %v323_v30, %v335_v45  ;;  %2022 = vrsqrt.f32 %v395_v35  ;;  %v493_v36 = vmul.f32 %v2779_v7, %v2779_v7  ;;  %v494_v59 = vmul.f32 %v2782_v31, %v2782_v31  ;;  %v480_v39 = vpop.permute.xlu1 %479 }
  0xb3   : > { %v482_v40 = vpop.permute.xlu0 %481  ;;  %v2009_v41 = vpop.eup %2008  ;;  %v343_v27 = vadd.f32 0.1, %v340_v33  ;;  %v339_v43 = vsub.f32 %v324_v32, %v336_v34  ;;  %v2793_v44 = vsub.f32 %v480_v39, %v2496_v3  ;;  %289 = vrot.lane.b32.xlu0 %v2786_v37, %s2442_s25  ;;  %2024 = vrcp.f32 %v464_v23 }
  0xb4   : > { %v2796_v62 = vsub.f32 %v482_v40, %v2506_v8  ;;  %v2011_v46 = vpop.eup %2010  ;;  %v341_v47 = vmul.f32 %v338_v38, %v338_v38  ;;  %v496_v49 = vadd.f32 0.81, %v493_v36  ;;  %v497_v50 = vadd.f32 0.81, %v494_v59 }
  0xb5   : > { %2026 = vrcp.f32 %v343_v27  ;;  %v342_v51 = vmul.f32 %v339_v43, %v339_v43  ;;  %v495_v53 = vmul.f32 %v2793_v44, %v2793_v44  ;;  %v388_v23 = vmul.f32 %v2011_v46, %v2741_v17 }
  0xb6   : > { %v2802_v54 = vpop.eup %2012  ;;  %v344_v55 = vadd.f32 0.1, %v341_v47  ;;  %2028 = vrsqrt.f32 %v496_v49  ;;  %v505_v58 = vmul.f32 %v2796_v62, %v2796_v62  ;;  %v484_v5 = vpop.permute.xlu1 %483  ;;  %v389_v28 = vmul.f32 %v2009_v41, %v2738_v10 }
  0xb7   : > { %v486_v13 = vpop.permute.xlu0 %485  ;;  %v2806_v14 = vpop.eup %2014  ;;  %v345_v15 = vadd.f32 0.1, %v342_v51  ;;  %2030 = vrsqrt.f32 %v497_v50  ;;  %v498_v16 = vadd.f32 0.81, %v495_v53  ;;  %v2809_v52 = vsub.f32 %v484_v5, %v2514_v12  ;;  %293 = vrot.lane.b32.xlu0 %v2802_v54, %s2442_s25 }
  0xb8   : > { %v2017_v19 = vpop.eup %2016  ;;  %2032 = vrcp.f32 %v344_v55  ;;  %v508_v20 = vadd.f32 0.81, %v505_v58  ;;  %v2814_v21 = vsub.f32 %v486_v13, %v2509_v9  ;;  %291 = vrot.lane.b32.xlu1 %v2806_v14, %s2442_s25 }
  0xb9   : > { %v2019_v22 = vpop.eup %2018  ;;  %2034 = vrcp.f32 %v345_v15  ;;  %v400_v24 = vmul.f32 %v2017_v19, %v2749_v18  ;;  %v506_v25 = vmul.f32 %v2809_v52, %v2809_v52 }
  0xba   : > { %2036 = vrsqrt.f32 %v498_v16  ;;  %v507_v35 = vmul.f32 %v2814_v21, %v2814_v21  ;;  %v544_v29 = vpop.permute.xlu1 %543  ;;  %v390_v18 = vmul.f32 %v2019_v22, %v2754_v42 }
  0xbb   : > { %v542_v30 = vpop.permute.xlu0 %541  ;;  %v2021_v45 = vpop.eup %2020  ;;  %v403_v32 = vsub.f32 %v388_v23, %v400_v24  ;;  %2038 = vrsqrt.f32 %v508_v20  ;;  %v509_v33 = vadd.f32 0.81, %v506_v25  ;;  %v2826_v34 = vsub.f32 %v544_v29, %v2493_v2 }
  0xbc   : > { %v2023_v17 = vpop.eup %2022  ;;  %v402_v38 = vmul.f32 %v2021_v45, %v2765_v6  ;;  %v510_v36 = vadd.f32 0.81, %v507_v35  ;;  %v2831_v10 = vsub.f32 %v542_v30, %v2500_v4 }
  0xbd   : > { %v406_v59 = vmul.f32 %v403_v32, %v403_v32  ;;  %v401_v39 = vmul.f32 %v2023_v17, %v2768_v11  ;;  %2040 = vrsqrt.f32 %v509_v33  ;;  %v560_v40 = vmul.f32 %v2826_v34, %v2826_v34  ;;  %v2836_v41 = vpop.eup %2024 }
  0xbe   : > { %v405_v27 = vsub.f32 %v390_v18, %v402_v38  ;;  %2042 = vrsqrt.f32 %v510_v36  ;;  %v559_v42 = vmul.f32 %v2831_v10, %v2831_v10  ;;  %v548_v43 = vpop.permute.xlu1 %547 }
  0xbf   : > { %v546_v6 = vpop.permute.xlu0 %545  ;;  %v2027_v46 = vpop.eup %2026  ;;  %v409_v47 = vadd.f32 0.1, %v406_v59  ;;  %v404_v49 = vsub.f32 %v389_v28, %v401_v39  ;;  %v563_v50 = vadd.f32 0.81, %v560_v40  ;;  %v2841_v51 = vsub.f32 %v548_v43, %v2506_v8 }
  0xc0   : > { %v2029_v11 = vpop.eup %2028  ;;  %v2844_v53 = vadd.f32 %v2027_v46, %v2786_v37  ;;  %v408_v55 = vmul.f32 %v405_v27, %v405_v27  ;;  %v562_v58 = vadd.f32 0.81, %v559_v42  ;;  %v2847_v5 = vsub.f32 %v546_v6, %v2496_v3  ;;  %352 = vrot.lane.b32.xlu1 %v2027_v46, %s2441_s24 }
  0xc1   : > { %v2031_v13 = vpop.eup %2030  ;;  %2044 = vrcp.f32 %v409_v47  ;;  %v407_v15 = vmul.f32 %v404_v49, %v404_v49  ;;  %v571_v16 = vmul.f32 %v2841_v51, %v2841_v51 }
  0xc2   : > { %v2033_v19 = vpop.eup %2032  ;;  %v411_v20 = vadd.f32 0.1, %v408_v55  ;;  %2046 = vrsqrt.f32 %v563_v50  ;;  %v561_v37 = vmul.f32 %v2847_v5, %v2847_v5  ;;  %v552_v22 = vpop.permute.xlu1 %551  ;;  %v503_v18 = vmul.f32 %v2031_v13, %v2782_v31 }
  0xc3   : > { %v550_v23 = vpop.permute.xlu0 %549  ;;  %v2035_v24 = vpop.eup %2034  ;;  %v2855_v25 = vadd.f32 %v2033_v19, %v2806_v14  ;;  %v410_v28 = vadd.f32 0.1, %v407_v15  ;;  %2048 = vrsqrt.f32 %v562_v58  ;;  %v574_v35 = vadd.f32 0.81, %v571_v16  ;;  %354 = vrot.lane.b32.xlu0 %v2033_v19, %s2441_s24 }
  0xc4   : > { %v2037_v29 = vpop.eup %2036  ;;  %v2859_v30 = vadd.f32 %v2035_v24, %v2802_v54  ;;  %2050 = vrcp.f32 %v411_v20  ;;  %v564_v45 = vadd.f32 0.81, %v561_v37  ;;  %v2862_v32 = vsub.f32 %v552_v22, %v2509_v9  ;;  %356 = vrot.lane.b32.xlu1 %v2035_v24, %s2441_s24 }
  0xc5   : > { %v2039_v33 = vpop.eup %2038  ;;  %2052 = vrcp.f32 %v410_v28  ;;  %v502_v14 = vmul.f32 %v2029_v11, %v2779_v7  ;;  %v2867_v17 = vsub.f32 %v550_v23, %v2514_v12 }
  0xc6   : > { %v514_v38 = vmul.f32 %v2039_v33, %v2796_v62  ;;  %2054 = vrsqrt.f32 %v574_v35  ;;  %v573_v54 = vmul.f32 %v2862_v32, %v2862_v32  ;;  %v608_v36 = vpop.permute.xlu1 %607  ;;  %v504_v62 = vmul.f32 %v2037_v29, %v2793_v44 }
  0xc7   : > { %v610_v59 = vpop.permute.xlu0 %609  ;;  %v2041_v39 = vpop.eup %2040  ;;  %2056 = vrsqrt.f32 %v564_v45  ;;  %v572_v40 = vmul.f32 %v2867_v17, %v2867_v17  ;;  %v2876_v7 = vsub.f32 %v608_v36, %v2500_v4 }
  0xc8   : > { %v2879_v27 = vsub.f32 %v610_v59, %v2493_v2  ;;  %v2043_v31 = vpop.eup %2042  ;;  %v517_v42 = vsub.f32 %v502_v14, %v514_v38  ;;  %v515_v43 = vmul.f32 %v2041_v39, %v2809_v52  ;;  %v576_v6 = vadd.f32 0.81, %v573_v54 }
  0xc9   : > { %v516_v46 = vmul.f32 %v2043_v31, %v2814_v21  ;;  %v575_v47 = vadd.f32 0.81, %v572_v40  ;;  %v625_v49 = vmul.f32 %v2876_v7, %v2876_v7 }
  0xca   : > { %v626_v50 = vmul.f32 %v2879_v27, %v2879_v27  ;;  %v520_v11 = vmul.f32 %v517_v42, %v517_v42  ;;  %v518_v55 = vsub.f32 %v503_v18, %v515_v43  ;;  %2058 = vrsqrt.f32 %v576_v6  ;;  %v612_v58 = vpop.permute.xlu1 %611 }
  0xcb   : > { %v614_v13 = vpop.permute.xlu0 %613  ;;  %v2045_v15 = vpop.eup %2044  ;;  %v519_v44 = vsub.f32 %v504_v62, %v516_v46  ;;  %2060 = vrsqrt.f32 %v575_v47  ;;  %v628_v16 = vadd.f32 0.81, %v625_v49  ;;  %v2889_v37 = vsub.f32 %v612_v58, %v2496_v3 }
  0xcc   : > { %v629_v52 = vadd.f32 0.81, %v626_v50  ;;  %v2047_v19 = vpop.eup %2046  ;;  %v523_v20 = vadd.f32 0.1, %v520_v11  ;;  %v521_v21 = vmul.f32 %v518_v55, %v518_v55  ;;  %v2892_v22 = vsub.f32 %v614_v13, %v2506_v8  ;;  %418 = vrot.lane.b32.xlu0 %v2045_v15, %s2440_s23 }
  0xcd   : > { %v2049_v23 = vpop.eup %2048  ;;  %v522_v24 = vmul.f32 %v519_v44, %v519_v44  ;;  %v569_v28 = vmul.f32 %v2047_v19, %v2826_v34  ;;  %2062 = vrsqrt.f32 %v628_v16  ;;  %v415_v35 = vadd.f32 %v2045_v15, %v2844_v53 }
  0xce   : > { %v2051_v29 = vpop.eup %2050  ;;  %2064 = vrcp.f32 %v523_v20  ;;  %v524_v45 = vadd.f32 0.1, %v521_v21  ;;  %v568_v33 = vmul.f32 %v2049_v23, %v2831_v10  ;;  %v627_v14 = vmul.f32 %v2889_v37, %v2889_v37  ;;  %v616_v18 = vpop.permute.xlu1 %615 }
  0xcf   : > { %v618_v38 = vpop.permute.xlu0 %617  ;;  %v2053_v54 = vpop.eup %2052  ;;  %v525_v36 = vadd.f32 0.1, %v522_v24  ;;  %2066 = vrsqrt.f32 %v629_v52  ;;  %v637_v59 = vmul.f32 %v2892_v22, %v2892_v22  ;;  %v2903_v34 = vsub.f32 %v616_v18, %v2514_v12 }
  0xd0   : > { %v2055_v53 = vpop.eup %2054  ;;  %2068 = vrcp.f32 %v524_v45  ;;  %v630_v39 = vadd.f32 0.81, %v627_v14  ;;  %v2906_v40 = vsub.f32 %v618_v38, %v2509_v9  ;;  %422 = vrot.lane.b32.xlu0 %v2051_v29, %s2440_s23  ;;  %420 = vrot.lane.b32.xlu1 %v2053_v54, %s2440_s23  ;;  %v417_v10 = vadd.f32 %v2051_v29, %v2859_v30 }
  0xd1   : > { %v2057_v31 = vpop.eup %2056  ;;  %2070 = vrcp.f32 %v525_v36  ;;  %v580_v62 = vmul.f32 %v2055_v53, %v2841_v51  ;;  %v640_v42 = vadd.f32 0.81, %v637_v59  ;;  %v638_v43 = vmul.f32 %v2903_v34, %v2903_v34 }
  0xd2   : > { %v570_v6 = vmul.f32 %v2057_v31, %v2847_v5  ;;  %2072 = vrsqrt.f32 %v630_v39  ;;  %v639_v46 = vmul.f32 %v2906_v40, %v2906_v40  ;;  %v699_v47 = vpop.permute.xlu1 %698  ;;  %v471_v50 = vadd.f32 %v2758_v48, %v417_v10 }
  0xd3   : > { %v697_v49 = vpop.permute.xlu0 %696  ;;  %v583_v11 = vsub.f32 %v568_v33, %v580_v62  ;;  %2074 = vrsqrt.f32 %v640_v42  ;;  %v641_v30 = vadd.f32 0.81, %v638_v43  ;;  %v2919_v55 = vsub.f32 %v699_v47, %v2493_v2 }
  0xd4   : > { %v2059_v51 = vpop.eup %2058  ;;  %v642_v58 = vadd.f32 0.81, %v639_v46  ;;  %v2922_v13 = vsub.f32 %v697_v49, %v2500_v4  ;;  %v416_v5 = vadd.f32 %v2053_v54, %v2855_v25  ;;  %v469_v15 = vadd.f32 %v2751_v26, %v415_v35 }
  0xd5   : > { %v2061_v44 = vpop.eup %2060  ;;  %v586_v16 = vmul.f32 %v583_v11, %v583_v11  ;;  %v582_v52 = vmul.f32 %v2059_v51, %v2862_v32  ;;  %2076 = vrsqrt.f32 %v641_v30  ;;  %v715_v19 = vmul.f32 %v2919_v55, %v2919_v55 }
  0xd6   : > { %v581_v2 = vmul.f32 %v2061_v44, %v2867_v17  ;;  %2078 = vrsqrt.f32 %v642_v58  ;;  %v714_v20 = vmul.f32 %v2922_v13, %v2922_v13  ;;  %v703_v4 = vpop.permute.xlu1 %702  ;;  %v470_v25 = vadd.f32 %v2836_v41, %v416_v5  ;;  %v2967_v44 = vld [vmem:[%s2484_s16] sm:$0xff] }
  0xd7   : > { %v701_v21 = vpop.permute.xlu0 %700  ;;  %v2063_v23 = vpop.eup %2062  ;;  %v589_v24 = vadd.f32 0.1, %v586_v16  ;;  %v585_v35 = vsub.f32 %v570_v6, %v582_v52  ;;  %v718_v29 = vadd.f32 0.81, %v715_v19  ;;  %v2934_v32 = vsub.f32 %v703_v4, %v2506_v8  ;;  %v2973_v52 = vld [vmem:[%s2484_s16 + $0x8] sm:$0xff] }
  0xd8   : > { %v2065_v45 = vpop.eup %2064  ;;  %v584_v33 = vsub.f32 %v569_v28, %v581_v2  ;;  %v717_v14 = vadd.f32 0.81, %v714_v20  ;;  %v2937_v17 = vsub.f32 %v701_v21, %v2496_v3  ;;  %v634_v8 = vmul.f32 %v2063_v23, %v2876_v7 }
  0xd9   : > { %v2067_v18 = vpop.eup %2066  ;;  %2080 = vrcp.f32 %v589_v24  ;;  %v588_v38 = vmul.f32 %v585_v35, %v585_v35  ;;  %v726_v54 = vmul.f32 %v2934_v32, %v2934_v32  ;;  %532 = vrot.lane.b32.xlu1 %v2065_v45, %s2439_s22  ;;  %v2942_v36 = vadd.f32 %v2065_v45, %v469_v15 }
  0xda   : > { %v2069_v59 = vpop.eup %2068  ;;  %v587_v53 = vmul.f32 %v584_v33, %v584_v33  ;;  %2082 = vrsqrt.f32 %v718_v29  ;;  %v716_v28 = vmul.f32 %v2937_v17, %v2937_v17  ;;  %v707_v3 = vpop.permute.xlu1 %706  ;;  %v635_v11 = vmul.f32 %v2067_v18, %v2879_v27  ;;  %v2985_v18 = vld [vmem:[%s2484_s16 + $0x10] sm:$0xff] }
  0xdb   : > { %v705_v39 = vpop.permute.xlu0 %704  ;;  %v2071_v10 = vpop.eup %2070  ;;  %v591_v31 = vadd.f32 0.1, %v588_v38  ;;  %2084 = vrsqrt.f32 %v717_v14  ;;  %v729_v62 = vadd.f32 0.81, %v726_v54  ;;  %v2948_v42 = vsub.f32 %v707_v3, %v2509_v9  ;;  %534 = vrot.lane.b32.xlu0 %v2069_v59, %s2439_s22 }
  0xdc   : > { %v2073_v43 = vpop.eup %2072  ;;  %v590_v6 = vadd.f32 0.1, %v587_v53  ;;  %v719_v46 = vadd.f32 0.81, %v716_v28  ;;  %v2952_v7 = vsub.f32 %v705_v39, %v2514_v12  ;;  %v2954_v47 = vadd.f32 %v2071_v10, %v471_v50  ;;  %v2991_v53 = vld [vmem:[%s2490_s19] sm:$0xff] }
  0xdd   : > { %v2075_v49 = vpop.eup %2074  ;;  %2086 = vrcp.f32 %v591_v31  ;;  %v728_v9 = vmul.f32 %v2948_v42, %v2948_v42  ;;  %536 = vrot.lane.b32.xlu1 %v2071_v10, %s2439_s22  ;;  %v2960_v30 = vadd.f32 %v2069_v59, %v470_v25  ;;  %v636_v51 = vmul.f32 %v2073_v43, %v2889_v37 }
  0xde   : > { %2088 = vrcp.f32 %v590_v6  ;;  %v646_v12 = vmul.f32 %v2075_v49, %v2892_v22  ;;  %v727_v50 = vmul.f32 %v2952_v7, %v2952_v7  ;;  %v760_v58 = vpop.permute.xlu1 %759 }
  0xdf   : > { %v762_v5 = vpop.permute.xlu0 %761  ;;  %v2077_v15 = vpop.eup %2076  ;;  %2090 = vrsqrt.f32 %v729_v62  ;;  %v731_v27 = vadd.f32 0.81, %v728_v9  ;;  %v2970_v16 = vsub.f32 %v760_v58, %v2967_v44 }
  0xe0   : > { %v2976_v19 = vsub.f32 %v762_v5, %v2973_v52  ;;  %v2079_v37 = vpop.eup %2078  ;;  %v649_v22 = vsub.f32 %v634_v8, %v646_v12  ;;  %v647_v2 = vmul.f32 %v2077_v15, %v2903_v34  ;;  %2092 = vrsqrt.f32 %v719_v46 }
  0xe1   : > { %v730_v20 = vadd.f32 0.81, %v727_v50  ;;  %v648_v4 = vmul.f32 %v2079_v37, %v2906_v40  ;;  %2094 = vrsqrt.f32 %v731_v27  ;;  %v777_v21 = vmul.f32 %v2970_v16, %v2970_v16  ;;  %v3011_v50 = vld [vmem:[%s2490_s19 + $0x10] sm:$0xff] }
  0xe2   : > { %v778_v25 = vmul.f32 %v2976_v19, %v2976_v19  ;;  %v652_v23 = vmul.f32 %v649_v22, %v649_v22  ;;  %v650_v24 = vsub.f32 %v635_v11, %v647_v2  ;;  %v764_v35 = vpop.permute.xlu1 %763 }
  0xe3   : > { %2096 = vrsqrt.f32 %v730_v20  ;;  %v766_v29 = vpop.permute.xlu0 %765  ;;  %v2081_v45 = vpop.eup %2080  ;;  %v651_v34 = vsub.f32 %v636_v51, %v648_v4  ;;  %v780_v33 = vadd.f32 0.81, %v777_v21  ;;  %v2988_v40 = vsub.f32 %v764_v35, %v2985_v18 }
  0xe4   : > { %v781_v14 = vadd.f32 0.81, %v778_v25  ;;  %v2083_v38 = vpop.eup %2082  ;;  %v655_v54 = vadd.f32 0.1, %v652_v23  ;;  %v653_v59 = vmul.f32 %v650_v24, %v650_v24  ;;  %v2994_v8 = vsub.f32 %v766_v29, %v2991_v53  ;;  %598 = vrot.lane.b32.xlu0 %v2081_v45, %s2438_s21 }
  0xe5   : > { %v2998_v28 = vadd.f32 %v2081_v45, %v2942_v36  ;;  %v2085_v3 = vpop.eup %2084  ;;  %v654_v39 = vmul.f32 %v651_v34, %v651_v34  ;;  %2098 = vrsqrt.f32 %v780_v33  ;;  %v779_v10 = vmul.f32 %v2988_v40, %v2988_v40  ;;  %v3005_v36 = vld [vmem:[%s2490_s19 + $0x8] sm:$0xff] }
  0xe6   : > { %2100 = vrcp.f32 %v655_v54  ;;  %v656_v31 = vadd.f32 0.1, %v653_v59  ;;  %v789_v62 = vmul.f32 %v2994_v8, %v2994_v8  ;;  %v768_v43 = vpop.permute.xlu1 %767  ;;  %v723_v2 = vmul.f32 %v2085_v3, %v2922_v13 }
  0xe7   : > { %v770_v6 = vpop.permute.xlu0 %769  ;;  %v2087_v46 = vpop.eup %2086  ;;  %v657_v49 = vadd.f32 0.1, %v654_v39  ;;  %2102 = vrsqrt.f32 %v781_v14  ;;  %v782_v11 = vadd.f32 0.81, %v779_v10  ;;  %v3008_v9 = vsub.f32 %v768_v43, %v3005_v36 }
  0xe8   : > { %v2089_v51 = vpop.eup %2088  ;;  %2104 = vrcp.f32 %v656_v31  ;;  %v792_v12 = vadd.f32 0.81, %v789_v62  ;;  %v3014_v58 = vsub.f32 %v770_v6, %v3011_v50  ;;  %602 = vrot.lane.b32.xlu0 %v2087_v46, %s2438_s21  ;;  %v597_v5 = vadd.f32 %v2087_v46, %v2954_v47 }
  0xe9   : > { %v2091_v15 = vpop.eup %2090  ;;  %2106 = vrcp.f32 %v657_v49  ;;  %v790_v27 = vmul.f32 %v3008_v9, %v3008_v9  ;;  %600 = vrot.lane.b32.xlu1 %v2089_v51, %s2438_s21  ;;  %v3022_v37 = vadd.f32 %v2089_v51, %v2960_v30 }
  0xea   : > { %v2093_v22 = vpop.eup %2092  ;;  %v735_v20 = vmul.f32 %v2091_v15, %v2934_v32  ;;  %2108 = vrsqrt.f32 %v782_v11  ;;  %v791_v4 = vmul.f32 %v3014_v58, %v3014_v58  ;;  %v828_v47 = vpop.permute.xlu1 %827  ;;  %v724_v32 = vmul.f32 %v2083_v38, %v2919_v55 }
  0xeb   : > { %v826_v21 = vpop.permute.xlu0 %825  ;;  %v2095_v25 = vpop.eup %2094  ;;  %v725_v23 = vmul.f32 %v2093_v22, %v2937_v17  ;;  %2110 = vrsqrt.f32 %v792_v12  ;;  %v793_v24 = vadd.f32 0.81, %v790_v27  ;;  %v3036_v33 = vsub.f32 %v828_v47, %v2973_v52 }
  0xec   : > { %v738_v29 = vsub.f32 %v723_v2, %v735_v20  ;;  %v737_v30 = vmul.f32 %v2095_v25, %v2948_v42  ;;  %v794_v45 = vadd.f32 0.81, %v791_v4  ;;  %v3031_v13 = vsub.f32 %v826_v21, %v2967_v44 }
  0xed   : > { %v2097_v35 = vpop.eup %2096  ;;  %2112 = vrsqrt.f32 %v793_v24  ;;  %v844_v46 = vmul.f32 %v3036_v33, %v3036_v33 }
  0xee   : > { %v736_v34 = vmul.f32 %v2097_v35, %v2952_v7  ;;  %v741_v14 = vmul.f32 %v738_v29, %v738_v29  ;;  %v740_v17 = vsub.f32 %v725_v23, %v737_v30  ;;  %2114 = vrsqrt.f32 %v794_v45  ;;  %v832_v59 = vpop.permute.xlu1 %831 }
  0xef   : > { %v843_v54 = vmul.f32 %v3031_v13, %v3031_v13  ;;  %v830_v42 = vpop.permute.xlu0 %829  ;;  %v2099_v3 = vpop.eup %2098  ;;  %v3041_v10 = vsub.f32 %v832_v59, %v2991_v53  ;;  %v847_v29 = vadd.f32 0.81, %v844_v46 }
  0xf0   : > { %v739_v39 = vsub.f32 %v724_v32, %v736_v34  ;;  %v3044_v55 = vsub.f32 %v830_v42, %v2985_v18  ;;  %v2101_v7 = vpop.eup %2100  ;;  %v744_v38 = vadd.f32 0.1, %v741_v14  ;;  %v743_v31 = vmul.f32 %v740_v17, %v740_v17 }
  0xf1   : > { %v846_v62 = vadd.f32 0.81, %v843_v54  ;;  %v2103_v43 = vpop.eup %2102  ;;  %v855_v49 = vmul.f32 %v3041_v10, %v3041_v10  ;;  %664 = vrot.lane.b32.xlu1 %v2101_v7, %s2437_s20  ;;  %v3054_v22 = vadd.f32 %v2101_v7, %v2998_v28  ;;  %v786_v28 = vmul.f32 %v2099_v3, %v2970_v16 }
  0xf2   : > { %v742_v6 = vmul.f32 %v739_v39, %v739_v39  ;;  %v845_v11 = vmul.f32 %v3044_v55, %v3044_v55  ;;  %v2105_v51 = vpop.eup %2104  ;;  %2116 = vrcp.f32 %v744_v38  ;;  %v746_v12 = vadd.f32 0.1, %v743_v31  ;;  %v836_v15 = vpop.permute.xlu1 %835 }
  0xf3   : > { %v834_v27 = vpop.permute.xlu0 %833  ;;  %v2107_v2 = vpop.eup %2106  ;;  %2118 = vrsqrt.f32 %v846_v62  ;;  %v858_v4 = vadd.f32 0.81, %v855_v49  ;;  %666 = vrot.lane.b32.xlu0 %v2105_v51, %s2437_s20  ;;  %v842_v25 = vsub.f32 %v836_v15, %v3011_v50  ;;  %v3064_v30 = vadd.f32 %v2105_v51, %v3022_v37 }
  0xf4   : > { %v745_v20 = vadd.f32 0.1, %v742_v6  ;;  %v848_v47 = vadd.f32 0.81, %v845_v11  ;;  %v2109_v21 = vpop.eup %2108  ;;  %2120 = vrcp.f32 %v746_v12  ;;  %v841_v23 = vsub.f32 %v834_v27, %v3005_v36 }
  0xf5   : > { %v3059_v24 = vadd.f32 %v2107_v2, %v597_v5  ;;  %v2111_v35 = vpop.eup %2110  ;;  %668 = vrot.lane.b32.xlu1 %v2107_v2, %s2437_s20  ;;  %v857_v32 = vmul.f32 %v842_v25, %v842_v25  ;;  %v787_v17 = vmul.f32 %v2103_v43, %v2976_v19  ;;  %v788_v3 = vmul.f32 %v2109_v21, %v2988_v40 }
  0xf6   : > { %2122 = vrcp.f32 %v745_v20  ;;  %v798_v45 = vmul.f32 %v2111_v35, %v2994_v8  ;;  %v856_v34 = vmul.f32 %v841_v23, %v841_v23 }
  0xf7   : > { %2124 = vrsqrt.f32 %v858_v4  ;;  %v2113_v14 = vpop.eup %2112  ;;  %v860_v16 = vadd.f32 0.81, %v857_v32 }
  0xf8   : > { %2126 = vrsqrt.f32 %v848_v47  ;;  %v2115_v5 = vpop.eup %2114  ;;  %v801_v54 = vsub.f32 %v786_v28, %v798_v45  ;;  %v799_v59 = vmul.f32 %v2113_v14, %v3008_v9  ;;  %v859_v42 = vadd.f32 0.81, %v856_v34 }
  0xf9   : > { %v800_v37 = vmul.f32 %v2115_v5, %v3014_v58  ;;  %2128 = vrsqrt.f32 %v847_v29  ;;  %v3121_v5 = vpop.permute.xlu1 %939 }
  0xfa   : > { %v804_v39 = vmul.f32 %v801_v54, %v801_v54  ;;  %v802_v8 = vsub.f32 %v787_v17, %v799_v59  ;;  %2130 = vrsqrt.f32 %v860_v16 }
  0xfb   : > { %v803_v7 = vsub.f32 %v788_v3, %v800_v37  ;;  %2132 = vrsqrt.f32 %v859_v42 }
  0xfc   : > { %v3071_v38 = vpop.eup %2116  ;;  %v807_v19 = vadd.f32 0.1, %v804_v39  ;;  %v805_v31 = vmul.f32 %v802_v8, %v802_v8 }
  0xfd   : > { %v2119_v62 = vpop.eup %2118  ;;  %v806_v43 = vmul.f32 %v803_v7, %v803_v7  ;;  %753 = vrot.lane.b32.xlu0 %v3071_v38, %s2442_s25 }
  0xfe   : > { %v3075_v9 = vpop.eup %2120  ;;  %2134 = vrcp.f32 %v807_v19  ;;  %v808_v40 = vadd.f32 0.1, %v805_v31  ;;  %v852_v11 = vmul.f32 %v2119_v62, %v3031_v13 }
  0xff   : > { %v809_v6 = vadd.f32 0.1, %v806_v43 }
 0x100   : > { %v3077_v58 = vpop.eup %2122  ;;  %2136 = vrcp.f32 %v808_v40 }
 0x101   : > { %v2125_v46 = vpop.eup %2124  ;;  %755 = vrot.lane.b32.xlu1 %v3077_v58, %s2442_s25  ;;  %2138 = vrcp.f32 %v809_v6  ;;  %757 = vrot.lane.b32.xlu0 %v3075_v9, %s2442_s25 }
 0x102   : > { %v2127_v49 = vpop.eup %2126  ;;  %v864_v51 = vmul.f32 %v2125_v46, %v3041_v10 }
 0x103   : > { %v2129_v12 = vpop.eup %2128  ;;  %v854_v4 = vmul.f32 %v2127_v49, %v3044_v55 }
 0x104   : > { %v867_v15 = vsub.f32 %v852_v11, %v864_v51  ;;  %v2131_v27 = vpop.eup %2130  ;;  %v853_v21 = vmul.f32 %v2129_v12, %v3036_v33 }
 0x105   : > { %v2133_v2 = vpop.eup %2132  ;;  %v866_v47 = vmul.f32 %v2131_v27, %v842_v25 }
 0x106   : > { %v870_v20 = vmul.f32 %v867_v15, %v867_v15  ;;  %v865_v35 = vmul.f32 %v2133_v2, %v841_v23 }
 0x107   : > { %v869_v29 = vsub.f32 %v854_v4, %v866_v47 }
 0x108   : > { %v873_v28 = vadd.f32 0.1, %v870_v20  ;;  %v3087_v45 = vpop.eup %2134  ;;  %v868_v13 = vsub.f32 %v853_v21, %v865_v35 }
 0x109   : > { %v872_v10 = vmul.f32 %v869_v29, %v869_v29  ;;  %816 = vrot.lane.b32.xlu1 %v3087_v45, %s2441_s24 }
 0x10a   : > { %2140 = vrcp.f32 %v873_v28  ;;  %v3091_v32 = vpop.eup %2136  ;;  %v871_v34 = vmul.f32 %v868_v13, %v868_v13 }
 0x10b   : > { %v3093_v14 = vpop.eup %2138  ;;  %v875_v55 = vadd.f32 0.1, %v872_v10  ;;  %818 = vrot.lane.b32.xlu0 %v3091_v32, %s2441_s24 }
 0x10c   : > { %v874_v33 = vadd.f32 0.1, %v871_v34 }
 0x10d   : > { %2142 = vrcp.f32 %v875_v55  ;;  %820 = vrot.lane.b32.xlu1 %v3093_v14, %s2441_s24 }
 0x10e   : > { %2144 = vrcp.f32 %v874_v33 }
 0x114   : > { %v3099_v25 = vpop.eup %2140 }
 0x115   : > { %882 = vrot.lane.b32.xlu0 %v3099_v25, %s2440_s23 }
 0x117   : > { %v3103_v23 = vpop.eup %2142 }
 0x118   : > { %v3105_v17 = vpop.eup %2144 }
 0x119   : > { %886 = vrot.lane.b32.xlu0 %v3103_v23, %s2440_s23  ;;  %884 = vrot.lane.b32.xlu1 %v3105_v17, %s2440_s23 }
 0x11d   : > { %941 = vrot.lane.b32.xlu0 %v2635_v56, %s2440_s23  ;;  %943 = vrot.lane.b32.xlu1 %v2647_v61, %s2440_s23 }
 0x121   : > { %945 = vrot.lane.b32.xlu0 %v2645_v60, %s2440_s23  ;;  %947 = vrot.lane.b32.xlu1 %v2656_v0, %s2440_s23 }
 0x125   : > { %949 = vrot.lane.b32.xlu0 %v2654_v63, %s2440_s23  ;;  %v290_v54 = vpop.permute.xlu0 %289 }
 0x129   : > { %v294_v16 = vpop.permute.xlu0 %293 }
 0x12a   : > { %v292_v59 = vpop.permute.xlu1 %291 }
 0x132   : > { %v353_v42 = vpop.permute.xlu1 %352 }
 0x133   : > { %v358_v62 = vadd.f32 %v353_v42, %v290_v54 }
 0x135   : > { %v355_v3 = vpop.permute.xlu0 %354 }
 0x136   : > { %v357_v37 = vpop.permute.xlu1 %356  ;;  %v359_v43 = vadd.f32 %v355_v3, %v292_v59 }
 0x137   : > { %v360_v49 = vadd.f32 %v357_v37, %v294_v16 }
 0x13e   : > { %v419_v39 = vpop.permute.xlu0 %418 }
 0x13f   : > { %v424_v40 = vadd.f32 %v419_v39, %v358_v62  ;;  %v892_v62 = vsub.f32 %v2635_v56, %v2973_v52 }
 0x141   : > { %v472_v12 = vadd.f32 %v2751_v26, %v424_v40  ;;  %v893_v40 = vsub.f32 %v2647_v61, %v2985_v18 }
 0x142   : > { %v421_v8 = vpop.permute.xlu1 %420  ;;  %v423_v7 = vpop.permute.xlu0 %422 }
 0x143   : > { %v425_v11 = vadd.f32 %v421_v8, %v359_v43  ;;  %v426_v51 = vadd.f32 %v423_v7, %v360_v49  ;;  %v896_v49 = vsub.f32 %v2654_v63, %v3011_v50 }
 0x145   : > { %v473_v2 = vadd.f32 %v2836_v41, %v425_v11  ;;  %v474_v4 = vadd.f32 %v2758_v48, %v426_v51  ;;  %v898_v11 = vmul.f32 %v892_v62, %v892_v62 }
 0x14b   : > { %v533_v19 = vpop.permute.xlu1 %532 }
 0x14c   : > { %v538_v27 = vadd.f32 %v533_v19, %v472_v12  ;;  %v891_v19 = vsub.f32 %v2637_v57, %v2967_v44 }
 0x14d   : > { %v535_v31 = vpop.permute.xlu0 %534 }
 0x14e   : > { %v539_v47 = vadd.f32 %v535_v31, %v473_v2  ;;  %v897_v43 = vmul.f32 %v891_v19, %v891_v19 }
 0x14f   : > { %v537_v6 = vpop.permute.xlu1 %536 }
 0x150   : > { %v540_v28 = vadd.f32 %v537_v6, %v474_v4  ;;  %v900_v12 = vadd.f32 0.81, %v897_v43 }
 0x152   : > { %2146 = vrsqrt.f32 %v900_v12 }
 0x156   : > { %v599_v46 = vpop.permute.xlu0 %598 }
 0x157   : > { %v604_v21 = vadd.f32 %v599_v46, %v538_v27 }
 0x15a   : > { %v603_v20 = vpop.permute.xlu0 %602 }
 0x15b   : > { %v601_v15 = vpop.permute.xlu1 %600  ;;  %v606_v34 = vadd.f32 %v603_v20, %v540_v28  ;;  %v911_v20 = vmul.f32 %v896_v49, %v896_v49 }
 0x15c   : > { %v605_v29 = vadd.f32 %v601_v15, %v539_v47  ;;  %v899_v15 = vmul.f32 %v893_v40, %v893_v40  ;;  %v901_v47 = vadd.f32 0.81, %v898_v11 }
 0x163   : > { %v665_v35 = vpop.permute.xlu1 %664 }
 0x164   : > { %v670_v13 = vadd.f32 %v665_v35, %v604_v21  ;;  %v902_v35 = vadd.f32 0.81, %v899_v15 }
 0x165   : > { %v667_v10 = vpop.permute.xlu0 %666 }
 0x166   : > { %v671_v55 = vadd.f32 %v667_v10, %v605_v29  ;;  %v673_v26 = vrot.slane %v670_v13, 3  ;;  %v914_v29 = vadd.f32 0.81, %v911_v20  ;;  %v951_v13 = vsub.f32 %v3121_v5, %v2967_v44 }
 0x167   : > { %v669_v33 = vpop.permute.xlu1 %668 }
 0x168   : > { %v672_v54 = vadd.f32 %v669_v33, %v606_v34  ;;  %v674_v59 = vrot.slane %v671_v55, 3  ;;  %v957_v55 = vmul.f32 %v951_v13, %v951_v13 }
 0x16a   : > { %v675_v16 = vrot.slane %v672_v54, 3  ;;  %v678_v41 = vsel %vm676_vm2, %v673_v26, %v674_v59 }
 0x16b   : > { %v3128_v42 = vadd.f32 %v678_v41, %v3054_v22  ;;  %v894_v22 = vsub.f32 %v2645_v60, %v2991_v53  ;;  %v2147_v41 = vpop.eup %2146 }
 0x16c   : > { %v679_v48 = vsel %vm676_vm2, %v675_v16, %v673_v26  ;;  %v677_v3 = vsel %vm676_vm2, %v674_v59, %v675_v16 }
 0x16d   : > { %v3131_v37 = vadd.f32 %v679_v48, %v3059_v24  ;;  %v3134_v39 = vadd.f32 %v677_v3, %v3064_v30  ;;  %v895_v24 = vsub.f32 %v2656_v0, %v3005_v36  ;;  %v909_v46 = vmul.f32 %v894_v22, %v894_v22 }
 0x16e   : > { %v960_v48 = vadd.f32 0.81, %v957_v55 }
 0x16f   : > { %v3136_v8 = vpop.permute.xlu0 %753  ;;  %v910_v51 = vmul.f32 %v895_v24, %v895_v24  ;;  %v912_v2 = vadd.f32 0.81, %v909_v46 }
 0x171   : > { %v913_v21 = vadd.f32 0.81, %v910_v51  ;;  %2148 = vrsqrt.f32 %v912_v2 }
 0x172   : > { %2150 = vrsqrt.f32 %v901_v47 }
 0x173   : > { %v3138_v7 = vpop.permute.xlu1 %755  ;;  %v3142_v31 = vpop.permute.xlu0 %757  ;;  %2152 = vrsqrt.f32 %v913_v21 }
 0x174   : > { %3979 = vst [vmem:[#allocation2_spill] sm:$0xff] %v3138_v7  ;;  %3980 = vst [vmem:[#allocation3_spill] sm:$0xff] %v3142_v31  ;;  %2154 = vrsqrt.f32 %v902_v35 }
 0x175   : > { %2156 = vrsqrt.f32 %v914_v29 }
 0x176   : > { %2158 = vrsqrt.f32 %v960_v48 }
 0x17b   : > { %v3150_v30 = vpop.permute.xlu1 %816  ;;  %v2149_v46 = vpop.eup %2148 }
 0x17c   : > { %v2151_v12 = vpop.eup %2150 }
 0x17d   : > { %v3154_v6 = vpop.permute.xlu0 %818  ;;  %v2153_v2 = vpop.eup %2152 }
 0x17e   : > { %3981 = vst [vmem:[#allocation4_spill] sm:$0xff] %v3154_v6  ;;  %v2155_v21 = vpop.eup %2154 }
 0x17f   : > { %v3160_v4 = vpop.permute.xlu1 %820  ;;  %v2157_v55 = vpop.eup %2156  ;;  %v908_v31 = vmul.f32 %v2155_v21, %v893_v40 }
 0x180   : > { %3983 = vst [vmem:[#allocation6_spill] sm:$0xff] %v3160_v4 }
 0x187   : > { %v3158_v27 = vpop.permute.xlu0 %882 }
 0x188   : > { %3982 = vst [vmem:[#allocation5_spill] sm:$0xff] %v3158_v27  ;;  %v920_v27 = vmul.f32 %v2157_v55, %v896_v49 }
 0x18b   : > { %v3162_v28 = vpop.permute.xlu0 %886  ;;  %v3166_v10 = vpop.permute.xlu1 %884 }
 0x18c   : > { %3984 = vst [vmem:[#allocation7_spill] sm:$0xff] %v3162_v28  ;;  %3985 = vst [vmem:[#allocation8_spill] sm:$0xff] %v3166_v10  ;;  %v906_v28 = vmul.f32 %v2147_v41, %v891_v19  ;;  %v907_v10 = vmul.f32 %v2151_v12, %v892_v62 }
 0x18f   : > { %v942_v34 = vpop.permute.xlu0 %941  ;;  %v944_v33 = vpop.permute.xlu1 %943 }
 0x190   : > { %v952_v26 = vsub.f32 %v942_v34, %v2973_v52  ;;  %v953_v54 = vsub.f32 %v944_v33, %v2985_v18 }
 0x192   : > { %v958_v59 = vmul.f32 %v952_v26, %v952_v26  ;;  %v959_v3 = vmul.f32 %v953_v54, %v953_v54 }
 0x193   : > { %v946_v16 = vpop.permute.xlu0 %945  ;;  %v948_v43 = vpop.permute.xlu1 %947 }
 0x194   : > { %v954_v5 = vsub.f32 %v946_v16, %v2991_v53  ;;  %v961_v11 = vadd.f32 0.81, %v958_v59  ;;  %v955_v51 = vsub.f32 %v948_v43, %v3005_v36  ;;  %v962_v35 = vadd.f32 0.81, %v959_v3 }
 0x195   : > { %v918_v16 = vmul.f32 %v2149_v46, %v894_v22  ;;  %v919_v43 = vmul.f32 %v2153_v2, %v895_v24  ;;  %v923_v3 = vsub.f32 %v908_v31, %v920_v27  ;;  %v750_v27 = vadd.f32 %v3071_v38, %v3128_v42 }
 0x196   : > { %v969_v15 = vmul.f32 %v954_v5, %v954_v5  ;;  %v970_v20 = vmul.f32 %v955_v51, %v955_v51  ;;  %2160 = vrsqrt.f32 %v961_v11 }
 0x197   : > { %v950_v47 = vpop.permute.xlu0 %949  ;;  %v921_v6 = vsub.f32 %v906_v28, %v918_v16  ;;  %v922_v48 = vsub.f32 %v907_v10, %v919_v43  ;;  %v926_v19 = vmul.f32 %v923_v3, %v923_v3 }
 0x198   : > { %v972_v29 = vadd.f32 0.81, %v969_v15  ;;  %v956_v34 = vsub.f32 %v950_v47, %v3011_v50  ;;  %v973_v33 = vadd.f32 0.81, %v970_v20  ;;  %v2159_v47 = vpop.eup %2158 }
 0x199   : > { %v924_v15 = vmul.f32 %v921_v6, %v921_v6  ;;  %v925_v7 = vmul.f32 %v922_v48, %v922_v48  ;;  %v966_v41 = vmul.f32 %v2159_v47, %v951_v13  ;;  %v751_v13 = vadd.f32 %v3077_v58, %v3134_v39 }
 0x19a   : > { %2162 = vrsqrt.f32 %v972_v29  ;;  %v971_v59 = vmul.f32 %v956_v34, %v956_v34  ;;  %v813_v29 = vadd.f32 %v3087_v45, %v750_v27 }
 0x19b   : > { %2164 = vrsqrt.f32 %v973_v33  ;;  %v927_v62 = vadd.f32 0.1, %v924_v15 }
 0x19c   : > { %2166 = vrsqrt.f32 %v962_v35  ;;  %v974_v4 = vadd.f32 0.81, %v971_v59  ;;  %v928_v35 = vadd.f32 0.1, %v925_v7  ;;  %v879_v58 = vadd.f32 %v3099_v25, %v813_v29 }
 0x19e   : > { %2168 = vrsqrt.f32 %v974_v4  ;;  %v929_v4 = vadd.f32 0.1, %v926_v19 }
 0x19f   : > { %2170 = vrcp.f32 %v927_v62 }
 0x1a0   : > { %v2161_v11 = vpop.eup %2160  ;;  %2172 = vrcp.f32 %v928_v35 }
 0x1a1   : > { %v967_v12 = vmul.f32 %v2161_v11, %v952_v26  ;;  %2174 = vrcp.f32 %v929_v4 }
 0x1a4   : > { %v2163_v20 = vpop.eup %2162 }
 0x1a5   : > { %v2165_v22 = vpop.eup %2164  ;;  %v978_v46 = vmul.f32 %v2163_v20, %v954_v5 }
 0x1a6   : > { %v2167_v24 = vpop.eup %2166  ;;  %v979_v2 = vmul.f32 %v2165_v22, %v955_v51 }
 0x1a7   : > { %v981_v40 = vsub.f32 %v966_v41, %v978_v46  ;;  %v968_v10 = vmul.f32 %v2167_v24, %v953_v54  ;;  %v752_v54 = vadd.f32 %v3075_v9, %v3131_v37 }
 0x1a8   : > { %v2169_v49 = vpop.eup %2168  ;;  %v982_v28 = vsub.f32 %v967_v12, %v979_v2 }
 0x1a9   : > { %v984_v31 = vmul.f32 %v981_v40, %v981_v40  ;;  %v980_v6 = vmul.f32 %v2169_v49, %v956_v34  ;;  %v814_v34 = vadd.f32 %v3091_v32, %v751_v13  ;;  %v815_v42 = vadd.f32 %v3093_v14, %v752_v54  ;;  %v3183_v39 = vpop.eup %2170 }
 0x1aa   : > { %v985_v21 = vmul.f32 %v982_v28, %v982_v28  ;;  %v3186_v33 = vpop.eup %2172  ;;  %v933_v45 = vadd.f32 %v3183_v39, %v879_v58 }
 0x1ab   : > { %v987_v5 = vadd.f32 0.1, %v984_v31  ;;  %v983_v26 = vsub.f32 %v968_v10, %v980_v6  ;;  %v880_v55 = vadd.f32 %v3105_v17, %v814_v34  ;;  %v3188_v16 = vpop.eup %2174  ;;  %v881_v9 = vadd.f32 %v3103_v23, %v815_v42 }
 0x1ac   : > { %v988_v51 = vadd.f32 0.1, %v985_v21 }
 0x1ad   : > { %2176 = vrcp.f32 %v987_v5  ;;  %v986_v7 = vmul.f32 %v983_v26, %v983_v26  ;;  %v934_v32 = vadd.f32 %v3186_v33, %v880_v55  ;;  %v935_v17 = vadd.f32 %v3188_v16, %v881_v9 }
 0x1ae   : > { %2178 = vrcp.f32 %v988_v51 }
 0x1af   : > { %v989_v38 = vadd.f32 0.1, %v986_v7 }
 0x1b1   : > { %2180 = vrcp.f32 %v989_v38 }
 0x1b7   : > { %v2177_v37 = vpop.eup %2176 }
 0x1b8   : > { %v2179_v59 = vpop.eup %2178  ;;  %996 = vrot.lane.b32.xlu1 %v2177_v37, %s2439_s22  ;;  %v993_v14 = vadd.f32 %v2177_v37, %v933_v45  ;;  %v1147_v37 = vrot.slane %v2967_v44, 7 }
 0x1b9   : > { %998 = vrot.lane.b32.xlu0 %v2179_v59, %s2439_s22  ;;  %v994_v25 = vadd.f32 %v2179_v59, %v934_v32  ;;  %v1149_v32 = vrot.slane %v2985_v18, 7  ;;  %v1148_v59 = vrot.slane %v2973_v52, 7 }
 0x1bb   : > { %v2181_v43 = vpop.eup %2180 }
 0x1bc   : > { %1000 = vrot.lane.b32.xlu1 %v2181_v43, %s2439_s22  ;;  %v3197_v48 = vadd.f32 %v2181_v43, %v935_v17 }
 0x1bd   : > { %1005 = vrot.lane.b32.xlu0 %v2637_v57, %s2441_s24 }
 0x1c0   : > { %1007 = vrot.lane.b32.xlu1 %v2635_v56, %s2441_s24 }
 0x1c1   : > { %1009 = vrot.lane.b32.xlu0 %v2647_v61, %s2441_s24 }
 0x1c4   : > { %1011 = vrot.lane.b32.xlu1 %v2645_v60, %s2441_s24 }
 0x1c5   : > { %1013 = vrot.lane.b32.xlu0 %v2656_v0, %s2441_s24 }
 0x1c8   : > { %1015 = vrot.lane.b32.xlu1 %v2654_v63, %s2441_s24 }
 0x22a   : > { %v3211_v23 = vpop.permute.xlu1 %996 }
 0x22b   : > { %v3213_v3 = vpop.permute.xlu0 %998 }
 0x22e   : > { %v3215_v15 = vpop.permute.xlu1 %1000 }
 0x22f   : > { %v1006_v47 = vpop.permute.xlu0 %1005 }
 0x230   : > { %v1017_v11 = vsub.f32 %v1006_v47, %v2967_v44 }
 0x232   : > { %v1008_v20 = vpop.permute.xlu1 %1007  ;;  %v1023_v19 = vmul.f32 %v1017_v11, %v1017_v11 }
 0x233   : > { %v1018_v22 = vsub.f32 %v1008_v20, %v2973_v52  ;;  %v3219_v41 = vpop.permute.xlu0 %1009 }
 0x234   : > { %v1026_v24 = vadd.f32 0.81, %v1023_v19 }
 0x235   : > { %v1024_v46 = vmul.f32 %v1018_v22, %v1018_v22 }
 0x236   : > { %v1012_v62 = vpop.permute.xlu1 %1011  ;;  %2182 = vrsqrt.f32 %v1026_v24 }
 0x237   : > { %v1020_v12 = vsub.f32 %v1012_v62, %v2991_v53  ;;  %v1014_v2 = vpop.permute.xlu0 %1013  ;;  %v1027_v35 = vadd.f32 0.81, %v1024_v46 }
 0x238   : > { %v1021_v40 = vsub.f32 %v1014_v2, %v3005_v36 }
 0x239   : > { %v1035_v49 = vmul.f32 %v1020_v12, %v1020_v12  ;;  %2184 = vrsqrt.f32 %v1027_v35 }
 0x23a   : > { %v1036_v28 = vmul.f32 %v1021_v40, %v1021_v40  ;;  %v1016_v43 = vpop.permute.xlu1 %1015 }
 0x23b   : > { %v1038_v4 = vadd.f32 0.81, %v1035_v49  ;;  %v1022_v47 = vsub.f32 %v1016_v43, %v3011_v50 }
 0x23c   : > { %v1039_v10 = vadd.f32 0.81, %v1036_v28 }
 0x23d   : > { %2186 = vrsqrt.f32 %v1038_v4  ;;  %v1037_v20 = vmul.f32 %v1022_v47, %v1022_v47 }
 0x23e   : > { %2188 = vrsqrt.f32 %v1039_v10 }
 0x240   : > { %v2183_v31 = vpop.eup %2182 }
 0x241   : > { %v1032_v13 = vmul.f32 %v2183_v31, %v1017_v11  ;;  %v1019_v11 = vsub.f32 %v3219_v41, %v2985_v18  ;;  %v3384_v31 = vld [vmem:[%s2484_s16] sm:$0xff] }
 0x243   : > { %v2185_v6 = vpop.eup %2184  ;;  %v1025_v19 = vmul.f32 %v1019_v11, %v1019_v11 }
 0x244   : > { %v1033_v26 = vmul.f32 %v2185_v6, %v1018_v22  ;;  %v1040_v22 = vadd.f32 0.81, %v1037_v20  ;;  %v3388_v6 = vld [vmem:[%s2484_s16 + $0x8] sm:$0xff] }
 0x245   : > { %v1028_v46 = vadd.f32 0.81, %v1025_v19 }
 0x247   : > { %v2187_v27 = vpop.eup %2186 }
 0x248   : > { %v2189_v21 = vpop.eup %2188  ;;  %v1044_v5 = vmul.f32 %v2187_v27, %v1020_v12 }
 0x249   : > { %v1045_v51 = vmul.f32 %v2189_v21, %v1021_v40 }
 0x24a   : > { %v1047_v7 = vsub.f32 %v1032_v13, %v1044_v5 }
 0x24b   : > { %v1048_v54 = vsub.f32 %v1033_v26, %v1045_v51 }
 0x24c   : > { %v1050_v29 = vmul.f32 %v1047_v7, %v1047_v7 }
 0x24d   : > { %v1051_v34 = vmul.f32 %v1048_v54, %v1048_v54 }
 0x24e   : > { %v1053_v38 = vadd.f32 0.1, %v1050_v29 }
 0x24f   : > { %v1054_v42 = vadd.f32 0.1, %v1051_v34 }
 0x250   : > { %2190 = vrcp.f32 %v1053_v38 }
 0x251   : > { %2192 = vrcp.f32 %v1054_v42 }
 0x252   : > { %2194 = vrsqrt.f32 %v1040_v22  ;;  %v3422_v22 = vld [vmem:[%s2484_s16 + $0x10] sm:$0xff] }
 0x253   : > { %2196 = vrsqrt.f32 %v1028_v46 }
 0x25a   : > { %v2191_v58 = vpop.eup %2190 }
 0x25b   : > { %v2193_v55 = vpop.eup %2192  ;;  %1062 = vrot.lane.b32.xlu0 %v2191_v58, %s2438_s21  ;;  %v3224_v9 = vadd.f32 %v2191_v58, %v993_v14 }
 0x25c   : > { %1064 = vrot.lane.b32.xlu1 %v2193_v55, %s2438_s21  ;;  %v3227_v45 = vadd.f32 %v2193_v55, %v994_v25  ;;  %v2195_v41 = vpop.eup %2194 }
 0x25d   : > { %v2197_v62 = vpop.eup %2196  ;;  %v1046_v24 = vmul.f32 %v2195_v41, %v1022_v47 }
 0x25e   : > { %v1034_v12 = vmul.f32 %v2197_v62, %v1019_v11  ;;  %v3428_v62 = vld [vmem:[%s2490_s19] sm:$0xff] }
 0x25f   : > { %1071 = vrot.lane.b32.xlu0 %v2637_v57, %s2442_s25  ;;  %v3251_v57 = vsel %vm1150_vm3, %v1147_v37, %v1148_v59 }
 0x260   : > { %1073 = vrot.lane.b32.xlu1 %v2635_v56, %s2442_s25  ;;  %v3247_v56 = vsel %vm1150_vm3, %v1149_v32, %v1147_v37  ;;  %v1049_v2 = vsub.f32 %v1034_v12, %v1046_v24 }
 0x262   : > { %v1052_v35 = vmul.f32 %v1049_v2, %v1049_v2 }
 0x263   : > { %1075 = vrot.lane.b32.xlu0 %v2647_v61, %s2442_s25  ;;  %v1156_v61 = vrot.slane %v3011_v50, 7 }
 0x264   : > { %1077 = vrot.lane.b32.xlu1 %v2645_v60, %s2442_s25  ;;  %v1154_v60 = vrot.slane %v2991_v53, 7  ;;  %v1055_v40 = vadd.f32 0.1, %v1052_v35 }
 0x266   : > { %v3266_v14 = vsel %vm1150_vm3, %v1156_v61, %v1154_v60  ;;  %2198 = vrcp.f32 %v1055_v40 }
 0x267   : > { %1079 = vrot.lane.b32.xlu0 %v2656_v0, %s2442_s25  ;;  %v1155_v0 = vrot.slane %v3005_v36, 7  ;;  %3986 = vst [vmem:[#allocation9_spill] sm:$0xff] %v3266_v14 }
 0x268   : > { %1081 = vrot.lane.b32.xlu1 %v2654_v63, %s2442_s25  ;;  %v3261_v63 = vsel %vm1150_vm3, %v1148_v59, %v1149_v32 }
 0x269   : > { %v3274_v25 = vsel %vm1150_vm3, %v1154_v60, %v1155_v0  ;;  %v3278_v17 = vsel %vm1150_vm3, %v1155_v0, %v1156_v61 }
 0x26b   : > { %1160 = vrot.lane.b32.xlu0 %v3247_v56, %s2437_s20 }
 0x26c   : > { %1162 = vrot.lane.b32.xlu1 %v3251_v57, %s2437_s20 }
 0x26f   : > { %1164 = vrot.lane.b32.xlu0 %v3261_v63, %s2437_s20 }
 0x270   : > { %1166 = vrot.lane.b32.xlu1 %v3266_v14, %s2437_s20  ;;  %v3399_v5 = vpop.eup %2198 }
 0x273   : > { %1168 = vrot.lane.b32.xlu0 %v3274_v25, %s2437_s20 }
 0x274   : > { %1170 = vrot.lane.b32.xlu1 %v3278_v17, %s2437_s20 }
 0x277   : > { %1223 = vrot.lane.b32.xlu0 %v3247_v56, %s2438_s21 }
 0x278   : > { %1225 = vrot.lane.b32.xlu1 %v3251_v57, %s2438_s21 }
 0x27b   : > { %1227 = vrot.lane.b32.xlu0 %v3261_v63, %s2438_s21 }
 0x27c   : > { %1229 = vrot.lane.b32.xlu1 %v3266_v14, %s2438_s21 }
 0x27f   : > { %1231 = vrot.lane.b32.xlu0 %v3274_v25, %s2438_s21 }
 0x280   : > { %1233 = vrot.lane.b32.xlu1 %v3278_v17, %s2438_s21 }
 0x283   : > { %1289 = vrot.lane.b32.xlu0 %v3247_v56, %s2439_s22 }
 0x284   : > { %1291 = vrot.lane.b32.xlu1 %v3251_v57, %s2439_s22 }
 0x287   : > { %1293 = vrot.lane.b32.xlu0 %v3261_v63, %s2439_s22 }
 0x288   : > { %1295 = vrot.lane.b32.xlu1 %v3266_v14, %s2439_s22 }
 0x28b   : > { %1297 = vrot.lane.b32.xlu0 %v3274_v25, %s2439_s22 }
 0x28c   : > { %1299 = vrot.lane.b32.xlu1 %v3278_v17, %s2439_s22 }
 0x28f   : > { %1403 = vrot.lane.b32.xlu0 %v3247_v56, %s2440_s23 }
 0x290   : > { %1405 = vrot.lane.b32.xlu1 %v3251_v57, %s2440_s23 }
 0x293   : > { %1407 = vrot.lane.b32.xlu0 %v3261_v63, %s2440_s23 }
 0x294   : > { %1409 = vrot.lane.b32.xlu1 %v3266_v14, %s2440_s23 }
 0x297   : > { %1411 = vrot.lane.b32.xlu0 %v3274_v25, %s2440_s23 }
 0x298   : > { %1413 = vrot.lane.b32.xlu1 %v3278_v17, %s2440_s23 }
 0x29b   : > { %1469 = vrot.lane.b32.xlu0 %v3247_v56, %s2441_s24 }
 0x29c   : > { %1471 = vrot.lane.b32.xlu1 %v3251_v57, %s2441_s24 }
 0x29f   : > { %1473 = vrot.lane.b32.xlu0 %v3261_v63, %s2441_s24 }
 0x2a0   : > { %1475 = vrot.lane.b32.xlu1 %v3266_v14, %s2441_s24 }
 0x2a3   : > { %1477 = vrot.lane.b32.xlu0 %v3274_v25, %s2441_s24 }
 0x2a4   : > { %1479 = vrot.lane.b32.xlu1 %v3278_v17, %s2441_s24 }
 0x2a7   : > { %1535 = vrot.lane.b32.xlu0 %v3247_v56, %s2442_s25 }
 0x2a8   : > { %1537 = vrot.lane.b32.xlu1 %v3251_v57, %s2442_s25 }
 0x2ab   : > { %1539 = vrot.lane.b32.xlu0 %v3261_v63, %s2442_s25 }
 0x2ac   : > { %1541 = vrot.lane.b32.xlu1 %v3266_v14, %s2442_s25 }
 0x2af   : > { %1543 = vrot.lane.b32.xlu0 %v3274_v25, %s2442_s25 }
 0x2b0   : > { %1545 = vrot.lane.b32.xlu1 %v3278_v17, %s2442_s25 }
 0x2b3   : > { %1611 = vrot.lane.b32.xlu0 %v2967_v44, %s2437_s20 }
 0x2b4   : > { %1613 = vrot.lane.b32.xlu1 %v2973_v52, %s2437_s20 }
 0x2b7   : > { %1615 = vrot.lane.b32.xlu0 %v2985_v18, %s2437_s20 }
 0x2b8   : > { %1617 = vrot.lane.b32.xlu1 %v2991_v53, %s2437_s20 }
 0x2bb   : > { %1619 = vrot.lane.b32.xlu0 %v3005_v36, %s2437_s20 }
 0x2bc   : > { %1621 = vrot.lane.b32.xlu1 %v3011_v50, %s2437_s20 }
 0x2bf   : > { %1674 = vrot.lane.b32.xlu0 %v2967_v44, %s2438_s21 }
 0x2c0   : > { %1676 = vrot.lane.b32.xlu1 %v2973_v52, %s2438_s21 }
 0x2c3   : > { %1678 = vrot.lane.b32.xlu0 %v2985_v18, %s2438_s21 }
 0x2c4   : > { %1680 = vrot.lane.b32.xlu1 %v2991_v53, %s2438_s21 }
 0x2c7   : > { %1682 = vrot.lane.b32.xlu0 %v3005_v36, %s2438_s21 }
 0x2c8   : > { %1684 = vrot.lane.b32.xlu1 %v3011_v50, %s2438_s21 }
 0x2cb   : > { %1740 = vrot.lane.b32.xlu0 %v2967_v44, %s2439_s22 }
 0x2cc   : > { %1742 = vrot.lane.b32.xlu1 %v2973_v52, %s2439_s22 }
 0x2cd   : > { %v3375_v49 = vpop.permute.xlu0 %1062 }
 0x2ce   : > { %v3377_v28 = vpop.permute.xlu1 %1064 }
 0x2cf   : > { %1744 = vrot.lane.b32.xlu0 %v2985_v18, %s2439_s22 }
 0x2d0   : > { %1746 = vrot.lane.b32.xlu1 %v2991_v53, %s2439_s22 }
 0x2d1   : > { %v1072_v4 = vpop.permute.xlu0 %1071 }
 0x2d2   : > { %v1074_v10 = vpop.permute.xlu1 %1073  ;;  %v1083_v44 = vsub.f32 %v1072_v4, %v3384_v31 }
 0x2d3   : > { %v3391_v52 = vsub.f32 %v1074_v10, %v3388_v6  ;;  %1748 = vrot.lane.b32.xlu0 %v3005_v36, %s2439_s22 }
 0x2d4   : > { %v1089_v27 = vmul.f32 %v1083_v44, %v1083_v44  ;;  %1750 = vrot.lane.b32.xlu1 %v3011_v50, %s2439_s22 }
 0x2d5   : > { %v1090_v21 = vmul.f32 %v3391_v52, %v3391_v52  ;;  %v1076_v13 = vpop.permute.xlu0 %1075 }
 0x2d6   : > { %v1078_v26 = vpop.permute.xlu1 %1077  ;;  %v3402_v51 = vsub.f32 %v1076_v13, %v2985_v18  ;;  %v1092_v7 = vadd.f32 0.81, %v1089_v27  ;;  %v3438_v13 = vld [vmem:[%s2490_s19 + $0x8] sm:$0xff] }
 0x2d7   : > { %v1086_v54 = vsub.f32 %v1078_v26, %v2991_v53  ;;  %1066 = vrot.lane.b32.xlu0 %v3399_v5, %s2438_s21  ;;  %v1093_v29 = vadd.f32 0.81, %v1090_v21 }
 0x2d8   : > { %v1091_v34 = vmul.f32 %v3402_v51, %v3402_v51  ;;  %2200 = vrsqrt.f32 %v1092_v7 }
 0x2d9   : > { %v1101_v38 = vmul.f32 %v1086_v54, %v1086_v54  ;;  %v1080_v42 = vpop.permute.xlu0 %1079  ;;  %2202 = vrsqrt.f32 %v1093_v29 }
 0x2da   : > { %v1094_v58 = vadd.f32 0.81, %v1091_v34  ;;  %v1082_v55 = vpop.permute.xlu1 %1081  ;;  %v1087_v37 = vsub.f32 %v1080_v42, %v3005_v36  ;;  %v3444_v34 = vld [vmem:[%s2490_s19 + $0x10] sm:$0xff] }
 0x2db   : > { %v1104_v32 = vadd.f32 0.81, %v1101_v38  ;;  %v1088_v18 = vsub.f32 %v1082_v55, %v3011_v50 }
 0x2dc   : > { %v1102_v59 = vmul.f32 %v1087_v37, %v1087_v37 }
 0x2dd   : > { %2204 = vrsqrt.f32 %v1104_v32  ;;  %v1103_v53 = vmul.f32 %v1088_v18, %v1088_v18  ;;  %v1161_v60 = vpop.permute.xlu0 %1160 }
 0x2de   : > { %2206 = vrsqrt.f32 %v1094_v58  ;;  %v1105_v61 = vadd.f32 0.81, %v1102_v59  ;;  %v1163_v0 = vpop.permute.xlu1 %1162  ;;  %v3412_v43 = vsub.f32 %v1161_v60, %v3384_v31 }
 0x2df   : > { %v1106_v47 = vadd.f32 0.81, %v1103_v53  ;;  %v3415_v36 = vsub.f32 %v1163_v0, %v3388_v6 }
 0x2e0   : > { %2208 = vrsqrt.f32 %v1105_v61  ;;  %v1178_v50 = vmul.f32 %v3412_v43, %v3412_v43 }
 0x2e1   : > { %2210 = vrsqrt.f32 %v1106_v47  ;;  %v1179_v11 = vmul.f32 %v3415_v36, %v3415_v36  ;;  %v1165_v20 = vpop.permute.xlu0 %1164 }
 0x2e2   : > { %v1167_v19 = vpop.permute.xlu1 %1166  ;;  %v3425_v46 = vsub.f32 %v1165_v20, %v3422_v22  ;;  %v1181_v41 = vadd.f32 0.81, %v1178_v50  ;;  %v2201_v35 = vpop.eup %2200 }
 0x2e3   : > { %v3431_v24 = vsub.f32 %v1167_v19, %v3428_v62  ;;  %v1182_v12 = vadd.f32 0.81, %v1179_v11  ;;  %v2203_v10 = vpop.eup %2202  ;;  %v1098_v58 = vmul.f32 %v2201_v35, %v1083_v44 }
 0x2e4   : > { %v1180_v2 = vmul.f32 %v3425_v46, %v3425_v46  ;;  %2212 = vrsqrt.f32 %v1181_v41  ;;  %v1099_v59 = vmul.f32 %v2203_v10, %v3391_v52 }
 0x2e5   : > { %v1190_v40 = vmul.f32 %v3431_v24, %v3431_v24  ;;  %v1169_v4 = vpop.permute.xlu0 %1168  ;;  %2214 = vrsqrt.f32 %v1182_v12 }
 0x2e6   : > { %v1183_v27 = vadd.f32 0.81, %v1180_v2  ;;  %v1171_v21 = vpop.permute.xlu1 %1170  ;;  %v3441_v26 = vsub.f32 %v1169_v4, %v3438_v13 }
 0x2e7   : > { %v2205_v7 = vpop.eup %2204  ;;  %v1193_v29 = vadd.f32 0.81, %v1190_v40  ;;  %v3447_v38 = vsub.f32 %v1171_v21, %v3444_v34 }
 0x2e8   : > { %v2207_v42 = vpop.eup %2206  ;;  %v1110_v55 = vmul.f32 %v2205_v7, %v1086_v54  ;;  %v1191_v32 = vmul.f32 %v3441_v26, %v3441_v26 }
 0x2e9   : > { %2216 = vrsqrt.f32 %v1193_v29  ;;  %v1192_v53 = vmul.f32 %v3447_v38, %v3447_v38  ;;  %v1224_v60 = vpop.permute.xlu0 %1223  ;;  %v1100_v54 = vmul.f32 %v2207_v42, %v3402_v51 }
 0x2ea   : > { %v2209_v61 = vpop.eup %2208  ;;  %v1113_v0 = vsub.f32 %v1098_v58, %v1110_v55  ;;  %2218 = vrsqrt.f32 %v1183_v27  ;;  %v1194_v47 = vadd.f32 0.81, %v1191_v32  ;;  %v1226_v50 = vpop.permute.xlu1 %1225  ;;  %v3455_v11 = vsub.f32 %v1224_v60, %v3384_v31 }
 0x2eb   : > { %v2211_v44 = vpop.eup %2210  ;;  %v1111_v20 = vmul.f32 %v2209_v61, %v1087_v37  ;;  %v1195_v19 = vadd.f32 0.81, %v1192_v53  ;;  %v3459_v52 = vsub.f32 %v1226_v50, %v3388_v6 }
 0x2ec   : > { %v1116_v41 = vmul.f32 %v1113_v0, %v1113_v0  ;;  %v1112_v12 = vmul.f32 %v2211_v44, %v1088_v18  ;;  %2220 = vrsqrt.f32 %v1194_v47  ;;  %v1241_v2 = vmul.f32 %v3455_v11, %v3455_v11 }
 0x2ed   : > { %v1114_v35 = vsub.f32 %v1099_v59, %v1111_v20  ;;  %2222 = vrsqrt.f32 %v1195_v19  ;;  %v1242_v40 = vmul.f32 %v3459_v52, %v3459_v52  ;;  %v1228_v4 = vpop.permute.xlu0 %1227 }
 0x2ee   : > { %v1119_v10 = vadd.f32 0.1, %v1116_v41  ;;  %v1115_v27 = vsub.f32 %v1100_v54, %v1112_v12  ;;  %v1244_v51 = vadd.f32 0.81, %v1241_v2  ;;  %v1230_v37 = vpop.permute.xlu1 %1229  ;;  %v3466_v21 = vsub.f32 %v1228_v4, %v3422_v22  ;;  %v2213_v55 = vpop.eup %2212 }
 0x2ef   : > { %v1117_v7 = vmul.f32 %v1114_v35, %v1114_v35  ;;  %v1245_v29 = vadd.f32 0.81, %v1242_v40  ;;  %v3469_v18 = vsub.f32 %v1230_v37, %v3428_v62  ;;  %v2215_v60 = vpop.eup %2214  ;;  %v1187_v41 = vmul.f32 %v2213_v55, %v3412_v43 }
 0x2f0   : > { %2224 = vrcp.f32 %v1119_v10  ;;  %v1118_v42 = vmul.f32 %v1115_v27, %v1115_v27  ;;  %v1243_v58 = vmul.f32 %v3466_v21, %v3466_v21  ;;  %v1188_v35 = vmul.f32 %v2215_v60, %v3415_v36 }
 0x2f1   : > { %v1120_v32 = vadd.f32 0.1, %v1117_v7  ;;  %2226 = vrsqrt.f32 %v1245_v29  ;;  %v1253_v59 = vmul.f32 %v3469_v18, %v3469_v18  ;;  %v1232_v53 = vpop.permute.xlu0 %1231 }
 0x2f2   : > { %v1121_v61 = vadd.f32 0.1, %v1118_v42  ;;  %2228 = vrsqrt.f32 %v1244_v51  ;;  %v1246_v0 = vadd.f32 0.81, %v1243_v58  ;;  %v1234_v47 = vpop.permute.xlu1 %1233  ;;  %v3476_v50 = vsub.f32 %v1232_v53, %v3438_v13 }
 0x2f3   : > { %v2217_v44 = vpop.eup %2216  ;;  %2230 = vrcp.f32 %v1120_v32  ;;  %v1256_v54 = vadd.f32 0.81, %v1253_v59  ;;  %v3479_v20 = vsub.f32 %v1234_v47, %v3444_v34 }
 0x2f4   : > { %v2219_v19 = vpop.eup %2218  ;;  %2232 = vrcp.f32 %v1121_v61  ;;  %v1199_v12 = vmul.f32 %v2217_v44, %v3431_v24  ;;  %v1254_v2 = vmul.f32 %v3476_v50, %v3476_v50 }
 0x2f5   : > { %2234 = vrsqrt.f32 %v1256_v54  ;;  %v1255_v40 = vmul.f32 %v3479_v20, %v3479_v20  ;;  %v1290_v4 = vpop.permute.xlu0 %1289  ;;  %v1189_v24 = vmul.f32 %v2219_v19, %v3425_v46 }
 0x2f6   : > { %v2221_v10 = vpop.eup %2220  ;;  %v1202_v27 = vsub.f32 %v1187_v41, %v1199_v12  ;;  %2236 = vrsqrt.f32 %v1246_v0  ;;  %v1257_v51 = vadd.f32 0.81, %v1254_v2  ;;  %v1292_v37 = vpop.permute.xlu1 %1291  ;;  %v3489_v7 = vsub.f32 %v1290_v4, %v3384_v31 }
 0x2f7   : > { %v2223_v43 = vpop.eup %2222  ;;  %v1200_v29 = vmul.f32 %v2221_v10, %v3441_v26  ;;  %v1258_v42 = vadd.f32 0.81, %v1255_v40  ;;  %v3494_v36 = vsub.f32 %v1292_v37, %v3388_v6  ;;  %v1061_v4 = vadd.f32 %v3399_v5, %v3197_v48 }
 0x2f8   : > { %v1205_v58 = vmul.f32 %v1202_v27, %v1202_v27  ;;  %v1201_v55 = vmul.f32 %v2223_v43, %v3447_v38  ;;  %2238 = vrsqrt.f32 %v1257_v51  ;;  %v1307_v32 = vmul.f32 %v3489_v7, %v3489_v7 }
 0x2f9   : > { %v1203_v59 = vsub.f32 %v1188_v35, %v1200_v29  ;;  %2240 = vrsqrt.f32 %v1258_v42  ;;  %v1308_v53 = vmul.f32 %v3494_v36, %v3494_v36  ;;  %v1294_v60 = vpop.permute.xlu0 %1293 }
 0x2fa   : > { %v2225_v46 = vpop.eup %2224  ;;  %v1208_v61 = vadd.f32 0.1, %v1205_v58  ;;  %v1204_v26 = vsub.f32 %v1189_v24, %v1201_v55  ;;  %v1310_v0 = vadd.f32 0.81, %v1307_v32  ;;  %v1296_v47 = vpop.permute.xlu1 %1295  ;;  %v3502_v44 = vsub.f32 %v1294_v60, %v3422_v22 }
 0x2fb   : > { %v2227_v54 = vpop.eup %2226  ;;  %v1206_v38 = vmul.f32 %v1203_v59, %v1203_v59  ;;  %v1311_v19 = vadd.f32 0.81, %v1308_v53  ;;  %v3505_v41 = vsub.f32 %v1296_v47, %v3428_v62  ;;  %1128 = vrot.lane.b32.xlu1 %v2225_v46, %s2437_s20  ;;  %v3509_v12 = vadd.f32 %v2225_v46, %v3224_v9 }
 0x2fc   : > { %v2229_v2 = vpop.eup %2228  ;;  %2242 = vrcp.f32 %v1208_v61  ;;  %v1207_v35 = vmul.f32 %v1204_v26, %v1204_v26  ;;  %v1309_v40 = vmul.f32 %v3502_v44, %v3502_v44  ;;  %v1251_v46 = vmul.f32 %v2227_v54, %v3459_v52 }
 0x2fd   : > { %v2231_v10 = vpop.eup %2230  ;;  %v1209_v27 = vadd.f32 0.1, %v1206_v38  ;;  %v1250_v51 = vmul.f32 %v2229_v2, %v3455_v11  ;;  %2244 = vrsqrt.f32 %v1311_v19  ;;  %v1319_v37 = vmul.f32 %v3505_v41, %v3505_v41  ;;  %v1298_v43 = vpop.permute.xlu0 %1297 }
 0x2fe   : > { %v2233_v9 = vpop.eup %2232  ;;  %v1210_v24 = vadd.f32 0.1, %v1207_v35  ;;  %2246 = vrsqrt.f32 %v1310_v0  ;;  %v1312_v29 = vadd.f32 0.81, %v1309_v40  ;;  %v1300_v42 = vpop.permute.xlu1 %1299  ;;  %v3519_v58 = vsub.f32 %v1298_v43, %v3438_v13  ;;  %1130 = vrot.lane.b32.xlu0 %v2231_v10, %s2437_s20 }
 0x2ff   : > { %v2235_v48 = vpop.eup %2234  ;;  %2248 = vrcp.f32 %v1209_v27  ;;  %v1322_v5 = vadd.f32 0.81, %v1319_v37  ;;  %v3523_v11 = vsub.f32 %v1300_v42, %v3444_v34  ;;  %1132 = vrot.lane.b32.xlu1 %v2233_v9, %s2437_s20  ;;  %v3526_v55 = vadd.f32 %v2233_v9, %v1061_v4 }
 0x300   : > { %v2237_v32 = vpop.eup %2236  ;;  %2250 = vrcp.f32 %v1210_v24  ;;  %v1262_v59 = vmul.f32 %v2235_v48, %v3469_v18  ;;  %v1320_v53 = vmul.f32 %v3519_v58, %v3519_v58  ;;  %v3532_v60 = vadd.f32 %v2231_v10, %v3227_v45 }
 0x301   : > { %2252 = vrsqrt.f32 %v1322_v5  ;;  %v1321_v61 = vmul.f32 %v3523_v11, %v3523_v11  ;;  %v1404_v26 = vpop.permute.xlu0 %1403  ;;  %v1252_v35 = vmul.f32 %v2237_v32, %v3466_v21 }
 0x302   : > { %v2239_v0 = vpop.eup %2238  ;;  %v1265_v47 = vsub.f32 %v1250_v51, %v1262_v59  ;;  %2254 = vrsqrt.f32 %v1312_v29  ;;  %v1323_v38 = vadd.f32 0.81, %v1320_v53  ;;  %v1406_v19 = vpop.permute.xlu1 %1405  ;;  %v3538_v18 = vsub.f32 %v1404_v26, %v3384_v31 }
 0x303   : > { %v2241_v2 = vpop.eup %2240  ;;  %v1263_v45 = vmul.f32 %v2239_v0, %v3476_v50  ;;  %v1324_v40 = vadd.f32 0.81, %v1321_v61  ;;  %v3543_v52 = vsub.f32 %v1406_v19, %v3388_v6 }
 0x304   : > { %v1268_v54 = vmul.f32 %v1265_v47, %v1265_v47  ;;  %v1264_v4 = vmul.f32 %v2241_v2, %v3479_v20  ;;  %2256 = vrsqrt.f32 %v1323_v38  ;;  %v1421_v10 = vmul.f32 %v3538_v18, %v3538_v18 }
 0x305   : > { %v1266_v27 = vsub.f32 %v1251_v46, %v1263_v45  ;;  %2258 = vrsqrt.f32 %v1324_v40  ;;  %v1422_v51 = vmul.f32 %v3543_v52, %v3543_v52  ;;  %v1408_v37 = vpop.permute.xlu0 %1407 }
 0x306   : > { %v3550_v21 = vpop.eup %2242  ;;  %v1271_v50 = vadd.f32 0.1, %v1268_v54  ;;  %v1267_v43 = vsub.f32 %v1252_v35, %v1264_v4  ;;  %v1424_v9 = vadd.f32 0.81, %v1421_v10  ;;  %v1410_v24 = vpop.permute.xlu1 %1409  ;;  %v3553_v29 = vsub.f32 %v1408_v37, %v3422_v22 }
 0x307   : > { %3987 = vst [vmem:[#allocation10_spill] sm:$0xff] %v3550_v21  ;;  %v2245_v20 = vpop.eup %2244  ;;  %v1269_v42 = vmul.f32 %v1266_v27, %v1266_v27  ;;  %v1425_v48 = vadd.f32 0.81, %v1422_v51  ;;  %v3556_v5 = vsub.f32 %v1410_v24, %v3428_v62  ;;  %1217 = vrot.lane.b32.xlu0 %v3550_v21, %s2442_s25 }
 0x308   : > { %v2247_v32 = vpop.eup %2246  ;;  %2260 = vrcp.f32 %v1271_v50  ;;  %v1270_v59 = vmul.f32 %v1267_v43, %v1267_v43  ;;  %v1423_v53 = vmul.f32 %v3553_v29, %v3553_v29  ;;  %v1317_v37 = vmul.f32 %v2245_v20, %v3494_v36 }
 0x309   : > { %v3562_v46 = vpop.eup %2248  ;;  %v1272_v61 = vadd.f32 0.1, %v1269_v42  ;;  %2262 = vrsqrt.f32 %v1425_v48  ;;  %v1433_v26 = vmul.f32 %v3556_v5, %v3556_v5  ;;  %v1412_v0 = vpop.permute.xlu0 %1411  ;;  %v1316_v10 = vmul.f32 %v2247_v32, %v3489_v7 }
 0x30a   : > { %v3566_v47 = vpop.eup %2250  ;;  %v1273_v38 = vadd.f32 0.1, %v1270_v59  ;;  %2264 = vrsqrt.f32 %v1424_v9  ;;  %v1426_v19 = vadd.f32 0.81, %v1423_v53  ;;  %v1414_v2 = vpop.permute.xlu1 %1413  ;;  %v3569_v35 = vsub.f32 %v1412_v0, %v3438_v13  ;;  %1219 = vrot.lane.b32.xlu1 %v3562_v46, %s2442_s25 }
 0x30b   : > { %v2253_v45 = vpop.eup %2252  ;;  %2266 = vrcp.f32 %v1272_v61  ;;  %v1436_v40 = vadd.f32 0.81, %v1433_v26  ;;  %v3574_v54 = vsub.f32 %v1414_v2, %v3444_v34  ;;  %1221 = vrot.lane.b32.xlu0 %v3566_v47, %s2442_s25 }
 0x30c   : > { %v2255_v4 = vpop.eup %2254  ;;  %2268 = vrcp.f32 %v1273_v38  ;;  %v1328_v27 = vmul.f32 %v2253_v45, %v3505_v41  ;;  %v1434_v51 = vmul.f32 %v3569_v35, %v3569_v35 }
 0x30d   : > { %2270 = vrsqrt.f32 %v1436_v40  ;;  %v1435_v50 = vmul.f32 %v3574_v54, %v3574_v54  ;;  %v1470_v43 = vpop.permute.xlu0 %1469  ;;  %v1318_v41 = vmul.f32 %v2255_v4, %v3502_v44 }
 0x30e   : > { %v2257_v9 = vpop.eup %2256  ;;  %v1331_v24 = vsub.f32 %v1316_v10, %v1328_v27  ;;  %2272 = vrsqrt.f32 %v1426_v19  ;;  %v1437_v42 = vadd.f32 0.81, %v1434_v51  ;;  %v1472_v48 = vpop.permute.xlu1 %1471  ;;  %v3586_v59 = vsub.f32 %v1470_v43, %v3384_v31 }
 0x30f   : > { %v2259_v7 = vpop.eup %2258  ;;  %v1329_v32 = vmul.f32 %v2257_v9, %v3519_v58  ;;  %v1438_v53 = vadd.f32 0.81, %v1435_v50  ;;  %v3591_v36 = vsub.f32 %v1472_v48, %v3388_v6 }
 0x310   : > { %v1334_v20 = vmul.f32 %v1331_v24, %v1331_v24  ;;  %v1330_v61 = vmul.f32 %v2259_v7, %v3523_v11  ;;  %2274 = vrsqrt.f32 %v1437_v42  ;;  %v1487_v26 = vmul.f32 %v3586_v59, %v3586_v59 }
 0x311   : > { %v1332_v0 = vsub.f32 %v1317_v37, %v1329_v32  ;;  %2276 = vrsqrt.f32 %v1438_v53  ;;  %v1488_v38 = vmul.f32 %v3591_v36, %v3591_v36  ;;  %v1474_v19 = vpop.permute.xlu0 %1473 }
 0x312   : > { %v3598_v44 = vpop.eup %2260  ;;  %v1337_v58 = vadd.f32 0.1, %v1334_v20  ;;  %v1333_v2 = vsub.f32 %v1318_v41, %v1330_v61  ;;  %v1490_v45 = vadd.f32 0.81, %v1487_v26  ;;  %v1476_v40 = vpop.permute.xlu1 %1475  ;;  %v3601_v4 = vsub.f32 %v1474_v19, %v3422_v22 }
 0x313   : > { %3988 = vst [vmem:[#allocation11_spill] sm:$0xff] %v3598_v44  ;;  %v2263_v11 = vpop.eup %2262  ;;  %v1335_v10 = vmul.f32 %v1332_v0, %v1332_v0  ;;  %v1491_v27 = vadd.f32 0.81, %v1488_v38  ;;  %v3604_v51 = vsub.f32 %v1476_v40, %v3428_v62  ;;  %1280 = vrot.lane.b32.xlu1 %v3598_v44, %s2441_s24 }
 0x314   : > { %v2265_v37 = vpop.eup %2264  ;;  %2278 = vrcp.f32 %v1337_v58  ;;  %v1336_v50 = vmul.f32 %v1333_v2, %v1333_v2  ;;  %v1489_v43 = vmul.f32 %v3601_v4, %v3601_v4 }
 0x315   : > { %v3610_v9 = vpop.eup %2266  ;;  %v1338_v24 = vadd.f32 0.1, %v1335_v10  ;;  %2280 = vrsqrt.f32 %v1491_v27  ;;  %v1499_v42 = vmul.f32 %v3604_v51, %v3604_v51  ;;  %v1478_v48 = vpop.permute.xlu0 %1477  ;;  %v1430_v19 = vmul.f32 %v2265_v37, %v3538_v18 }
 0x316   : > { %v3614_v7 = vpop.eup %2268  ;;  %v1339_v41 = vadd.f32 0.1, %v1336_v50  ;;  %2282 = vrsqrt.f32 %v1490_v45  ;;  %v1492_v32 = vadd.f32 0.81, %v1489_v43  ;;  %v1480_v53 = vpop.permute.xlu1 %1479  ;;  %v3617_v20 = vsub.f32 %v1478_v48, %v3438_v13  ;;  %1282 = vrot.lane.b32.xlu0 %v3610_v9, %s2441_s24 }
 0x317   : > { %v2271_v61 = vpop.eup %2270  ;;  %2284 = vrcp.f32 %v1338_v24  ;;  %v1502_v26 = vadd.f32 0.81, %v1499_v42  ;;  %v3622_v0 = vsub.f32 %v1480_v53, %v3444_v34  ;;  %1284 = vrot.lane.b32.xlu1 %v3614_v7, %s2441_s24  ;;  %v1431_v45 = vmul.f32 %v2263_v11, %v3543_v52 }
 0x318   : > { %v2273_v38 = vpop.eup %2272  ;;  %2286 = vrcp.f32 %v1339_v41  ;;  %v1442_v58 = vmul.f32 %v2271_v61, %v3556_v5  ;;  %v1500_v2 = vmul.f32 %v3617_v20, %v3617_v20 }
 0x319   : > { %2288 = vrsqrt.f32 %v1502_v26  ;;  %v1501_v40 = vmul.f32 %v3622_v0, %v3622_v0  ;;  %v1536_v10 = vpop.permute.xlu0 %1535  ;;  %v1432_v5 = vmul.f32 %v2273_v38, %v3553_v29 }
 0x31a   : > { %v2275_v27 = vpop.eup %2274  ;;  %v1445_v50 = vsub.f32 %v1430_v19, %v1442_v58  ;;  %2290 = vrsqrt.f32 %v1492_v32  ;;  %v1503_v43 = vadd.f32 0.81, %v1500_v2  ;;  %v1538_v24 = vpop.permute.xlu1 %1537  ;;  %v3634_v42 = vsub.f32 %v1536_v10, %v3384_v31 }
 0x31b   : > { %v2277_v18 = vpop.eup %2276  ;;  %v1443_v37 = vmul.f32 %v2275_v27, %v3569_v35  ;;  %v1504_v48 = vadd.f32 0.81, %v1501_v40  ;;  %v3639_v52 = vsub.f32 %v1538_v24, %v3388_v6 }
 0x31c   : > { %v1448_v11 = vmul.f32 %v1445_v50, %v1445_v50  ;;  %v1444_v41 = vmul.f32 %v2277_v18, %v3574_v54  ;;  %2292 = vrsqrt.f32 %v1503_v43  ;;  %v1553_v32 = vmul.f32 %v3634_v42, %v3634_v42 }
 0x31d   : > { %v1446_v53 = vsub.f32 %v1431_v45, %v1443_v37  ;;  %2294 = vrsqrt.f32 %v1504_v48  ;;  %v1554_v61 = vmul.f32 %v3639_v52, %v3639_v52  ;;  %v1540_v26 = vpop.permute.xlu0 %1539 }
 0x31e   : > { %v3646_v29 = vpop.eup %2278  ;;  %v1451_v35 = vadd.f32 0.1, %v1448_v11  ;;  %v1447_v38 = vsub.f32 %v1432_v5, %v1444_v41  ;;  %v1556_v19 = vadd.f32 0.81, %v1553_v32  ;;  %v1542_v58 = vpop.permute.xlu1 %1541  ;;  %v3649_v2 = vsub.f32 %v1540_v26, %v3422_v22 }
 0x31f   : > { %3989 = vst [vmem:[#allocation12_spill] sm:$0xff] %v3646_v29  ;;  %v2281_v54 = vpop.eup %2280  ;;  %v1449_v40 = vmul.f32 %v1446_v53, %v1446_v53  ;;  %v1557_v10 = vadd.f32 0.81, %v1554_v61  ;;  %v3652_v27 = vsub.f32 %v1542_v58, %v3428_v62  ;;  %1346 = vrot.lane.b32.xlu0 %v3646_v29, %s2440_s23 }
 0x320   : > { %v2283_v45 = vpop.eup %2282  ;;  %2296 = vrcp.f32 %v1451_v35  ;;  %v1450_v50 = vmul.f32 %v1447_v38, %v1447_v38  ;;  %v1555_v43 = vmul.f32 %v3649_v2, %v3649_v2 }
 0x321   : > { %v3658_v24 = vpop.eup %2284  ;;  %v1452_v18 = vadd.f32 0.1, %v1449_v40  ;;  %2298 = vrsqrt.f32 %v1557_v10  ;;  %v1565_v5 = vmul.f32 %v3652_v27, %v3652_v27  ;;  %v1544_v37 = vpop.permute.xlu0 %1543  ;;  %v1497_v10 = vmul.f32 %v2281_v54, %v3591_v36 }
 0x322   : > { %v3662_v48 = vpop.eup %2286  ;;  %v1453_v11 = vadd.f32 0.1, %v1450_v50  ;;  %2300 = vrsqrt.f32 %v1556_v19  ;;  %v1558_v41 = vadd.f32 0.81, %v1555_v43  ;;  %v1546_v32 = vpop.permute.xlu1 %1545  ;;  %v3665_v53 = vsub.f32 %v1544_v37, %v3438_v13  ;;  %1348 = vrot.lane.b32.xlu1 %v3658_v24, %s2440_s23 }
 0x323   : > { %v2289_v61 = vpop.eup %2288  ;;  %2302 = vrcp.f32 %v1452_v18  ;;  %v1568_v26 = vadd.f32 0.81, %v1565_v5  ;;  %v3670_v35 = vsub.f32 %v1546_v32, %v3444_v34  ;;  %1350 = vrot.lane.b32.xlu0 %v3662_v48, %s2440_s23  ;;  %v1496_v19 = vmul.f32 %v2283_v45, %v3586_v59 }
 0x324   : > { %v2291_v38 = vpop.eup %2290  ;;  %2304 = vrcp.f32 %v1453_v11  ;;  %v1508_v58 = vmul.f32 %v2289_v61, %v3604_v51  ;;  %v1566_v40 = vmul.f32 %v3665_v53, %v3665_v53 }
 0x325   : > { %2306 = vrsqrt.f32 %v1568_v26  ;;  %v1567_v50 = vmul.f32 %v3670_v35, %v3670_v35  ;;  %v1612_v43 = vpop.permute.xlu0 %1611  ;;  %v1498_v51 = vmul.f32 %v2291_v38, %v3601_v4 }
 0x326   : > { %v2293_v18 = vpop.eup %2292  ;;  %v1511_v5 = vsub.f32 %v1496_v19, %v1508_v58  ;;  %2308 = vrsqrt.f32 %v1558_v41  ;;  %v1569_v37 = vadd.f32 0.81, %v1566_v40  ;;  %v1614_v32 = vpop.permute.xlu1 %1613  ;;  %v3682_v11 = vsub.f32 %v1612_v43, %v3384_v31 }
 0x327   : > { %v2295_v59 = vpop.eup %2294  ;;  %v1509_v45 = vmul.f32 %v2293_v18, %v3617_v20  ;;  %v1570_v61 = vadd.f32 0.81, %v1567_v50  ;;  %v3687_v36 = vsub.f32 %v1614_v32, %v3388_v6 }
 0x328   : > { %v1514_v54 = vmul.f32 %v1511_v5, %v1511_v5  ;;  %v1510_v26 = vmul.f32 %v2295_v59, %v3622_v0  ;;  %2310 = vrsqrt.f32 %v1569_v37  ;;  %v1629_v41 = vmul.f32 %v3682_v11, %v3682_v11 }
 0x329   : > { %v1512_v19 = vsub.f32 %v1497_v10, %v1509_v45  ;;  %2312 = vrsqrt.f32 %v1570_v61  ;;  %v1630_v58 = vmul.f32 %v3687_v36, %v3687_v36  ;;  %v1616_v40 = vpop.permute.xlu0 %1615 }
 0x32a   : > { %v3694_v4 = vpop.eup %2296  ;;  %v1517_v20 = vadd.f32 0.1, %v1514_v54  ;;  %v1513_v38 = vsub.f32 %v1498_v51, %v1510_v26  ;;  %v1632_v50 = vadd.f32 0.81, %v1629_v41  ;;  %v1618_v43 = vpop.permute.xlu1 %1617  ;;  %v3697_v18 = vsub.f32 %v1616_v40, %v3422_v22 }
 0x32b   : > { %3990 = vst [vmem:[#allocation13_spill] sm:$0xff] %v3694_v4  ;;  %v2299_v0 = vpop.eup %2298  ;;  %v1515_v5 = vmul.f32 %v1512_v19, %v1512_v19  ;;  %v1633_v37 = vadd.f32 0.81, %v1630_v58  ;;  %v3700_v32 = vsub.f32 %v1618_v43, %v3428_v62  ;;  %1460 = vrot.lane.b32.xlu1 %v3694_v4, %s2439_s22 }
 0x32c   : > { %v2301_v10 = vpop.eup %2300  ;;  %2314 = vrcp.f32 %v1517_v20  ;;  %v1516_v59 = vmul.f32 %v1513_v38, %v1513_v38  ;;  %v1631_v51 = vmul.f32 %v3697_v18, %v3697_v18 }
 0x32d   : > { %v3706_v45 = vpop.eup %2302  ;;  %v1518_v61 = vadd.f32 0.1, %v1515_v5  ;;  %2316 = vrsqrt.f32 %v1633_v37  ;;  %v1641_v54 = vmul.f32 %v3700_v32, %v3700_v32  ;;  %v1620_v26 = vpop.permute.xlu0 %1619 }
 0x32e   : > { %v3710_v41 = vpop.eup %2304  ;;  %v1519_v19 = vadd.f32 0.1, %v1516_v59  ;;  %2318 = vrsqrt.f32 %v1632_v50  ;;  %v1634_v58 = vadd.f32 0.81, %v1631_v51  ;;  %v1622_v40 = vpop.permute.xlu1 %1621  ;;  %v3713_v20 = vsub.f32 %v1620_v26, %v3438_v13  ;;  %1462 = vrot.lane.b32.xlu0 %v3706_v45, %s2439_s22 }
 0x32f   : > { %v2307_v38 = vpop.eup %2306  ;;  %2320 = vrcp.f32 %v1518_v61  ;;  %v1644_v43 = vadd.f32 0.81, %v1641_v54  ;;  %v3718_v5 = vsub.f32 %v1622_v40, %v3444_v34  ;;  %1464 = vrot.lane.b32.xlu1 %v3710_v41, %s2439_s22  ;;  %v1562_v50 = vmul.f32 %v2301_v10, %v3634_v42 }
 0x330   : > { %v2309_v37 = vpop.eup %2308  ;;  %2322 = vrcp.f32 %v1519_v19  ;;  %v1574_v59 = vmul.f32 %v2307_v38, %v3652_v27  ;;  %v1642_v51 = vmul.f32 %v3713_v20, %v3713_v20  ;;  %v1563_v26 = vmul.f32 %v2299_v0, %v3639_v52 }
 0x331   : > { %2324 = vrsqrt.f32 %v1644_v43  ;;  %v1643_v61 = vmul.f32 %v3718_v5, %v3718_v5  ;;  %v1675_v54 = vpop.permute.xlu0 %1674  ;;  %v1564_v27 = vmul.f32 %v2309_v37, %v3649_v2 }
 0x332   : > { %v2311_v40 = vpop.eup %2310  ;;  %v1577_v4 = vsub.f32 %v1562_v50, %v1574_v59  ;;  %2326 = vrsqrt.f32 %v1634_v58  ;;  %v1645_v29 = vadd.f32 0.81, %v1642_v51  ;;  %v1677_v44 = vpop.permute.xlu1 %1676  ;;  %v3730_v19 = vsub.f32 %v1675_v54, %v3384_v31 }
 0x333   : > { %v2313_v42 = vpop.eup %2312  ;;  %v1575_v10 = vmul.f32 %v2311_v40, %v3665_v53  ;;  %v1646_v38 = vadd.f32 0.81, %v1643_v61  ;;  %v3735_v52 = vsub.f32 %v1677_v44, %v3388_v6 }
 0x334   : > { %v1580_v0 = vmul.f32 %v1577_v4, %v1577_v4  ;;  %v1576_v43 = vmul.f32 %v2313_v42, %v3670_v35  ;;  %2328 = vrsqrt.f32 %v1645_v29  ;;  %v1692_v58 = vmul.f32 %v3730_v19, %v3730_v19 }
 0x335   : > { %v1578_v50 = vsub.f32 %v1563_v26, %v1575_v10  ;;  %2330 = vrsqrt.f32 %v1646_v38  ;;  %v1693_v59 = vmul.f32 %v3735_v52, %v3735_v52  ;;  %v1679_v51 = vpop.permute.xlu0 %1678 }
 0x336   : > { %v3742_v2 = vpop.eup %2314  ;;  %v1583_v53 = vadd.f32 0.1, %v1580_v0  ;;  %v1579_v37 = vsub.f32 %v1564_v27, %v1576_v43  ;;  %v1695_v61 = vadd.f32 0.81, %v1692_v58  ;;  %v1681_v44 = vpop.permute.xlu1 %1680  ;;  %v3745_v4 = vsub.f32 %v1679_v51, %v3422_v22 }
 0x337   : > { %3991 = vst [vmem:[#allocation14_spill] sm:$0xff] %v3742_v2  ;;  %v2317_v35 = vpop.eup %2316  ;;  %v1581_v29 = vmul.f32 %v1578_v50, %v1578_v50  ;;  %v1696_v54 = vadd.f32 0.81, %v1693_v59  ;;  %v3748_v40 = vsub.f32 %v1681_v44, %v3428_v62  ;;  %1526 = vrot.lane.b32.xlu0 %v3742_v2, %s2438_s21 }
 0x338   : > { %v2319_v26 = vpop.eup %2318  ;;  %2332 = vrcp.f32 %v1583_v53  ;;  %v1582_v42 = vmul.f32 %v1579_v37, %v1579_v37  ;;  %v1694_v27 = vmul.f32 %v3745_v4, %v3745_v4  ;;  %v1639_v2 = vmul.f32 %v2317_v35, %v3687_v36 }
 0x339   : > { %v3754_v10 = vpop.eup %2320  ;;  %v1584_v38 = vadd.f32 0.1, %v1581_v29  ;;  %2334 = vrsqrt.f32 %v1696_v54  ;;  %v1704_v0 = vmul.f32 %v3748_v40, %v3748_v40  ;;  %v1683_v43 = vpop.permute.xlu0 %1682 }
 0x33a   : > { %v3758_v58 = vpop.eup %2322  ;;  %v1585_v50 = vadd.f32 0.1, %v1582_v42  ;;  %2336 = vrsqrt.f32 %v1695_v61  ;;  %v1685_v59 = vpop.permute.xlu1 %1684  ;;  %v3761_v51 = vsub.f32 %v1683_v43, %v3438_v13  ;;  %1528 = vrot.lane.b32.xlu1 %v3754_v10, %s2438_s21  ;;  %v1697_v44 = vadd.f32 0.81, %v1694_v27 }
 0x33b   : > { %v2325_v53 = vpop.eup %2324  ;;  %2338 = vrcp.f32 %v1584_v38  ;;  %v1707_v37 = vadd.f32 0.81, %v1704_v0  ;;  %v3766_v29 = vsub.f32 %v1685_v59, %v3444_v34  ;;  %1530 = vrot.lane.b32.xlu0 %v3758_v58, %s2438_s21  ;;  %v1638_v61 = vmul.f32 %v2319_v26, %v3682_v11 }
 0x33c   : > { %v2327_v54 = vpop.eup %2326  ;;  %2340 = vrcp.f32 %v1585_v50  ;;  %v1650_v42 = vmul.f32 %v2325_v53, %v3700_v32  ;;  %v1705_v43 = vmul.f32 %v3761_v51, %v3761_v51  ;;  %v3779_v0 = vsub.f32 %v3261_v63, %v3422_v22 }
 0x33d   : > { %2342 = vrsqrt.f32 %v1707_v37  ;;  %v1706_v27 = vmul.f32 %v3766_v29, %v3766_v29  ;;  %v1741_v38 = vpop.permute.xlu0 %1740  ;;  %v1640_v11 = vmul.f32 %v2327_v54, %v3697_v18 }
 0x33e   : > { %v2329_v59 = vpop.eup %2328  ;;  %v1653_v50 = vsub.f32 %v1638_v61, %v1650_v42  ;;  %v1708_v26 = vadd.f32 0.81, %v1705_v43  ;;  %v1743_v32 = vpop.permute.xlu1 %1742  ;;  %v3783_v53 = vsub.f32 %v1741_v38, %v3384_v31  ;;  %2344 = vrsqrt.f32 %v1697_v44 }
 0x33f   : > { %v2331_v21 = vpop.eup %2330  ;;  %v1651_v36 = vmul.f32 %v2329_v59, %v3713_v20  ;;  %v1709_v35 = vadd.f32 0.81, %v1706_v27  ;;  %v3787_v37 = vsub.f32 %v1743_v32, %v3388_v6  ;;  %v1363_v20 = vmul.f32 %v3779_v0, %v3779_v0 }
 0x340   : > { %v1656_v14 = vmul.f32 %v1653_v50, %v1653_v50  ;;  %v1652_v63 = vmul.f32 %v2331_v21, %v3718_v5  ;;  %2346 = vrsqrt.f32 %v1708_v26  ;;  %v1758_v18 = vmul.f32 %v3783_v53, %v3783_v53 }
 0x341   : > { %v1654_v54 = vsub.f32 %v1639_v2, %v1651_v36  ;;  %2348 = vrsqrt.f32 %v1709_v35  ;;  %v1759_v31 = vmul.f32 %v3787_v37, %v3787_v37  ;;  %v1745_v61 = vpop.permute.xlu0 %1744  ;;  %v1366_v36 = vadd.f32 0.81, %v1363_v20  ;;  %v2410_v35 = vld [vmem:[%s2484_s16 + $0x8] sm:$0xff] }
 0x342   : > { %v3796_v44 = vpop.eup %2332  ;;  %v1659_v6 = vadd.f32 0.1, %v1656_v14  ;;  %v1655_v42 = vsub.f32 %v1640_v11, %v1652_v63  ;;  %v1761_v43 = vadd.f32 0.81, %v1758_v18  ;;  %v1747_v27 = vpop.permute.xlu1 %1746  ;;  %v3799_v21 = vsub.f32 %v1745_v61, %v3422_v22 }
 0x343   : > { %v2335_v5 = vpop.eup %2334  ;;  %v1657_v2 = vmul.f32 %v1654_v54, %v1654_v54  ;;  %v3802_v38 = vsub.f32 %v1747_v27, %v3428_v62  ;;  %1592 = vrot.lane.b32.xlu1 %v3796_v44, %s2437_s20  ;;  %v3810_v11 = vsub.f32 %v3278_v17, %v3444_v34  ;;  %v3818_v63 = vsub.f32 %v3251_v57, %v2410_v35 }
 0x344   : > { %v2337_v59 = vpop.eup %2336  ;;  %2350 = vrcp.f32 %v1659_v6  ;;  %v1658_v50 = vmul.f32 %v1655_v42, %v1655_v42  ;;  %v1760_v14 = vmul.f32 %v3799_v21, %v3799_v21  ;;  %v1762_v61 = vadd.f32 0.81, %v1759_v31 }
 0x345   : > { %v3812_v22 = vpop.eup %2338  ;;  %v1660_v26 = vadd.f32 0.1, %v1657_v2  ;;  %v1770_v62 = vmul.f32 %v3802_v38, %v3802_v38  ;;  %v1749_v32 = vpop.permute.xlu0 %1748  ;;  %2352 = vrsqrt.f32 %v1761_v43  ;;  %v1701_v57 = vmul.f32 %v2337_v59, %v3730_v19 }
 0x346   : > { %v3820_v18 = vpop.eup %2340  ;;  %v1661_v54 = vadd.f32 0.1, %v1658_v50  ;;  %v1751_v6 = vpop.permute.xlu1 %1750  ;;  %v3823_v17 = vsub.f32 %v1749_v32, %v3438_v13  ;;  %1594 = vrot.lane.b32.xlu0 %v3812_v22, %s2437_s20  ;;  %v1763_v20 = vadd.f32 0.81, %v1760_v14  ;;  %v3842_v14 = vsub.f32 %v3274_v25, %v3438_v13 }
 0x347   : > { %v2343_v42 = vpop.eup %2342  ;;  %2354 = vrcp.f32 %v1660_v26  ;;  %v1773_v27 = vadd.f32 0.81, %v1770_v62  ;;  %v3828_v2 = vsub.f32 %v1751_v6, %v3444_v34  ;;  %1596 = vrot.lane.b32.xlu1 %v3820_v18, %s2437_s20  ;;  %v1375_v34 = vmul.f32 %v3810_v11, %v3810_v11 }
 0x348   : > { %2356 = vrcp.f32 %v1661_v54  ;;  %v1713_v31 = vmul.f32 %v2343_v42, %v3748_v40  ;;  %v1771_v43 = vmul.f32 %v3823_v17, %v3823_v17  ;;  %v2345_v50 = vpop.eup %2344  ;;  %v1362_v40 = vmul.f32 %v3818_v63, %v3818_v63 }
 0x349   : > { %2358 = vrsqrt.f32 %v1773_v27  ;;  %v1772_v26 = vmul.f32 %v3828_v2, %v3828_v2  ;;  %v1702_v35 = vmul.f32 %v2335_v5, %v3735_v52  ;;  %v1703_v27 = vmul.f32 %v2345_v50, %v3745_v4 }
 0x34a   : > { %v2347_v62 = vpop.eup %2346  ;;  %v1716_v32 = vsub.f32 %v1701_v57, %v1713_v31  ;;  %2360 = vrsqrt.f32 %v1762_v61  ;;  %v1774_v19 = vadd.f32 0.81, %v1771_v43  ;;  %v1378_v61 = vadd.f32 0.81, %v1375_v34 }
 0x34b   : > { %v2349_v59 = vpop.eup %2348  ;;  %v1714_v54 = vmul.f32 %v2347_v62, %v3761_v51  ;;  %2362 = vrsqrt.f32 %v1763_v20  ;;  %v1775_v6 = vadd.f32 0.81, %v1772_v26  ;;  %v1374_v57 = vmul.f32 %v3842_v14, %v3842_v14 }
 0x34c   : > { %v1719_v42 = vmul.f32 %v1716_v32, %v1716_v32  ;;  %v1715_v25 = vmul.f32 %v2349_v59, %v3766_v29  ;;  %2364 = vrsqrt.f32 %v1774_v19  ;;  %v1365_v5 = vadd.f32 0.81, %v1362_v40 }
 0x34d   : > { %v1717_v13 = vsub.f32 %v1702_v35, %v1714_v54  ;;  %2366 = vrsqrt.f32 %v1775_v6  ;;  %v1377_v26 = vadd.f32 0.81, %v1374_v57 }
 0x34e   : > { %v3852_v31 = vpop.eup %2350  ;;  %v1722_v43 = vadd.f32 0.1, %v1719_v42  ;;  %v1718_v52 = vsub.f32 %v1703_v27, %v1715_v25  ;;  %2368 = vrsqrt.f32 %v1366_v36 }
 0x34f   : > { %v1720_v51 = vmul.f32 %v1717_v13, %v1717_v13  ;;  %1668 = vrot.lane.b32.xlu0 %v3852_v31, %s2442_s25  ;;  %v2353_v4 = vpop.eup %2352 }
 0x350   : > { %2370 = vrcp.f32 %v1722_v43  ;;  %v1721_v29 = vmul.f32 %v1718_v52, %v1718_v52  ;;  %v1767_v19 = vmul.f32 %v2353_v4, %v3783_v53 }
 0x351   : > { %v3856_v20 = vpop.eup %2354  ;;  %v1723_v50 = vadd.f32 0.1, %v1720_v51  ;;  %2372 = vrsqrt.f32 %v1378_v61 }
 0x352   : > { %v3858_v34 = vpop.eup %2356  ;;  %v1724_v62 = vadd.f32 0.1, %v1721_v29  ;;  %1670 = vrot.lane.b32.xlu1 %v3856_v20, %s2442_s25  ;;  %2374 = vrsqrt.f32 %v1365_v5 }
 0x353   : > { %v2359_v32 = vpop.eup %2358  ;;  %2376 = vrcp.f32 %v1723_v50  ;;  %1672 = vrot.lane.b32.xlu0 %v3858_v34, %s2442_s25 }
 0x354   : > { %v2361_v36 = vpop.eup %2360  ;;  %2378 = vrcp.f32 %v1724_v62  ;;  %v1779_v40 = vmul.f32 %v2359_v32, %v3802_v38 }
 0x355   : > { %v2363_v59 = vpop.eup %2362  ;;  %2380 = vrsqrt.f32 %v1377_v26  ;;  %v1768_v42 = vmul.f32 %v2361_v36, %v3787_v37 }
 0x356   : > { %v2365_v35 = vpop.eup %2364  ;;  %v1782_v54 = vsub.f32 %v1767_v19, %v1779_v40  ;;  %v1769_v13 = vmul.f32 %v2363_v59, %v3799_v21  ;;  %v822_v19 = vadd.f32 %v3150_v30, %v3136_v8  ;;  %v3992_v40 = vld [vmem:[#allocation2_spill] sm:$0xff]  ;;  %v3993_v59 = vld [vmem:[#allocation4_spill] sm:$0xff] }
 0x357   : > { %v2367_v6 = vpop.eup %2366  ;;  %v1780_v27 = vmul.f32 %v2365_v35, %v3823_v17  ;;  %v823_v35 = vadd.f32 %v3993_v59, %v3992_v40 }
 0x358   : > { %v1785_v25 = vmul.f32 %v1782_v54, %v1782_v54  ;;  %v1781_v61 = vmul.f32 %v2367_v6, %v3828_v2  ;;  %v2369_v57 = vpop.eup %2368  ;;  %v3994_v54 = vld [vmem:[#allocation5_spill] sm:$0xff] }
 0x359   : > { %v1783_v43 = vsub.f32 %v1768_v42, %v1780_v27  ;;  %v1372_v26 = vmul.f32 %v2369_v57, %v3779_v0  ;;  %v888_v6 = vadd.f32 %v3994_v54, %v822_v19 }
 0x35a   : > { %v3870_v52 = vpop.eup %2370  ;;  %v1788_v53 = vadd.f32 0.1, %v1785_v25  ;;  %v1784_v38 = vsub.f32 %v1769_v13, %v1781_v61  ;;  %v3995_v25 = vld [vmem:[#allocation3_spill] sm:$0xff]  ;;  %v3996_v13 = vld [vmem:[#allocation6_spill] sm:$0xff] }
 0x35b   : > { %v2373_v5 = vpop.eup %2372  ;;  %v1786_v51 = vmul.f32 %v1783_v43, %v1783_v43  ;;  %1731 = vrot.lane.b32.xlu1 %v3870_v52, %s2441_s24  ;;  %v824_v0 = vadd.f32 %v3996_v13, %v3995_v25  ;;  %v936_v30 = vadd.f32 %v3183_v39, %v888_v6 }
 0x35c   : > { %v2375_v4 = vpop.eup %2374  ;;  %2382 = vrcp.f32 %v1788_v53  ;;  %v1787_v37 = vmul.f32 %v1784_v38, %v1784_v38  ;;  %v1384_v62 = vmul.f32 %v2373_v5, %v3810_v11  ;;  %v3997_v11 = vld [vmem:[#allocation8_spill] sm:$0xff] }
 0x35d   : > { %v3874_v17 = vpop.eup %2376  ;;  %v1789_v29 = vadd.f32 0.1, %v1786_v51  ;;  %v1371_v32 = vmul.f32 %v2375_v4, %v3818_v63  ;;  %v889_v57 = vadd.f32 %v3997_v11, %v823_v35  ;;  %v3998_v63 = vld [vmem:[#allocation7_spill] sm:$0xff]  ;;  %v1002_v5 = vadd.f32 %v3211_v23, %v936_v30 }
 0x35e   : > { %v3876_v21 = vpop.eup %2378  ;;  %v1790_v2 = vadd.f32 0.1, %v1787_v37  ;;  %1733 = vrot.lane.b32.xlu0 %v3874_v17, %s2441_s24  ;;  %v1387_v42 = vsub.f32 %v1372_v26, %v1384_v62  ;;  %v1067_v37 = vpop.permute.xlu0 %1066 }
 0x35f   : > { %v2381_v50 = vpop.eup %2380  ;;  %2384 = vrcp.f32 %v1789_v29  ;;  %1735 = vrot.lane.b32.xlu1 %v3876_v21, %s2441_s24  ;;  %v937_v51 = vadd.f32 %v3186_v33, %v889_v57  ;;  %v1068_v39 = vadd.f32 %v3375_v49, %v1002_v5 }
 0x360   : > { %2386 = vrcp.f32 %v1790_v2  ;;  %v1383_v36 = vmul.f32 %v2381_v50, %v3842_v14  ;;  %v890_v14 = vadd.f32 %v3998_v63, %v824_v0  ;;  %v1390_v43 = vmul.f32 %v1387_v42, %v1387_v42 }
 0x361   : > { %v1003_v29 = vadd.f32 %v3213_v3, %v937_v51 }
 0x362   : > { %v1386_v61 = vsub.f32 %v1371_v32, %v1383_v36  ;;  %v938_v4 = vadd.f32 %v3188_v16, %v890_v14  ;;  %v1393_v50 = vadd.f32 0.1, %v1390_v43 }
 0x363   : > { %v1069_v32 = vadd.f32 %v3377_v28, %v1003_v29 }
 0x364   : > { %v1389_v38 = vmul.f32 %v1386_v61, %v1386_v61  ;;  %v1004_v26 = vadd.f32 %v3215_v15, %v938_v4  ;;  %2388 = vrcp.f32 %v1393_v50 }
 0x366   : > { %v3891_v27 = vpop.eup %2382  ;;  %v1392_v62 = vadd.f32 0.1, %v1389_v38  ;;  %v1070_v36 = vadd.f32 %v1067_v37, %v1004_v26  ;;  %v3999_v38 = vld [vmem:[#allocation9_spill] sm:$0xff] }
 0x367   : > { %1797 = vrot.lane.b32.xlu0 %v3891_v27, %s2440_s23 }
 0x368   : > { %2390 = vrcp.f32 %v1392_v62 }
 0x369   : > { %v3899_v8 = vpop.eup %2384 }
 0x36a   : > { %v3902_v53 = vpop.eup %2386  ;;  %1799 = vrot.lane.b32.xlu1 %v3899_v8, %s2440_s23 }
 0x36b   : > { %1801 = vrot.lane.b32.xlu0 %v3902_v53, %s2440_s23 }
 0x36d   : > { %v1129_v2 = vpop.permute.xlu1 %1128 }
 0x36e   : > { %v1134_v23 = vadd.f32 %v1129_v2, %v1068_v39  ;;  %v2389_v0 = vpop.eup %2388 }
 0x370   : > { %v1131_v33 = vpop.permute.xlu0 %1130  ;;  %v1137_v3 = vrot.slane %v1134_v23, 2 }
 0x371   : > { %v1133_v19 = vpop.permute.xlu1 %1132  ;;  %v1135_v40 = vadd.f32 %v1131_v33, %v1069_v32 }
 0x372   : > { %v1136_v16 = vadd.f32 %v1133_v19, %v1070_v36  ;;  %v2391_v57 = vpop.eup %2390 }
 0x373   : > { %v1138_v59 = vrot.slane %v1135_v40, 2 }
 0x374   : > { %v1139_v49 = vrot.slane %v1136_v16, 2  ;;  %v4000_v16 = vld [vmem:[#allocation10_spill] sm:$0xff] }
 0x375   : > { %v1142_v35 = vsel %vm1140_vm4, %v1137_v3, %v1138_v59 }
 0x376   : > { %v1143_v54 = vsel %vm1140_vm4, %v1139_v49, %v1137_v3  ;;  %v1141_v6 = vsel %vm1140_vm4, %v1138_v59, %v1139_v49  ;;  %v1144_v15 = vadd.f32 %v1142_v35, %v3509_v12 }
 0x377   : > { %v1146_v28 = vadd.f32 %v1143_v54, %v3526_v55  ;;  %v1145_v42 = vadd.f32 %v1141_v6, %v3532_v60  ;;  %v4001_v54 = vld [vmem:[#allocation11_spill] sm:$0xff] }
 0x378   : > { %v1214_v3 = vadd.f32 %v4000_v16, %v1144_v15 }
 0x379   : > { %v1216_v25 = vadd.f32 %v3566_v47, %v1146_v28  ;;  %v1215_v13 = vadd.f32 %v3562_v46, %v1145_v42 }
 0x37a   : > { %v1277_v6 = vadd.f32 %v4001_v54, %v1214_v3 }
 0x37b   : > { %v1279_v61 = vadd.f32 %v3614_v7, %v1216_v25  ;;  %v1278_v11 = vadd.f32 %v3610_v9, %v1215_v13  ;;  %v2411_v7 = vld [vmem:[%s2484_s16] sm:$0xff] }
 0x37d   : > { %v1345_v63 = vadd.f32 %v3662_v48, %v1279_v61  ;;  %v1344_v12 = vadd.f32 %v3658_v24, %v1278_v11  ;;  %v1355_v48 = vsub.f32 %v3247_v56, %v2411_v7  ;;  %v2412_v24 = vld [vmem:[%s2490_s19] sm:$0xff]  ;;  %v4002_v11 = vld [vmem:[#allocation12_spill] sm:$0xff] }
 0x37e   : > { %v1358_v5 = vsub.f32 %v3999_v38, %v2412_v24 }
 0x37f   : > { %v1399_v14 = vadd.f32 %v2389_v0, %v1345_v63  ;;  %v1398_v55 = vadd.f32 %v2391_v57, %v1344_v12  ;;  %v1361_v51 = vmul.f32 %v1355_v48, %v1355_v48  ;;  %v1343_v63 = vadd.f32 %v4002_v11, %v1277_v6 }
 0x381   : > { %v1459_v60 = vadd.f32 %v3710_v41, %v1399_v14  ;;  %v1458_v47 = vadd.f32 %v3706_v45, %v1398_v55  ;;  %v1373_v41 = vmul.f32 %v1358_v5, %v1358_v5  ;;  %v1364_v4 = vadd.f32 0.81, %v1361_v51 }
 0x383   : > { %v1525_v30 = vadd.f32 %v3758_v58, %v1459_v60  ;;  %v1524_v46 = vadd.f32 %v3754_v10, %v1458_v47  ;;  %v1376_v45 = vadd.f32 0.81, %v1373_v41  ;;  %2392 = vrsqrt.f32 %v1364_v4  ;;  %v1218_v58 = vpop.permute.xlu0 %1217  ;;  %v1220_v10 = vpop.permute.xlu1 %1219 }
 0x385   : > { %v3930_v43 = vadd.f32 %v3820_v18, %v1525_v30  ;;  %v3933_v9 = vadd.f32 %v3812_v22, %v1524_v46  ;;  %2394 = vrsqrt.f32 %v1376_v45 }
 0x387   : > { %v1222_v29 = vpop.permute.xlu0 %1221  ;;  %v1281_v39 = vpop.permute.xlu1 %1280 }
 0x388   : > { %v1286_v28 = vadd.f32 %v1281_v39, %v1218_v58  ;;  %v4003_v58 = vld [vmem:[#allocation13_spill] sm:$0xff] }
 0x38b   : > { %v1283_v50 = vpop.permute.xlu0 %1282  ;;  %v1285_v26 = vpop.permute.xlu1 %1284 }
 0x38c   : > { %v1287_v35 = vadd.f32 %v1283_v50, %v1220_v10  ;;  %v1288_v13 = vadd.f32 %v1285_v26, %v1222_v29 }
 0x38d   : > { %v2393_v37 = vpop.eup %2392 }
 0x38e   : > { %v1370_v22 = vmul.f32 %v2393_v37, %v1355_v48 }
 0x38f   : > { %v2395_v18 = vpop.eup %2394 }
 0x390   : > { %v1382_v2 = vmul.f32 %v2395_v18, %v1358_v5 }
 0x391   : > { %v1347_v62 = vpop.permute.xlu0 %1346 }
 0x392   : > { %v1385_v56 = vsub.f32 %v1370_v22, %v1382_v2  ;;  %v1352_v61 = vadd.f32 %v1347_v62, %v1286_v28 }
 0x394   : > { %v1349_v32 = vpop.permute.xlu1 %1348  ;;  %v1388_v23 = vmul.f32 %v1385_v56, %v1385_v56 }
 0x395   : > { %v1351_v36 = vpop.permute.xlu0 %1350  ;;  %v1353_v42 = vadd.f32 %v1349_v32, %v1287_v35 }
 0x396   : > { %v1391_v33 = vadd.f32 0.1, %v1388_v23  ;;  %v1354_v12 = vadd.f32 %v1351_v36, %v1288_v13 }
 0x397   : > { %v1401_v60 = vadd.f32 %v2391_v57, %v1353_v42  ;;  %v4004_v57 = vld [vmem:[#allocation14_spill] sm:$0xff] }
 0x398   : > { %2396 = vrcp.f32 %v1391_v33  ;;  %v1402_v15 = vadd.f32 %v2389_v0, %v1354_v12 }
 0x39d   : > { %v1461_v19 = vpop.permute.xlu1 %1460 }
 0x3a0   : > { %v1463_v40 = vpop.permute.xlu0 %1462 }
 0x3a1   : > { %v1465_v59 = vpop.permute.xlu1 %1464  ;;  %v1467_v46 = vadd.f32 %v1463_v40, %v1401_v60 }
 0x3a2   : > { %v2397_v55 = vpop.eup %2396  ;;  %v1468_v5 = vadd.f32 %v1465_v59, %v1402_v15 }
 0x3a3   : > { %v1400_v30 = vadd.f32 %v2397_v55, %v1352_v61  ;;  %v1397_v48 = vadd.f32 %v2397_v55, %v1343_v63 }
 0x3a5   : > { %v1466_v24 = vadd.f32 %v1461_v19, %v1400_v30  ;;  %v1457_v10 = vadd.f32 %v4003_v58, %v1397_v48 }
 0x3a7   : > { %v1523_v39 = vadd.f32 %v4004_v57, %v1457_v10 }
 0x3a9   : > { %v1527_v49 = vpop.permute.xlu0 %1526  ;;  %v1589_v26 = vadd.f32 %v3796_v44, %v1523_v39 }
 0x3aa   : > { %v1532_v51 = vadd.f32 %v1527_v49, %v1466_v24 }
 0x3ac   : > { %v1529_v25 = vpop.permute.xlu1 %1528 }
 0x3ad   : > { %v1531_v14 = vpop.permute.xlu0 %1530  ;;  %v1533_v38 = vadd.f32 %v1529_v25, %v1467_v46 }
 0x3ae   : > { %v1534_v45 = vadd.f32 %v1531_v14, %v1468_v5 }
 0x3b5   : > { %v1593_v47 = vpop.permute.xlu1 %1592 }
 0x3b6   : > { %v1598_v37 = vadd.f32 %v1593_v47, %v1532_v51 }
 0x3b8   : > { %v1595_v7 = vpop.permute.xlu0 %1594  ;;  %v1601_v22 = vrot.slane %v1598_v37, 1 }
 0x3b9   : > { %v1597_v41 = vpop.permute.xlu1 %1596  ;;  %v1599_v4 = vadd.f32 %v1595_v7, %v1533_v38 }
 0x3ba   : > { %v1600_v18 = vadd.f32 %v1597_v41, %v1534_v45 }
 0x3bb   : > { %v1602_v29 = vrot.slane %v1599_v4, 1 }
 0x3bc   : > { %v1603_v0 = vrot.slane %v1600_v18, 1 }
 0x3bd   : > { %v1606_v2 = vsel %vm1604_vm5, %v1601_v22, %v1602_v29 }
 0x3be   : > { %v1605_v56 = vsel %vm1604_vm5, %v1602_v29, %v1603_v0  ;;  %v1608_v62 = vadd.f32 %v1606_v2, %v1589_v26  ;;  %v1607_v23 = vsel %vm1604_vm5, %v1603_v0, %v1601_v22 }
 0x3bf   : > { %v1609_v36 = vadd.f32 %v1605_v56, %v3933_v9  ;;  %v1610_v19 = vadd.f32 %v1607_v23, %v3930_v43 }
 0x3c0   : > { %v1665_v1 = vadd.f32 %v3852_v31, %v1608_v62 }
 0x3c1   : > { %v1669_v50 = vpop.permute.xlu0 %1668  ;;  %v1666_v3 = vadd.f32 %v3856_v20, %v1609_v36  ;;  %v1667_v44 = vadd.f32 %v3858_v34, %v1610_v19 }
 0x3c2   : > { %v1728_v59 = vadd.f32 %v3870_v52, %v1665_v1 }
 0x3c3   : > { %v1729_v6 = vadd.f32 %v3874_v17, %v1666_v3  ;;  %v1730_v43 = vadd.f32 %v3876_v21, %v1667_v44 }
 0x3c4   : > { %v1671_v32 = vpop.permute.xlu1 %1670  ;;  %v1794_v9 = vadd.f32 %v3891_v27, %v1728_v59 }
 0x3c5   : > { %v1673_v33 = vpop.permute.xlu0 %1672  ;;  %v1795_v34 = vadd.f32 %v3899_v8, %v1729_v6  ;;  %v1796_v17 = vadd.f32 %v3902_v53, %v1730_v43 }
 0x3cd   : > { %v1732_v40 = vpop.permute.xlu1 %1731 }
 0x3ce   : > { %v1737_v49 = vadd.f32 %v1732_v40, %v1669_v50 }
 0x3d0   : > { %v1734_v16 = vpop.permute.xlu0 %1733 }
 0x3d1   : > { %v1736_v35 = vpop.permute.xlu1 %1735  ;;  %v1738_v42 = vadd.f32 %v1734_v16, %v1671_v32 }
 0x3d2   : > { %v1739_v31 = vadd.f32 %v1736_v35, %v1673_v33 }
 0x3d9   : > { %v1798_v54 = vpop.permute.xlu0 %1797 }
 0x3da   : > { %v1803_v28 = vadd.f32 %v1798_v54, %v1737_v49 }
 0x3dc   : > { %v1806_v20 = vadd.f32 %v1803_v28, %v1794_v9  ;;  %v1800_v52 = vpop.permute.xlu1 %1799 }
 0x3dd   : > { %v1804_v25 = vadd.f32 %v1800_v52, %v1738_v42  ;;  %v1802_v13 = vpop.permute.xlu0 %1801 }
 0x3de   : > { %1809 = vst [vmem:[%s213_s28] sm:$0xff] %v1806_v20  ;;  %v1805_v61 = vadd.f32 %v1802_v13, %v1739_v31 }
 0x3df   : > { %v1807_v27 = vadd.f32 %v1804_v25, %v1795_v34 }
 0x3e0   : > { %v1808_v11 = vadd.f32 %v1805_v61, %v1796_v17 }
 0x3e1   : > { %1810 = vst [vmem:[%s213_s28 + $0x8] sm:$0xff] %v1807_v27 }
 0x3e2   : > { %1811 = vst [vmem:[%s213_s28 + $0x10] sm:$0xff] %v1808_v11 }
 0x3e3 PF: > { %s12_s11 = sadd.s32 1, %s2435_s11   ;;  %s4005_s9 = smov %s2431_s10 }
 0x3e4   : > { %p9_p5 = scmp.ge.s32.totalorder %s12_s11, 4   ;;  %s4006_s10 = smov %s4008_s12 }
 0x3e6   :  { %11 = sbr.rel (!%p9_p5) target bundleno = 2 (0x2), region = 61 }

</bundles_post_ra>
